<compile_context>
chip_gen: v7x
topology: tpu7x:2x2x1
jax: 0.10.0
libtpu: 0.0.40
codegen_flags: <defaults>
</compile_context>

<pallas_src>
import jax
import jax.numpy as jnp
import numpy as np
from jax.experimental import pallas as pl
from jax.experimental.pallas import tpu as pltpu


# ----------------------------------------------------------------------------
# Fused LeNet kernel
# ----------------------------------------------------------------------------
# Logical index encodings used below (all static, fixed at prep time):
#   conv1 matmul rows  (per image): rho = p*12 + e*6 + s   with ho = 4s + 2e + p
#   conv1 matmul cols            : pw*72 + co*12 + w1      with wo = 2*w1 + pw
#   p1 rows after pool1          : (h1 % 2)*6 + h1 // 2     (parity-split H)
#   p1 lanes                     : ci*12 + w1
#   conv2 matmul rows (per image): p2*4 + oh2               with oh = 2*oh2 + p2
#   conv2 matmul cols            : pw2*64 + co*4 + ow2      with ow = 2*ow2 + pw2
#   p2 lanes after pool2         : co*4 + w2 ; flatten index = h2*64 + co*4 + w2
def _lenet_kernel(x0_ref, x1_ref, x2_ref, x3_ref,
                  w1t_ref, b1_ref, w2t_ref, b2_ref,
                  fc1w_ref, fc1b_ref, fc2w_ref, fc2b_ref, fc3w_ref, fc3b_ref,
                  o_ref):
    bt = x0_ref.shape[0]
    xm = (x0_ref[...], x1_ref[...], x2_ref[...], x3_ref[...])   # 4 x (bt, 7, 28)

    # ---- conv1 as one MXU matmul over a Toeplitz-stacked weight -------------
    blocks = []
    for p in range(2):          # pool-pair parity of the output row
        for e in range(2):      # parity of the pooled row index h1
            pieces = []
            for di in range(5):
                q = 2 * e + p + di                       # input row = 4s + q
                pieces.append(xm[q % 4][:, q // 4:q // 4 + 6, :])   # (bt, 6, 28)
            blocks.append(jnp.concatenate(pieces, axis=2))          # (bt, 6, 140)
    x_stack = jnp.concatenate(blocks, axis=1)                       # (bt, 24, 140)

    a1 = jnp.dot(x_stack.reshape(bt * 24, 140), w1t_ref[...],
                 preferred_element_type=jnp.float32) + b1_ref[...]
    a1 = a1.reshape(bt, 24, 144)

    # pool1 (2x2 max) + relu: pairs are contiguous halves by construction.
    t = jnp.maximum(a1[:, 0:12, :], a1[:, 12:24, :])                # H pool
    t = jnp.maximum(t[:, :, 0:72], t[:, :, 72:144])                 # W pool
    p1 = jnp.maximum(t, 0.0)                                        # (bt, 12, 72)

    # ---- conv2 as one MXU matmul ---------------------------------------------
    blocks = []
    for pr in range(2):
        pieces = []
        for di in range(5):
            q = pr + di
            st = (q % 2) * 6 + q // 2          # contiguous slice of parity-split p1
            pieces.append(p1[:, st:st + 4, :])                      # (bt, 4, 72)
        blocks.append(jnp.concatenate(pieces, axis=2))              # (bt, 4, 360)
    p1_stack = jnp.concatenate(blocks, axis=1)                      # (bt, 8, 360)

    a2 = jnp.dot(p1_stack.reshape(bt * 8, 360), w2t_ref[...],
                 preferred_element_type=jnp.float32) + b2_ref[...]
    a2 = a2.reshape(bt, 8, 128)

    t = jnp.maximum(a2[:, 0:4, :], a2[:, 4:8, :])                   # H pool
    t = jnp.maximum(t[:, :, 0:64], t[:, :, 64:128])                 # W pool
    p2 = jnp.maximum(t, 0.0)                                        # (bt, 4, 64)

    # ---- flatten (h, c, w) lane order; fc1 weight is pre-permuted to match --
    flat = jnp.concatenate([p2[:, r, :] for r in range(4)], axis=1)  # (bt, 256)

    # ---- MLP on the MXU (f32 weights, lane-dense 128-wide output) -----------
    h = jnp.dot(flat, fc1w_ref[...], preferred_element_type=jnp.float32)
    h = jnp.maximum(h + fc1b_ref[...], 0.0)
    h = jnp.dot(h, fc2w_ref[...], preferred_element_type=jnp.float32)
    h = jnp.maximum(h + fc2b_ref[...], 0.0)
    o_ref[...] = jnp.dot(h, fc3w_ref[...],
                         preferred_element_type=jnp.float32) + fc3b_ref[...]


def _pick_bt(bp):
    for bt in (32, 16, 8):
        if bp % bt == 0:
            return bt
    return 8


def lenet_forward(x_nchw, prep):
    """LeNet forward; x_nchw: (B, 1, 28, 28) float32 -> (B, 10) logits."""
    b = x_nchw.shape[0]
    x = x_nchw.reshape(b, 28, 28)                       # C=1: squeeze, no transpose
    bp = ((b + 7) // 8) * 8
    if bp != b:
        x = jnp.pad(x, ((0, bp - b), (0, 0), (0, 0)))
    bt = _pick_bt(bp)
    # Split image rows by (row mod 4) once in XLA so every in-kernel window
    # slice is a static contiguous slice.
    xm = [x[:, k::4, :] for k in range(4)]              # 4 x (bp, 7, 28)

    out = pl.pallas_call(
        _lenet_kernel,
        out_shape=jax.ShapeDtypeStruct((bp, 128), jnp.float32),
        grid=(bp // bt,),
        in_specs=[pl.BlockSpec((bt, 7, 28), lambda i: (i, 0, 0))] * 4 + [
            pl.BlockSpec((140, 144), lambda i: (0, 0)),   # conv1 Toeplitz
            pl.BlockSpec((1, 144), lambda i: (0, 0)),
            pl.BlockSpec((360, 128), lambda i: (0, 0)),   # conv2 Toeplitz
            pl.BlockSpec((1, 128), lambda i: (0, 0)),
            pl.BlockSpec((256, 128), lambda i: (0, 0)),   # fc1
            pl.BlockSpec((1, 128), lambda i: (0, 0)),
            pl.BlockSpec((128, 128), lambda i: (0, 0)),   # fc2
            pl.BlockSpec((1, 128), lambda i: (0, 0)),
            pl.BlockSpec((128, 128), lambda i: (0, 0)),   # fc3
            pl.BlockSpec((1, 128), lambda i: (0, 0)),
        ],
        out_specs=pl.BlockSpec((bt, 128), lambda i: (i, 0)),
        compiler_params=pltpu.CompilerParams(
            dimension_semantics=("parallel",),
            vmem_limit_bytes=32 * 1024 * 1024),
    )(*xm, prep["w1t"], prep["b1"], prep["w2t"], prep["b2"],
      prep["fc1_w"], prep["fc1_b"], prep["fc2_w"], prep["fc2_b"],
      prep["fc3_w"], prep["fc3_b"])
    return out[:b, :10]


# ----------------------------------------------------------------------------
# Parameters (PyTorch layouts) and one-time kernel-friendly repack
# ----------------------------------------------------------------------------
def init_params(key):
    ks = jax.random.split(key, 10)

    def w(k, shape, fan_in):
        return jax.random.normal(k, shape, jnp.float32) / jnp.sqrt(fan_in)

    return {
        "conv1_w": w(ks[0], (6, 1, 5, 5), 25.0),
        "conv1_b": w(ks[1], (6,), 25.0),
        "conv2_w": w(ks[2], (16, 6, 5, 5), 150.0),
        "conv2_b": w(ks[3], (16,), 150.0),
        "fc1_w": w(ks[4], (120, 256), 256.0),
        "fc1_b": w(ks[5], (120,), 256.0),
        "fc2_w": w(ks[6], (84, 120), 120.0),
        "fc2_b": w(ks[7], (84,), 120.0),
        "fc3_w": w(ks[8], (10, 84), 84.0),
        "fc3_b": w(ks[9], (10,), 84.0),
    }


def prepare_params(p):
    """One-time repack (hoisted out of the hot path).

    Builds the Toeplitz-stacked conv weight matrices that let each conv run as
    a single MXU matmul, the matching bias rows, and fc weights transposed /
    permuted to the kernel's flatten order and zero-padded to 128 lanes (f32).
    """
    W1 = np.asarray(p["conv1_w"], np.float32)   # (6, 1, 5, 5)
    B1 = np.asarray(p["conv1_b"], np.float32)
    W2 = np.asarray(p["conv2_w"], np.float32)   # (16, 6, 5, 5)
    B2 = np.asarray(p["conv2_b"], np.float32)

    # conv1 Toeplitz (140, 144): row = di*28 + j_in, col = pw*72 + co*12 + w1.
    w1t = np.zeros((140, 144), np.float32)
    b1r = np.zeros((1, 144), np.float32)
    for pw in range(2):
        for co in range(6):
            for w1 in range(12):
                col = pw * 72 + co * 12 + w1
                wo = 2 * w1 + pw
                b1r[0, col] = B1[co]
                for di in range(5):
                    for dj in range(5):
                        w1t[di * 28 + wo + dj, col] = W1[co, 0, di, dj]

    # conv2 Toeplitz (360, 128): row = di*72 + ci*12 + w1, col = pw*64 + co*4 + ow2.
    w2t = np.zeros((360, 128), np.float32)
    b2r = np.zeros((1, 128), np.float32)
    for pw in range(2):
        for co in range(16):
            for ow2 in range(4):
                col = pw * 64 + co * 4 + ow2
                ow = 2 * ow2 + pw
                b2r[0, col] = B2[co]
                for di in range(5):
                    for ci in range(6):
                        for dj in range(5):
                            w2t[di * 72 + ci * 12 + ow + dj, col] = W2[co, ci, di, dj]

    # fc1: PyTorch input index is co*16 + h2*4 + w2; kernel flatten index is
    # h2*64 + co*4 + w2 -> permute, transpose, pad to 128 output lanes.
    fc1 = np.asarray(p["fc1_w"], np.float32)                       # (120, 256)
    fc1k = fc1.reshape(120, 16, 4, 4).transpose(2, 1, 3, 0).reshape(256, 120)
    fc1k = np.pad(fc1k, ((0, 0), (0, 8)))
    fc1b = np.pad(np.asarray(p["fc1_b"], np.float32), (0, 8)).reshape(1, 128)
    fc2k = np.pad(np.asarray(p["fc2_w"], np.float32).T, ((0, 8), (0, 44)))
    fc2b = np.pad(np.asarray(p["fc2_b"], np.float32), (0, 44)).reshape(1, 128)
    fc3k = np.pad(np.asarray(p["fc3_w"], np.float32).T, ((0, 44), (0, 118)))
    fc3b = np.pad(np.asarray(p["fc3_b"], np.float32), (0, 118)).reshape(1, 128)

    out = {"w1t": w1t, "b1": b1r, "w2t": w2t, "b2": b2r,
           "fc1_w": fc1k, "fc1_b": fc1b, "fc2_w": fc2k, "fc2_b": fc2b,
           "fc3_w": fc3k, "fc3_b": fc3b}
    return {k: jnp.asarray(v) for k, v in out.items()}


# ----------------------------------------------------------------------------
# Pure-JAX reference (faithful PyTorch LeNet semantics, f32)
# ----------------------------------------------------------------------------
def reference_forward(x_nchw, p):
    def conv(x, w, b):
        y = jax.lax.conv_general_dilated(
            x, w, window_strides=(1, 1), padding="VALID",
            dimension_numbers=("NCHW", "OIHW", "NCHW"))
        return y + b[None, :, None, None]

    def pool(x):
        b, c, h, w = x.shape
        return x.reshape(b, c, h // 2, 2, w // 2, 2).max(axis=(3, 5))

    x = jnp.maximum(pool(conv(x_nchw, p["conv1_w"], p["conv1_b"])), 0.0)
    x = jnp.maximum(pool(conv(x, p["conv2_w"], p["conv2_b"])), 0.0)
    x = x.reshape(x.shape[0], 16 * 4 * 4)
    x = jnp.maximum(x @ p["fc1_w"].T + p["fc1_b"], 0.0)
    x = jnp.maximum(x @ p["fc2_w"].T + p["fc2_b"], 0.0)
    return x @ p["fc3_w"].T + p["fc3_b"]


if __name__ == "__main__":
    key = jax.random.PRNGKey(0)
    kx, kp = jax.random.split(key)

    B = 8  # small MNIST-shaped batch (LeNet fc1 requires 28x28x1 inputs)
    x = jax.random.normal(kx, (B, 1, 28, 28), jnp.float32)
    params = init_params(kp)
    prep = prepare_params(params)      # one-time weight repack, outside the hot path

    fwd = jax.jit(lenet_forward)
    out = jax.block_until_ready(fwd(x, prep))
    assert out.shape == (B, 10), out.shape

    ref = jax.block_until_ready(reference_forward(x, params))
    max_err = float(jnp.max(jnp.abs(out - ref)))
    assert jnp.allclose(out, ref, rtol=1e-3, atol=1e-3), (
        f"mismatch vs reference (max abs err {max_err})")
    print("KERNEL_OK")
</pallas_src>

<mosaic_0001>
module attributes {stable_mosaic.version = 11 : i64} {
  func.func @_lenet_kernel(%arg0: i32, %arg1: memref<8x7x28xf32, #tpu.memory_space<vmem>>, %arg2: memref<8x7x28xf32, #tpu.memory_space<vmem>>, %arg3: memref<8x7x28xf32, #tpu.memory_space<vmem>>, %arg4: memref<8x7x28xf32, #tpu.memory_space<vmem>>, %arg5: memref<140x144xf32, #tpu.memory_space<vmem>>, %arg6: memref<1x144xf32, #tpu.memory_space<vmem>>, %arg7: memref<360x128xf32, #tpu.memory_space<vmem>>, %arg8: memref<1x128xf32, #tpu.memory_space<vmem>>, %arg9: memref<256x128xf32, #tpu.memory_space<vmem>>, %arg10: memref<1x128xf32, #tpu.memory_space<vmem>>, %arg11: memref<128x128xf32, #tpu.memory_space<vmem>>, %arg12: memref<1x128xf32, #tpu.memory_space<vmem>>, %arg13: memref<128x128xf32, #tpu.memory_space<vmem>>, %arg14: memref<1x128xf32, #tpu.memory_space<vmem>>, %arg15: memref<8x128xf32, #tpu.memory_space<vmem>>) attributes {dimension_semantics = [#tpu.dimension_semantics<parallel>], iteration_bounds = array<i64: 1>, scalar_prefetch = 0 : i64, scratch_operands = 0 : i64, tpu.core_type = #tpu.core_type<tc>, window_params = [{transform_indices = @transform_0, window_bounds = array<i64: 8, 7, 28>}, {transform_indices = @transform_1, window_bounds = array<i64: 8, 7, 28>}, {transform_indices = @transform_2, window_bounds = array<i64: 8, 7, 28>}, {transform_indices = @transform_3, window_bounds = array<i64: 8, 7, 28>}, {pipeline_mode = #tpu.pipeline_mode<synchronous>, transform_indices = @transform_4, window_bounds = array<i64: 140, 144>}, {pipeline_mode = #tpu.pipeline_mode<synchronous>, transform_indices = @transform_5, window_bounds = array<i64: 1, 144>}, {pipeline_mode = #tpu.pipeline_mode<synchronous>, transform_indices = @transform_6, window_bounds = array<i64: 360, 128>}, {pipeline_mode = #tpu.pipeline_mode<synchronous>, transform_indices = @transform_7, window_bounds = array<i64: 1, 128>}, {pipeline_mode = #tpu.pipeline_mode<synchronous>, transform_indices = @transform_8, window_bounds = array<i64: 256, 128>}, {pipeline_mode = #tpu.pipeline_mode<synchronous>, transform_indices = @transform_9, window_bounds = array<i64: 1, 128>}, {pipeline_mode = #tpu.pipeline_mode<synchronous>, transform_indices = @transform_10, window_bounds = array<i64: 128, 128>}, {pipeline_mode = #tpu.pipeline_mode<synchronous>, transform_indices = @transform_11, window_bounds = array<i64: 1, 128>}, {pipeline_mode = #tpu.pipeline_mode<synchronous>, transform_indices = @transform_12, window_bounds = array<i64: 128, 128>}, {pipeline_mode = #tpu.pipeline_mode<synchronous>, transform_indices = @transform_13, window_bounds = array<i64: 1, 128>}, {transform_indices = @transform_14, window_bounds = array<i64: 8, 128>}]} {
    %c0 = arith.constant 0 : index
    %c0_0 = arith.constant 0 : index
    %c0_1 = arith.constant 0 : index
    %0 = vector.load %arg1[%c0, %c0_0, %c0_1] : memref<8x7x28xf32, #tpu.memory_space<vmem>>, vector<8x7x28xf32>
    %c0_2 = arith.constant 0 : index
    %c0_3 = arith.constant 0 : index
    %c0_4 = arith.constant 0 : index
    %1 = vector.load %arg2[%c0_2, %c0_3, %c0_4] : memref<8x7x28xf32, #tpu.memory_space<vmem>>, vector<8x7x28xf32>
    %c0_5 = arith.constant 0 : index
    %c0_6 = arith.constant 0 : index
    %c0_7 = arith.constant 0 : index
    %2 = vector.load %arg3[%c0_5, %c0_6, %c0_7] : memref<8x7x28xf32, #tpu.memory_space<vmem>>, vector<8x7x28xf32>
    %c0_8 = arith.constant 0 : index
    %c0_9 = arith.constant 0 : index
    %c0_10 = arith.constant 0 : index
    %3 = vector.load %arg4[%c0_8, %c0_9, %c0_10] : memref<8x7x28xf32, #tpu.memory_space<vmem>>, vector<8x7x28xf32>
    %4 = vector.extract_strided_slice %0 {offsets = [0, 0, 0], sizes = [8, 6, 28], strides = [1, 1, 1]} : vector<8x7x28xf32> to vector<8x6x28xf32>
    %5 = vector.extract_strided_slice %1 {offsets = [0, 0, 0], sizes = [8, 6, 28], strides = [1, 1, 1]} : vector<8x7x28xf32> to vector<8x6x28xf32>
    %6 = vector.extract_strided_slice %2 {offsets = [0, 0, 0], sizes = [8, 6, 28], strides = [1, 1, 1]} : vector<8x7x28xf32> to vector<8x6x28xf32>
    %7 = vector.extract_strided_slice %3 {offsets = [0, 0, 0], sizes = [8, 6, 28], strides = [1, 1, 1]} : vector<8x7x28xf32> to vector<8x6x28xf32>
    %8 = vector.extract_strided_slice %0 {offsets = [0, 1, 0], sizes = [8, 6, 28], strides = [1, 1, 1]} : vector<8x7x28xf32> to vector<8x6x28xf32>
    %9 = tpu.concatenate %4, %5, %6, %7, %8 in 2 : vector<8x6x28xf32>, vector<8x6x28xf32>, vector<8x6x28xf32>, vector<8x6x28xf32>, vector<8x6x28xf32> -> vector<8x6x140xf32>
    %10 = vector.extract_strided_slice %2 {offsets = [0, 0, 0], sizes = [8, 6, 28], strides = [1, 1, 1]} : vector<8x7x28xf32> to vector<8x6x28xf32>
    %11 = vector.extract_strided_slice %3 {offsets = [0, 0, 0], sizes = [8, 6, 28], strides = [1, 1, 1]} : vector<8x7x28xf32> to vector<8x6x28xf32>
    %12 = vector.extract_strided_slice %0 {offsets = [0, 1, 0], sizes = [8, 6, 28], strides = [1, 1, 1]} : vector<8x7x28xf32> to vector<8x6x28xf32>
    %13 = vector.extract_strided_slice %1 {offsets = [0, 1, 0], sizes = [8, 6, 28], strides = [1, 1, 1]} : vector<8x7x28xf32> to vector<8x6x28xf32>
    %14 = vector.extract_strided_slice %2 {offsets = [0, 1, 0], sizes = [8, 6, 28], strides = [1, 1, 1]} : vector<8x7x28xf32> to vector<8x6x28xf32>
    %15 = tpu.concatenate %10, %11, %12, %13, %14 in 2 : vector<8x6x28xf32>, vector<8x6x28xf32>, vector<8x6x28xf32>, vector<8x6x28xf32>, vector<8x6x28xf32> -> vector<8x6x140xf32>
    %16 = vector.extract_strided_slice %1 {offsets = [0, 0, 0], sizes = [8, 6, 28], strides = [1, 1, 1]} : vector<8x7x28xf32> to vector<8x6x28xf32>
    %17 = vector.extract_strided_slice %2 {offsets = [0, 0, 0], sizes = [8, 6, 28], strides = [1, 1, 1]} : vector<8x7x28xf32> to vector<8x6x28xf32>
    %18 = vector.extract_strided_slice %3 {offsets = [0, 0, 0], sizes = [8, 6, 28], strides = [1, 1, 1]} : vector<8x7x28xf32> to vector<8x6x28xf32>
    %19 = vector.extract_strided_slice %0 {offsets = [0, 1, 0], sizes = [8, 6, 28], strides = [1, 1, 1]} : vector<8x7x28xf32> to vector<8x6x28xf32>
    %20 = vector.extract_strided_slice %1 {offsets = [0, 1, 0], sizes = [8, 6, 28], strides = [1, 1, 1]} : vector<8x7x28xf32> to vector<8x6x28xf32>
    %21 = tpu.concatenate %16, %17, %18, %19, %20 in 2 : vector<8x6x28xf32>, vector<8x6x28xf32>, vector<8x6x28xf32>, vector<8x6x28xf32>, vector<8x6x28xf32> -> vector<8x6x140xf32>
    %22 = vector.extract_strided_slice %3 {offsets = [0, 0, 0], sizes = [8, 6, 28], strides = [1, 1, 1]} : vector<8x7x28xf32> to vector<8x6x28xf32>
    %23 = vector.extract_strided_slice %0 {offsets = [0, 1, 0], sizes = [8, 6, 28], strides = [1, 1, 1]} : vector<8x7x28xf32> to vector<8x6x28xf32>
    %24 = vector.extract_strided_slice %1 {offsets = [0, 1, 0], sizes = [8, 6, 28], strides = [1, 1, 1]} : vector<8x7x28xf32> to vector<8x6x28xf32>
    %25 = vector.extract_strided_slice %2 {offsets = [0, 1, 0], sizes = [8, 6, 28], strides = [1, 1, 1]} : vector<8x7x28xf32> to vector<8x6x28xf32>
    %26 = vector.extract_strided_slice %3 {offsets = [0, 1, 0], sizes = [8, 6, 28], strides = [1, 1, 1]} : vector<8x7x28xf32> to vector<8x6x28xf32>
    %27 = tpu.concatenate %22, %23, %24, %25, %26 in 2 : vector<8x6x28xf32>, vector<8x6x28xf32>, vector<8x6x28xf32>, vector<8x6x28xf32>, vector<8x6x28xf32> -> vector<8x6x140xf32>
    %28 = tpu.concatenate %9, %15, %21, %27 in 1 : vector<8x6x140xf32>, vector<8x6x140xf32>, vector<8x6x140xf32>, vector<8x6x140xf32> -> vector<8x24x140xf32>
    %29 = vector.shape_cast %28 : vector<8x24x140xf32> to vector<192x140xf32>
    %c0_11 = arith.constant 0 : index
    %c0_12 = arith.constant 0 : index
    %30 = vector.load %arg5[%c0_11, %c0_12] : memref<140x144xf32, #tpu.memory_space<vmem>>, vector<140x144xf32>
    %cst = arith.constant dense<0.000000e+00> : vector<192x144xf32>
    %31 = tpu.matmul %29, %30, %cst {dimension_numbers = #tpu.dot_dimension_numbers<[1], [0], [0], [1], [0, 0, 1, 1], [], []>} : vector<192x140xf32>, vector<140x144xf32>, vector<192x144xf32> -> vector<192x144xf32>
    %c0_13 = arith.constant 0 : index
    %c0_14 = arith.constant 0 : index
    %32 = vector.load %arg6[%c0_13, %c0_14] : memref<1x144xf32, #tpu.memory_space<vmem>>, vector<1x144xf32>
    %33 = vector.broadcast %32 : vector<1x144xf32> to vector<192x144xf32>
    %34 = arith.addf %31, %33 : vector<192x144xf32>
    %35 = vector.shape_cast %34 : vector<192x144xf32> to vector<8x24x144xf32>
    %36 = vector.extract_strided_slice %35 {offsets = [0, 0, 0], sizes = [8, 12, 144], strides = [1, 1, 1]} : vector<8x24x144xf32> to vector<8x12x144xf32>
    %37 = vector.extract_strided_slice %35 {offsets = [0, 12, 0], sizes = [8, 12, 144], strides = [1, 1, 1]} : vector<8x24x144xf32> to vector<8x12x144xf32>
    %38 = arith.maximumf %36, %37 : vector<8x12x144xf32>
    %39 = vector.extract_strided_slice %38 {offsets = [0, 0, 0], sizes = [8, 12, 72], strides = [1, 1, 1]} : vector<8x12x144xf32> to vector<8x12x72xf32>
    %40 = vector.extract_strided_slice %38 {offsets = [0, 0, 72], sizes = [8, 12, 72], strides = [1, 1, 1]} : vector<8x12x144xf32> to vector<8x12x72xf32>
    %41 = arith.maximumf %39, %40 : vector<8x12x72xf32>
    %cst_15 = arith.constant 0.000000e+00 : f32
    %42 = vector.broadcast %cst_15 : f32 to vector<8x12x72xf32>
    %43 = arith.maximumf %41, %42 : vector<8x12x72xf32>
    %44 = vector.extract_strided_slice %43 {offsets = [0, 0, 0], sizes = [8, 4, 72], strides = [1, 1, 1]} : vector<8x12x72xf32> to vector<8x4x72xf32>
    %45 = vector.extract_strided_slice %43 {offsets = [0, 6, 0], sizes = [8, 4, 72], strides = [1, 1, 1]} : vector<8x12x72xf32> to vector<8x4x72xf32>
    %46 = vector.extract_strided_slice %43 {offsets = [0, 1, 0], sizes = [8, 4, 72], strides = [1, 1, 1]} : vector<8x12x72xf32> to vector<8x4x72xf32>
    %47 = vector.extract_strided_slice %43 {offsets = [0, 7, 0], sizes = [8, 4, 72], strides = [1, 1, 1]} : vector<8x12x72xf32> to vector<8x4x72xf32>
    %48 = vector.extract_strided_slice %43 {offsets = [0, 2, 0], sizes = [8, 4, 72], strides = [1, 1, 1]} : vector<8x12x72xf32> to vector<8x4x72xf32>
    %49 = tpu.concatenate %44, %45, %46, %47, %48 in 2 : vector<8x4x72xf32>, vector<8x4x72xf32>, vector<8x4x72xf32>, vector<8x4x72xf32>, vector<8x4x72xf32> -> vector<8x4x360xf32>
    %50 = vector.extract_strided_slice %43 {offsets = [0, 6, 0], sizes = [8, 4, 72], strides = [1, 1, 1]} : vector<8x12x72xf32> to vector<8x4x72xf32>
    %51 = vector.extract_strided_slice %43 {offsets = [0, 1, 0], sizes = [8, 4, 72], strides = [1, 1, 1]} : vector<8x12x72xf32> to vector<8x4x72xf32>
    %52 = vector.extract_strided_slice %43 {offsets = [0, 7, 0], sizes = [8, 4, 72], strides = [1, 1, 1]} : vector<8x12x72xf32> to vector<8x4x72xf32>
    %53 = vector.extract_strided_slice %43 {offsets = [0, 2, 0], sizes = [8, 4, 72], strides = [1, 1, 1]} : vector<8x12x72xf32> to vector<8x4x72xf32>
    %54 = vector.extract_strided_slice %43 {offsets = [0, 8, 0], sizes = [8, 4, 72], strides = [1, 1, 1]} : vector<8x12x72xf32> to vector<8x4x72xf32>
    %55 = tpu.concatenate %50, %51, %52, %53, %54 in 2 : vector<8x4x72xf32>, vector<8x4x72xf32>, vector<8x4x72xf32>, vector<8x4x72xf32>, vector<8x4x72xf32> -> vector<8x4x360xf32>
    %56 = tpu.concatenate %49, %55 in 1 : vector<8x4x360xf32>, vector<8x4x360xf32> -> vector<8x8x360xf32>
    %57 = vector.shape_cast %56 : vector<8x8x360xf32> to vector<64x360xf32>
    %c0_16 = arith.constant 0 : index
    %c0_17 = arith.constant 0 : index
    %58 = vector.load %arg7[%c0_16, %c0_17] : memref<360x128xf32, #tpu.memory_space<vmem>>, vector<360x128xf32>
    %cst_18 = arith.constant dense<0.000000e+00> : vector<64x128xf32>
    %59 = tpu.matmul %57, %58, %cst_18 {dimension_numbers = #tpu.dot_dimension_numbers<[1], [0], [0], [1], [0, 0, 1, 1], [], []>} : vector<64x360xf32>, vector<360x128xf32>, vector<64x128xf32> -> vector<64x128xf32>
    %c0_19 = arith.constant 0 : index
    %c0_20 = arith.constant 0 : index
    %60 = vector.load %arg8[%c0_19, %c0_20] : memref<1x128xf32, #tpu.memory_space<vmem>>, vector<1x128xf32>
    %61 = vector.broadcast %60 : vector<1x128xf32> to vector<64x128xf32>
    %62 = arith.addf %59, %61 : vector<64x128xf32>
    %63 = vector.shape_cast %62 : vector<64x128xf32> to vector<8x8x128xf32>
    %64 = vector.extract_strided_slice %63 {offsets = [0, 0, 0], sizes = [8, 4, 128], strides = [1, 1, 1]} : vector<8x8x128xf32> to vector<8x4x128xf32>
    %65 = vector.extract_strided_slice %63 {offsets = [0, 4, 0], sizes = [8, 4, 128], strides = [1, 1, 1]} : vector<8x8x128xf32> to vector<8x4x128xf32>
    %66 = arith.maximumf %64, %65 : vector<8x4x128xf32>
    %67 = vector.extract_strided_slice %66 {offsets = [0, 0, 0], sizes = [8, 4, 64], strides = [1, 1, 1]} : vector<8x4x128xf32> to vector<8x4x64xf32>
    %68 = vector.extract_strided_slice %66 {offsets = [0, 0, 64], sizes = [8, 4, 64], strides = [1, 1, 1]} : vector<8x4x128xf32> to vector<8x4x64xf32>
    %69 = arith.maximumf %67, %68 : vector<8x4x64xf32>
    %cst_21 = arith.constant 0.000000e+00 : f32
    %70 = vector.broadcast %cst_21 : f32 to vector<8x4x64xf32>
    %71 = arith.maximumf %69, %70 : vector<8x4x64xf32>
    %72 = vector.extract_strided_slice %71 {offsets = [0, 0, 0], sizes = [8, 1, 64], strides = [1, 1, 1]} : vector<8x4x64xf32> to vector<8x1x64xf32>
    %73 = vector.shape_cast %72 : vector<8x1x64xf32> to vector<8x64xf32>
    %74 = vector.extract_strided_slice %71 {offsets = [0, 1, 0], sizes = [8, 1, 64], strides = [1, 1, 1]} : vector<8x4x64xf32> to vector<8x1x64xf32>
    %75 = vector.shape_cast %74 : vector<8x1x64xf32> to vector<8x64xf32>
    %76 = vector.extract_strided_slice %71 {offsets = [0, 2, 0], sizes = [8, 1, 64], strides = [1, 1, 1]} : vector<8x4x64xf32> to vector<8x1x64xf32>
    %77 = vector.shape_cast %76 : vector<8x1x64xf32> to vector<8x64xf32>
    %78 = vector.extract_strided_slice %71 {offsets = [0, 3, 0], sizes = [8, 1, 64], strides = [1, 1, 1]} : vector<8x4x64xf32> to vector<8x1x64xf32>
    %79 = vector.shape_cast %78 : vector<8x1x64xf32> to vector<8x64xf32>
    %80 = tpu.concatenate %73, %75, %77, %79 in 1 : vector<8x64xf32>, vector<8x64xf32>, vector<8x64xf32>, vector<8x64xf32> -> vector<8x256xf32>
    %c0_22 = arith.constant 0 : index
    %c0_23 = arith.constant 0 : index
    %81 = vector.load %arg9[%c0_22, %c0_23] : memref<256x128xf32, #tpu.memory_space<vmem>>, vector<256x128xf32>
    %cst_24 = arith.constant dense<0.000000e+00> : vector<8x128xf32>
    %82 = tpu.matmul %80, %81, %cst_24 {dimension_numbers = #tpu.dot_dimension_numbers<[1], [0], [0], [1], [0, 0, 1, 1], [], []>} : vector<8x256xf32>, vector<256x128xf32>, vector<8x128xf32> -> vector<8x128xf32>
    %c0_25 = arith.constant 0 : index
    %c0_26 = arith.constant 0 : index
    %83 = vector.load %arg10[%c0_25, %c0_26] : memref<1x128xf32, #tpu.memory_space<vmem>>, vector<1x128xf32>
    %84 = vector.broadcast %83 : vector<1x128xf32> to vector<8x128xf32>
    %85 = arith.addf %82, %84 : vector<8x128xf32>
    %cst_27 = arith.constant 0.000000e+00 : f32
    %86 = vector.broadcast %cst_27 : f32 to vector<8x128xf32>
    %87 = arith.maximumf %85, %86 : vector<8x128xf32>
    %c0_28 = arith.constant 0 : index
    %c0_29 = arith.constant 0 : index
    %88 = vector.load %arg11[%c0_28, %c0_29] : memref<128x128xf32, #tpu.memory_space<vmem>>, vector<128x128xf32>
    %cst_30 = arith.constant dense<0.000000e+00> : vector<8x128xf32>
    %89 = tpu.matmul %87, %88, %cst_30 {dimension_numbers = #tpu.dot_dimension_numbers<[1], [0], [0], [1], [0, 0, 1, 1], [], []>} : vector<8x128xf32>, vector<128x128xf32>, vector<8x128xf32> -> vector<8x128xf32>
    %c0_31 = arith.constant 0 : index
    %c0_32 = arith.constant 0 : index
    %90 = vector.load %arg12[%c0_31, %c0_32] : memref<1x128xf32, #tpu.memory_space<vmem>>, vector<1x128xf32>
    %91 = vector.broadcast %90 : vector<1x128xf32> to vector<8x128xf32>
    %92 = arith.addf %89, %91 : vector<8x128xf32>
    %cst_33 = arith.constant 0.000000e+00 : f32
    %93 = vector.broadcast %cst_33 : f32 to vector<8x128xf32>
    %94 = arith.maximumf %92, %93 : vector<8x128xf32>
    %c0_34 = arith.constant 0 : index
    %c0_35 = arith.constant 0 : index
    %95 = vector.load %arg13[%c0_34, %c0_35] : memref<128x128xf32, #tpu.memory_space<vmem>>, vector<128x128xf32>
    %cst_36 = arith.constant dense<0.000000e+00> : vector<8x128xf32>
    %96 = tpu.matmul %94, %95, %cst_36 {dimension_numbers = #tpu.dot_dimension_numbers<[1], [0], [0], [1], [0, 0, 1, 1], [], []>} : vector<8x128xf32>, vector<128x128xf32>, vector<8x128xf32> -> vector<8x128xf32>
    %c0_37 = arith.constant 0 : index
    %c0_38 = arith.constant 0 : index
    %97 = vector.load %arg14[%c0_37, %c0_38] : memref<1x128xf32, #tpu.memory_space<vmem>>, vector<1x128xf32>
    %98 = vector.broadcast %97 : vector<1x128xf32> to vector<8x128xf32>
    %99 = arith.addf %96, %98 : vector<8x128xf32>
    %c0_39 = arith.constant 0 : index
    %c0_40 = arith.constant 0 : index
    %100 = vector.load %arg15[%c0_39, %c0_40] : memref<8x128xf32, #tpu.memory_space<vmem>>, vector<8x128xf32>
    tpu.vector_store %arg15[%c0_39, %c0_40], %99 {strides = array<i32>} : memref<8x128xf32, #tpu.memory_space<vmem>>, vector<8x128xf32>,
    return
  }
  func.func @transform_0(%arg0: i32) -> (i32, i32, i32) {
    %c0_i32 = arith.constant 0 : i32
    %c0_i32_0 = arith.constant 0 : i32
    %c0_i32_1 = arith.constant 0 : i32
    return %arg0, %c0_i32, %c0_i32_0 : i32, i32, i32
  }
  func.func @transform_1(%arg0: i32) -> (i32, i32, i32) {
    %c0_i32 = arith.constant 0 : i32
    %c0_i32_0 = arith.constant 0 : i32
    %c0_i32_1 = arith.constant 0 : i32
    return %arg0, %c0_i32, %c0_i32_0 : i32, i32, i32
  }
  func.func @transform_2(%arg0: i32) -> (i32, i32, i32) {
    %c0_i32 = arith.constant 0 : i32
    %c0_i32_0 = arith.constant 0 : i32
    %c0_i32_1 = arith.constant 0 : i32
    return %arg0, %c0_i32, %c0_i32_0 : i32, i32, i32
  }
  func.func @transform_3(%arg0: i32) -> (i32, i32, i32) {
    %c0_i32 = arith.constant 0 : i32
    %c0_i32_0 = arith.constant 0 : i32
    %c0_i32_1 = arith.constant 0 : i32
    return %arg0, %c0_i32, %c0_i32_0 : i32, i32, i32
  }
  func.func @transform_4(%arg0: i32) -> (i32, i32) {
    %c0_i32 = arith.constant 0 : i32
    %c0_i32_0 = arith.constant 0 : i32
    %c0_i32_1 = arith.constant 0 : i32
    return %c0_i32, %c0_i32_0 : i32, i32
  }
  func.func @transform_5(%arg0: i32) -> (i32, i32) {
    %c0_i32 = arith.constant 0 : i32
    %c0_i32_0 = arith.constant 0 : i32
    %c0_i32_1 = arith.constant 0 : i32
    return %c0_i32, %c0_i32_0 : i32, i32
  }
  func.func @transform_6(%arg0: i32) -> (i32, i32) {
    %c0_i32 = arith.constant 0 : i32
    %c0_i32_0 = arith.constant 0 : i32
    %c0_i32_1 = arith.constant 0 : i32
    return %c0_i32, %c0_i32_0 : i32, i32
  }
  func.func @transform_7(%arg0: i32) -> (i32, i32) {
    %c0_i32 = arith.constant 0 : i32
    %c0_i32_0 = arith.constant 0 : i32
    %c0_i32_1 = arith.constant 0 : i32
    return %c0_i32, %c0_i32_0 : i32, i32
  }
  func.func @transform_8(%arg0: i32) -> (i32, i32) {
    %c0_i32 = arith.constant 0 : i32
    %c0_i32_0 = arith.constant 0 : i32
    %c0_i32_1 = arith.constant 0 : i32
    return %c0_i32, %c0_i32_0 : i32, i32
  }
  func.func @transform_9(%arg0: i32) -> (i32, i32) {
    %c0_i32 = arith.constant 0 : i32
    %c0_i32_0 = arith.constant 0 : i32
    %c0_i32_1 = arith.constant 0 : i32
    return %c0_i32, %c0_i32_0 : i32, i32
  }
  func.func @transform_10(%arg0: i32) -> (i32, i32) {
    %c0_i32 = arith.constant 0 : i32
    %c0_i32_0 = arith.constant 0 : i32
    %c0_i32_1 = arith.constant 0 : i32
    return %c0_i32, %c0_i32_0 : i32, i32
  }
  func.func @transform_11(%arg0: i32) -> (i32, i32) {
    %c0_i32 = arith.constant 0 : i32
    %c0_i32_0 = arith.constant 0 : i32
    %c0_i32_1 = arith.constant 0 : i32
    return %c0_i32, %c0_i32_0 : i32, i32
  }
  func.func @transform_12(%arg0: i32) -> (i32, i32) {
    %c0_i32 = arith.constant 0 : i32
    %c0_i32_0 = arith.constant 0 : i32
    %c0_i32_1 = arith.constant 0 : i32
    return %c0_i32, %c0_i32_0 : i32, i32
  }
  func.func @transform_13(%arg0: i32) -> (i32, i32) {
    %c0_i32 = arith.constant 0 : i32
    %c0_i32_0 = arith.constant 0 : i32
    %c0_i32_1 = arith.constant 0 : i32
    return %c0_i32, %c0_i32_0 : i32, i32
  }
  func.func @transform_14(%arg0: i32) -> (i32, i32) {
    %c0_i32 = arith.constant 0 : i32
    %c0_i32_0 = arith.constant 0 : i32
    return %arg0, %c0_i32 : i32, i32
  }
}

</mosaic_0001>

<bundles_post_ra>
// kernel: lenet_forward.1
= control target key start
LH: loop header
LB: loop body
LE: loop exit
PB: predicated region body
PF: predicated region fallthrough
CT: control target
= control target key end

     0   :  { %19 = vsyncpa [#allocation3], 0  ;;  %s5490_s0 = inlined_call_operand.vmem [shape: f32[8,7,28], index: 0, kind: input, shape index: {}]   ;;  %s5491_s1 = inlined_call_operand.vmem [shape: f32[8,7,28], index: 1, kind: input, shape index: {}]   ;;  %s5492_s2 = inlined_call_operand.vmem [shape: f32[8,7,28], index: 2, kind: input, shape index: {}]   ;;  %s5493_s3 = inlined_call_operand.vmem [shape: f32[8,7,28], index: 3, kind: input, shape index: {}]   ;;  %s5494_s4 = inlined_call_operand.vmem [shape: f32[140,144], index: 4, kind: input, shape index: {}]   ;;  %s5495_s5 = inlined_call_operand.vmem [shape: f32[1,144], index: 5, kind: input, shape index: {}]   ;;  %s5496_s6 = inlined_call_operand.vmem [shape: f32[360,128], index: 6, kind: input, shape index: {}]   ;;  %s5497_s7 = inlined_call_operand.vmem [shape: f32[1,128], index: 7, kind: input, shape index: {}]   ;;  %s5498_s8 = inlined_call_operand.vmem [shape: f32[256,128], index: 8, kind: input, shape index: {}]   ;;  %s5499_s9 = inlined_call_operand.vmem [shape: f32[1,128], index: 9, kind: input, shape index: {}]   ;;  %s5500_s10 = inlined_call_operand.hbm [shape: f32[128,128], index: 10, kind: input, shape index: {}]   ;;  %s5501_s11 = inlined_call_operand.vmem [shape: f32[1,128], index: 11, kind: input, shape index: {}]   ;;  %s5502_s12 = inlined_call_operand.hbm [shape: f32[128,128], index: 12, kind: input, shape index: {}]   ;;  %s5503_s13 = inlined_call_operand.vmem [shape: f32[1,128], index: 13, kind: input, shape index: {}]   ;;  %s5504_s14 = inlined_call_operand.hbm [shape: f32[8,128], index: 14, kind: output, shape index: {}]  }
   0x1   :  { %20 = vsyncpa [#allocation6], 0 }
   0x2   :  { %21 = vsyncpa [#allocation4], 0  ;;  %s3755_s29 = smov [#allocation2]   ;;  %s3683_s17 = scalar_lea.hbm %s5500_s10, 2048 }
   0x3   :  { %s47_s30 = sshll.u32 %s3755_s29, 4  ;;  %p3684_p0 = scmp.ne.s32.totalorder %s5500_s10, %s3683_s17  ;;  %s48_s30 = int_to_ptr.vmem [resolvable:$true] %s47_s30 }
   0x4   :  { %p3687_p1 = scmp.lt.u32.totalorder %s3683_s17, %s5500_s10 }
   0x6   :  { %p3689_p2 = pnand %p3687_p1, %p3684_p0 }
   0x8   :  { %3692 = shalt.err (!%p3689_p2)
}
   0x9   :  { %s3693_s22 = scalar_lea.vmem %s48_s30, 2048  ;;  %p3698_p4 = scmp.lt.s32.totalorder %s48_s30, %s48_s30 }
   0xa   :  { %p3694_p3 = scmp.ne.s32.totalorder %s48_s30, %s3693_s22  ;;  %p3699_p5 = scmp.lt.s32.totalorder %s3693_s22, %s3693_s22 }
   0xc   :  { %p3700_p6 = por %p3699_p5, %p3698_p4 }
   0xe   :  { %p3701_p7 = pnand %p3700_p6, %p3694_p3 }
  0x10   :  { %3704 = shalt.err (!%p3701_p7)
}
  0x11   :  { %s3756_s23 = smov 128   ;;  %s3757_s24 = smov 8  }
  0x12   :  { %53 = dma.hbm_to_vmem [thread:$0]  %s5500_s10, 2048, %s48_s30, [#allocation3], %s3756_s23, %s3756_s23, %s3757_s24  }
  0x13   :  { %s3758_s27 = smov [#allocation5]   ;;  %s3705_s16 = scalar_lea.hbm %s5502_s12, 2048 }
  0x14   :  { %s61_s28 = sshll.u32 %s3758_s27, 4  ;;  %p3706_p8 = scmp.ne.s32.totalorder %s5502_s12, %s3705_s16  ;;  %s62_s28 = int_to_ptr.vmem [resolvable:$true] %s61_s28 }
  0x15   :  { %p3709_p9 = scmp.lt.u32.totalorder %s3705_s16, %s5502_s12 }
  0x17   :  { %p3711_p10 = pnand %p3709_p9, %p3706_p8 }
  0x19   :  { %3714 = shalt.err (!%p3711_p10)
}
  0x1a   :  { %s3715_s21 = scalar_lea.vmem %s62_s28, 2048  ;;  %p3720_p12 = scmp.lt.s32.totalorder %s62_s28, %s62_s28 }
  0x1b   :  { %p3716_p11 = scmp.ne.s32.totalorder %s62_s28, %s3715_s21  ;;  %p3721_p13 = scmp.lt.s32.totalorder %s3715_s21, %s3715_s21 }
  0x1d   :  { %p3722_p0 = por %p3721_p13, %p3720_p12 }
  0x1f   :  { %p3723_p1 = pnand %p3722_p0, %p3716_p11 }
  0x21   :  { %3726 = shalt.err (!%p3723_p1)
}
  0x22   :  { %67 = dma.hbm_to_vmem [thread:$0]  %s5502_s12, 2048, %s62_s28, [#allocation6], %s3756_s23, %s3756_s23, %s3757_s24  }
  0x23   :  { %3749 = dma.done.wait [#allocation3], 2048  }
  0x24   :  { %3750 = vsyncadd [#allocation3], 4294965248 }
  0x25   :  { %3751 = dma.done.wait [#allocation6], 2048  }
  0x26   :  { %3752 = vsyncadd [#allocation6], 4294965248  ;;  %v3875_v0 = vld [vmem:[%s5491_s1] sm:$0x7f]  ;;  %s3759_s24 = smov 28   ;;  %s3760_s28 = smov 84  }
  0x27   :  { %v3880_v1 = vld [vmem:[%s5493_s3] sm:$0x7f]  ;;  %v328_v4 = vrot.slane %v3875_v0, 1  ;;  %s3761_s16 = smov 56   ;;  %s3762_s17 = smov 112   ;;  %v860_v11 = vld [vmem:[%s5494_s4 + $0x8] sm:$0xff] }
  0x28   :  { %v3885_v2 = vld [vmem:[%s5490_s0] sm:$0x7f]  ;;  %v3328_v3 = vpack.i.bf16 %v3875_v0, %v3880_v1  ;;  %v862_v12 = vld [vmem:[%s5494_s4 + $0x18] sm:$0xff]  ;;  %v861_v14 = vld [vmem:[%s5494_s4 + $0x10] sm:$0xff]  ;;  %v624_v33 = vrot.slane %v3880_v1, 1  ;;  %vm825_vm0 = vcmask 1043456  }
  0x29   :  { %v3893_v5 = vld [vmem:[%s5492_s2] sm:$0x7f]  ;;  %v212_v6 = vrot.slane %v3885_v2, 1  ;;  %v3338_v7 = vpack.i.bf16 %v3880_v1, %v328_v4  ;;  %v864_v15 = vld [vmem:[%s5494_s4 + $0x28] sm:$0xff]  ;;  %v866_v16 = vld [vmem:[%s5494_s4 + $0x38] sm:$0xff]  ;;  %v3348_v17 = vpack.i.bf16 %v328_v4, %v3880_v1  ;;  %v3136_v18 = vpack.c.bf16 %v862_v12, %v860_v11  ;;  %s3765_s23 = smov 16  }
  0x2a   :  { %3329 = vrot.lane.b32.xlu0 %v3328_v3, %s3759_s24  ;;  %v360_v9 = vrot.slane %v3893_v5, 1  ;;  %v859_v13 = vld [vmem:[%s5494_s4] sm:$0xff]  ;;  %v865_v20 = vld [vmem:[%s5494_s4 + $0x30] sm:$0xff]  ;;  %v3140_v23 = vpack.c.bf16 %v866_v16, %v864_v15  ;;  %v868_v24 = vld [vmem:[%s5494_s4 + $0x48] sm:$0xff]  ;;  %vm3763_vm1 = vmmov 1   ;;  %vm244_vm3 = vcmask 228352  }
  0x2b   :  { %v3333_v8 = vpack.i.bf16 %v3893_v5, %v212_v6  ;;  %3339 = vrot.lane.b32.xlu1 %v3338_v7, %s3760_s28  ;;  %v3343_v10 = vpack.i.bf16 %v212_v6, %v3893_v5  ;;  %v863_v19 = vld [vmem:[%s5494_s4 + $0x20] sm:$0xff]  ;;  %v3138_v22 = vpack.c.bf16 %v861_v14, %v859_v13  ;;  %v870_v25 = vld [vmem:[%s5494_s4 + $0x58] sm:$0xff]  ;;  %v3940_v26 = vld [vmem:[%s5490_s0 + $0x8] sm:$0x7f]  ;;  %3137 = vmatprep.subr.bf16.mxu0 %v3136_v18  ;;  %vm253_vm4 = vcmask 457728  }
  0x2c   :  { %v3353_v21 = vpack.i.bf16 %v360_v9, %v212_v6  ;;  %v3946_v27 = vld [vmem:[%s5491_s1 + $0x8] sm:$0x7f]  ;;  %v3142_v28 = vpack.c.bf16 %v865_v20, %v863_v19  ;;  %v3144_v30 = vpack.c.bf16 %v870_v25, %v868_v24  ;;  %v867_v31 = vld [vmem:[%s5494_s4 + $0x40] sm:$0xff]  ;;  %v869_v32 = vld [vmem:[%s5494_s4 + $0x50] sm:$0xff]  ;;  %v213_v34 = vrot.slane %v3940_v26, 1 }
  0x2d   :  { %3139 = vmatpush1.bf16.msra.mxu0 %v3138_v22  ;;  %v3951_v29 = vld [vmem:[%s5493_s3 + $0x8] sm:$0x7f]  ;;  %v874_v36 = vld [vmem:[%s5494_s4 + $0x78] sm:$0xff]  ;;  %v329_v39 = vrot.slane %v3946_v27, 1  ;;  %v3146_v40 = vpack.c.bf16 %v869_v32, %v867_v31  ;;  %v871_v42 = vld [vmem:[%s5494_s4 + $0x60] sm:$0xff]  ;;  %vm262_vm5 = vcmask 687104  }
  0x2e   :  { %3334 = vrot.lane.b32.xlu0 %v3333_v8, %s3761_s16  ;;  %3141 = vmatprep.subr.bf16.mxu0 %v3140_v23  ;;  %v872_v35 = vld [vmem:[%s5494_s4 + $0x68] sm:$0xff]  ;;  %v3358_v38 = vpack.i.bf16 %v3946_v27, %v3951_v29  ;;  %v873_v43 = vld [vmem:[%s5494_s4 + $0x70] sm:$0xff]  ;;  %v878_v46 = vld [vmem:[%s5494_s4 + $0x98] sm:$0xff]  ;;  %vm271_vm6 = vcmask 916480   ;;  %vm808_vm7 = vcmask 1045504   ;;  %vm907_vm8 = vcmask 97280  }
  0x2f   :  { %368 = vrot.lane.b32.xlu1 %v360_v9, %s3762_s17  ;;  %v3971_v37 = vld [vmem:[%s5492_s2 + $0x8] sm:$0x7f]  ;;  %v3148_v41 = vpack.c.bf16 %v874_v36, %v872_v35  ;;  %v3368_v47 = vpack.i.bf16 %v3951_v29, %v329_v39  ;;  %v3150_v48 = vpack.c.bf16 %v873_v43, %v871_v42  ;;  %v875_v50 = vld [vmem:[%s5494_s4 + $0x80] sm:$0xff]  ;;  %v877_v51 = vld [vmem:[%s5494_s4 + $0x90] sm:$0xff]  ;;  %v3378_v62 = vpack.i.bf16 %v329_v39, %v3951_v29 }
  0x30   :  { %v3363_v44 = vpack.i.bf16 %v3971_v37, %v213_v34  ;;  %v876_v45 = vld [vmem:[%s5494_s4 + $0x88] sm:$0xff]  ;;  %v361_v52 = vrot.slane %v3971_v37, 1  ;;  %v882_v54 = vld [vmem:[%s5494_s4 + $0xb8] sm:$0xff]  ;;  %v3373_v55 = vpack.i.bf16 %v213_v34, %v3971_v37  ;;  %v3154_v56 = vpack.c.bf16 %v877_v51, %v875_v50  ;;  %v879_v58 = vld [vmem:[%s5494_s4 + $0xa0] sm:$0xff] }
  0x31   :  { %3143 = vmatpush1.bf16.msra.mxu0 %v3142_v28  ;;  %v3152_v49 = vpack.c.bf16 %v878_v46, %v876_v45  ;;  %v880_v53 = vld [vmem:[%s5494_s4 + $0xa8] sm:$0xff]  ;;  %v881_v59 = vld [vmem:[%s5494_s4 + $0xb0] sm:$0xff]  ;;  %v886_v61 = vld [vmem:[%s5494_s4 + $0xd8] sm:$0xff]  ;;  %vm842_vm9 = vcmask 1041408   ;;  %vm1744_vm10 = vcmask 1046528   ;;  %vm1595_vm11 = vcmask 1040384  }
  0x32   :  { %3344 = vrot.lane.b32.xlu0 %v3343_v10, %s3759_s24  ;;  %3145 = vmatprep.subr.bf16.mxu0 %v3144_v30  ;;  %v3156_v57 = vpack.c.bf16 %v882_v54, %v880_v53  ;;  %v884_v60 = vld [vmem:[%s5494_s4 + $0xc8] sm:$0xff]  ;;  %v3158_v63 = vpack.c.bf16 %v881_v59, %v879_v58  ;;  %v3383_v7 = vpack.i.bf16 %v361_v52, %v213_v34  ;;  %v890_v9 = vld [vmem:[%s5494_s4 + $0xf8] sm:$0xff]  ;;  %v4040_v10 = vld [vmem:[%s5490_s0 + $0x10] sm:$0x7f]  ;;  %vm1703_vm12 = vcmask 261120  }
  0x33   :  { %220 = vrot.lane.b32.xlu1 %v212_v6, %s3762_s17  ;;  %v3160_v3 = vpack.c.bf16 %v886_v61, %v884_v60  ;;  %v885_v6 = vld [vmem:[%s5494_s4 + $0xd0] sm:$0xff]  ;;  %v888_v8 = vld [vmem:[%s5494_s4 + $0xe8] sm:$0xff]  ;;  %v887_v15 = vld [vmem:[%s5494_s4 + $0xe0] sm:$0xff]  ;;  %v214_v18 = vrot.slane %v4040_v10, 1  ;;  %vm1685_vm13 = vcmask 130048   ;;  %vm1694_vm14 = vcmask 719872  }
  0x34   :  { %v4046_v11 = vld [vmem:[%s5491_s1 + $0x10] sm:$0x7f]  ;;  %v3164_v14 = vpack.c.bf16 %v890_v9, %v888_v8  ;;  %v892_v19 = vld [vmem:[%s5494_s4 + $0x108] sm:$0xff]  ;;  %v894_v20 = vld [vmem:[%s5494_s4 + $0x118] sm:$0xf]  ;;  %vm1676_vm15 = vcmask 588800  }
  0x35   :  { %3147 = vmatpush1.bf16.msra.mxu0 %v3146_v40  ;;  %v4051_v13 = vld [vmem:[%s5493_s3 + $0x10] sm:$0x7f]  ;;  %v330_v23 = vrot.slane %v4046_v11, 1  ;;  %v3168_v25 = vpack.c.bf16 %v894_v20, %v892_v19  ;;  %v891_v28 = vld [vmem:[%s5494_s4 + $0x100] sm:$0xff]  ;;  %vm3169_vm2 = vmpackc.low %vm825_vm0, %vm3763_vm1  ;;  %vm2133_vm1 = vcmask 850944  }
  0x36   :  { %3349 = vrot.lane.b32.xlu0 %v3348_v17, %s3761_s16  ;;  %3149 = vmatprep.subr.bf16.mxu0 %v3148_v41  ;;  %v889_v16 = vld [vmem:[%s5494_s4 + $0xf0] sm:$0xff]  ;;  %v625_v17 = vrot.slane %v3951_v29, 1  ;;  %v3388_v22 = vpack.i.bf16 %v4046_v11, %v4051_v13  ;;  %v4105_v40 = vld [vmem:[%s5491_s1 + $0x18] sm:$0x7f]  ;;  %v626_v42 = vrot.slane %v4051_v13, 1 }
  0x37   :  { %3354 = vrot.lane.b32.xlu1 %v3353_v21, %s3760_s28  ;;  %v4071_v21 = vld [vmem:[%s5492_s2 + $0x10] sm:$0x7f]  ;;  %v3166_v24 = vpack.c.bf16 %v889_v16, %v887_v15  ;;  %v3398_v32 = vpack.i.bf16 %v4051_v13, %v330_v23  ;;  %v3408_v36 = vpack.i.bf16 %v330_v23, %v4051_v13  ;;  %v4110_v41 = vld [vmem:[%s5493_s3 + $0x18] sm:$0x7f]  ;;  %v331_v46 = vrot.slane %v4105_v40, 1 }
  0x38   :  { %v893_v30 = vld [vmem:[%s5494_s4 + $0x110] sm:$0xf]  ;;  %v3393_v31 = vpack.i.bf16 %v4071_v21, %v214_v18  ;;  %v3403_v35 = vpack.i.bf16 %v214_v18, %v4071_v21  ;;  %v3418_v45 = vpack.i.bf16 %v4105_v40, %v4110_v41  ;;  %v4139_v53 = vld [vmem:[%s5490_s0 + $0x20] sm:$0x7f]  ;;  %v4185_v8 = vld [vmem:[%s5491_s1 + $0x28] sm:$0x7f] }
  0x39   :  { %3151 = vmatpush1.bf16.msra.mxu0 %v3150_v48  ;;  %v3428_v48 = vpack.i.bf16 %v4110_v41, %v331_v46  ;;  %v3438_v51 = vpack.i.bf16 %v331_v46, %v4110_v41  ;;  %v4145_v54 = vld [vmem:[%s5491_s1 + $0x20] sm:$0x7f]  ;;  %v4190_v9 = vld [vmem:[%s5493_s3 + $0x28] sm:$0x7f] }
  0x3a   :  { %496 = vrot.lane.b32.xlu0 %v328_v4, %s3762_s17  ;;  %3153 = vmatprep.subr.bf16.mxu0 %v3152_v49  ;;  %v883_v4 = vld [vmem:[%s5494_s4 + $0xc0] sm:$0xff]  ;;  %v332_v60 = vrot.slane %v4145_v54, 1  ;;  %v4198_v15 = vld [vmem:[%s5492_s2 + $0x28] sm:$0x7f]  ;;  %v3478_v16 = vpack.i.bf16 %v4185_v8, %v4190_v9  ;;  %s3766_s4 = smov 88  }
  0x3b   :  { %632 = vrot.lane.b32.xlu1 %v624_v33, %s3762_s17  ;;  %v3162_v12 = vpack.c.bf16 %v885_v6, %v883_v4  ;;  %v3171_v33 = vpack.c.bf16 %v893_v30, %v891_v28  ;;  %v4158_v58 = vld [vmem:[%s5492_s2 + $0x20] sm:$0x7f]  ;;  %v365_v20 = vrot.slane %v4198_v15, 1  ;;  %v4225_v28 = vld [vmem:[%s5491_s1 + $0x30] sm:$0x7f] }
  0x3c   :  { %v4230_v30 = vld [vmem:[%s5493_s3 + $0x30] sm:$0x7f] }
  0x3d   :  { %3155 = vmatpush1.bf16.msra.mxu0 %v3154_v56  ;;  %v627_v56 = vrot.slane %v4110_v41, 1 }
  0x3e   :  { %3359 = vrot.lane.b32.xlu0 %v3358_v38, %s3759_s24  ;;  %3157 = vmatprep.subr.bf16.mxu0 %v3156_v57  ;;  %v216_v57 = vrot.slane %v4139_v53, 1 }
  0x3f   :  { %3364 = vrot.lane.b32.xlu1 %v3363_v44, %s3761_s16  ;;  %v4118_v44 = vld [vmem:[%s5492_s2 + $0x18] sm:$0x7f] }
  0x40   :  { %v363_v49 = vrot.slane %v4118_v44, 1  ;;  %v3453_v61 = vpack.i.bf16 %v4158_v58, %v216_v57 }
  0x41   :  { %3159 = vmatpush1.bf16.msra.mxu0 %v3158_v63  ;;  %v364_v63 = vrot.slane %v4158_v58, 1 }
  0x42   :  { %3369 = vrot.lane.b32.xlu0 %v3368_v47, %s3760_s28  ;;  %3161 = vmatprep.subr.bf16.mxu0 %v3160_v3  ;;  %v3463_v3 = vpack.i.bf16 %v216_v57, %v4158_v58 }
  0x43   :  { %370 = vrot.lane.b32.xlu1 %v361_v52, %s3762_s17  ;;  %v3473_v6 = vpack.i.bf16 %v364_v63, %v216_v57 }
  0x45   :  { %3163 = vmatpush1.bf16.msra.mxu0 %v3162_v12 }
  0x46   :  { %3374 = vrot.lane.b32.xlu0 %v3373_v55, %s3759_s24  ;;  %3165 = vmatprep.subr.bf16.mxu0 %v3164_v14  ;;  %v4150_v55 = vld [vmem:[%s5493_s3 + $0x20] sm:$0x7f] }
  0x47   :  { %222 = vrot.lane.b32.xlu1 %v213_v34, %s3762_s17  ;;  %v362_v34 = vrot.slane %v4071_v21, 1  ;;  %v3448_v59 = vpack.i.bf16 %v4145_v54, %v4150_v55  ;;  %v3468_v4 = vpack.i.bf16 %v332_v60, %v4150_v55  ;;  %v628_v12 = vrot.slane %v4150_v55, 1 }
  0x49   :  { %3167 = vmatpush1.bf16.msra.mxu0 %v3166_v24  ;;  %v3413_v38 = vpack.i.bf16 %v362_v34, %v214_v18 }
  0x4a   :  { %3379 = vrot.lane.b32.xlu0 %v3378_v62, %s3761_s16  ;;  %3170 = vmatprep.subr.msk.bf16.mxu0 %vm3169_vm2, %v3168_v25  ;;  %v3458_v62 = vpack.i.bf16 %v4150_v55, %v332_v60  ;;  %v4219_v25 = vld [vmem:[%s5490_s0 + $0x30] sm:$0x7f] }
  0x4b   :  { %3384 = vrot.lane.b32.xlu1 %v3383_v7, %s3760_s28  ;;  %v4179_v7 = vld [vmem:[%s5490_s0 + $0x28] sm:$0x7f] }
  0x4c   :  { %v217_v14 = vrot.slane %v4179_v7, 1 }
  0x4d   :  { %3173 = vmatpush1.bf16.msk.msra.mxu0 %vm3169_vm2, %v3171_v33  ;;  %v218_v33 = vrot.slane %v4219_v25, 1  ;;  %vm2460_vm2 = vcmask 1042434  }
  0x4e   :  { %498 = vrot.lane.b32.xlu0 %v329_v39, %s3762_s17  ;;  %v4099_v39 = vld [vmem:[%s5490_s0 + $0x18] sm:$0x7f]  ;;  %v3503_v24 = vpack.i.bf16 %v365_v20, %v217_v14 }
  0x4f   :  { %634 = vrot.lane.b32.xlu1 %v625_v17, %s3762_s17  ;;  %v215_v43 = vrot.slane %v4099_v39, 1  ;;  %v333_v17 = vrot.slane %v4185_v8, 1 }
  0x51   :  { %v3423_v47 = vpack.i.bf16 %v4118_v44, %v215_v43  ;;  %v3433_v50 = vpack.i.bf16 %v215_v43, %v4118_v44  ;;  %v3443_v52 = vpack.i.bf16 %v363_v49, %v215_v43  ;;  %v3488_v19 = vpack.i.bf16 %v4190_v9, %v333_v17 }
  0x52   :  { %3389 = vrot.lane.b32.xlu0 %v3388_v22, %s3759_s24  ;;  %v3493_v22 = vpack.i.bf16 %v217_v14, %v4198_v15 }
  0x53   :  { %3394 = vrot.lane.b32.xlu1 %v3393_v31, %s3761_s16 }
  0x56   :  { %3399 = vrot.lane.b32.xlu0 %v3398_v32, %s3760_s28  ;;  %v629_v32 = vrot.slane %v4190_v9, 1 }
  0x57   :  { %372 = vrot.lane.b32.xlu1 %v362_v34, %s3762_s17  ;;  %v4238_v34 = vld [vmem:[%s5492_s2 + $0x30] sm:$0x7f] }
  0x5a   :  { %3404 = vrot.lane.b32.xlu0 %v3403_v35, %s3759_s24 }
  0x5b   :  { %224 = vrot.lane.b32.xlu1 %v214_v18, %s3762_s17  ;;  %v3483_v18 = vpack.i.bf16 %v4198_v15, %v217_v14 }
  0x5e   :  { %3409 = vrot.lane.b32.xlu0 %v3408_v36, %s3761_s16 }
  0x5f   :  { %3414 = vrot.lane.b32.xlu1 %v3413_v38, %s3760_s28 }
  0x62   :  { %500 = vrot.lane.b32.xlu0 %v330_v23, %s3762_s17  ;;  %v3498_v23 = vpack.i.bf16 %v333_v17, %v4190_v9 }
  0x63   :  { %636 = vrot.lane.b32.xlu1 %v626_v42, %s3762_s17  ;;  %v3508_v42 = vpack.i.bf16 %v4225_v28, %v4230_v30 }
  0x66   :  { %3419 = vrot.lane.b32.xlu0 %v3418_v45, %s3759_s24 }
  0x67   :  { %3424 = vrot.lane.b32.xlu1 %v3423_v47, %s3761_s16 }
  0x6a   :  { %3429 = vrot.lane.b32.xlu0 %v3428_v48, %s3760_s28 }
  0x6b   :  { %374 = vrot.lane.b32.xlu1 %v363_v49, %s3762_s17 }
  0x6e   :  { %3434 = vrot.lane.b32.xlu0 %v3433_v50, %s3759_s24 }
  0x6f   :  { %226 = vrot.lane.b32.xlu1 %v215_v43, %s3762_s17  ;;  %v4244_v43 = vrot.slane %v4225_v28, 1 }
  0x72   :  { %3439 = vrot.lane.b32.xlu0 %v3438_v51, %s3761_s16 }
  0x73   :  { %3444 = vrot.lane.b32.xlu1 %v3443_v52, %s3760_s28 }
  0x76   :  { %502 = vrot.lane.b32.xlu0 %v331_v46, %s3762_s17  ;;  %v3513_v46 = vpack.i.bf16 %v4238_v34, %v218_v33 }
  0x77   :  { %638 = vrot.lane.b32.xlu1 %v627_v56, %s3762_s17  ;;  %v3518_v56 = vpack.i.bf16 %v4230_v30, %v4244_v43 }
  0x7a   :  { %3449 = vrot.lane.b32.xlu0 %v3448_v59, %s3759_s24 }
  0x7b   :  { %3454 = vrot.lane.b32.xlu1 %v3453_v61, %s3761_s16 }
  0x7e   :  { %3459 = vrot.lane.b32.xlu0 %v3458_v62, %s3760_s28  ;;  %v366_v62 = vrot.slane %v4238_v34, 1 }
  0x7f   :  { %376 = vrot.lane.b32.xlu1 %v364_v63, %s3762_s17 }
  0x82   :  { %3464 = vrot.lane.b32.xlu0 %v3463_v3, %s3759_s24  ;;  %v3523_v3 = vpack.i.bf16 %v218_v33, %v4238_v34 }
  0x83   :  { %228 = vrot.lane.b32.xlu1 %v216_v57, %s3762_s17 }
  0x86   :  { %3469 = vrot.lane.b32.xlu0 %v3468_v4, %s3761_s16 }
  0x87   :  { %3474 = vrot.lane.b32.xlu1 %v3473_v6, %s3760_s28 }
  0x8a   :  { %504 = vrot.lane.b32.xlu0 %v332_v60, %s3762_s17 }
  0x8b   :  { %640 = vrot.lane.b32.xlu1 %v628_v12, %s3762_s17 }
  0x8e   :  { %3479 = vrot.lane.b32.xlu0 %v3478_v16, %s3759_s24 }
  0x8f   :  { %3484 = vrot.lane.b32.xlu1 %v3483_v18, %s3761_s16 }
  0x92   :  { %3489 = vrot.lane.b32.xlu0 %v3488_v19, %s3760_s28 }
  0x93   :  { %378 = vrot.lane.b32.xlu1 %v365_v20, %s3762_s17 }
  0x96   :  { %3494 = vrot.lane.b32.xlu0 %v3493_v22, %s3759_s24 }
  0x97   :  { %230 = vrot.lane.b32.xlu1 %v217_v14, %s3762_s17 }
  0x9a   :  { %3499 = vrot.lane.b32.xlu0 %v3498_v23, %s3761_s16 }
  0x9b   :  { %3504 = vrot.lane.b32.xlu1 %v3503_v24, %s3760_s28 }
  0x9c   :  { %v3330_v31 = vpop.permute.xlu0 %3329 }
  0x9d   :  { %v3332_v35 = vunpack.i.h.bf16 %v3330_v31  ;;  %v3331_v36 = vunpack.i.l.bf16 %v3330_v31  ;;  %v3340_v38 = vpop.permute.xlu1 %3339 }
  0x9e   :  { %506 = vrot.lane.b32.xlu0 %v333_v17, %s3762_s17  ;;  %v3341_v51 = vunpack.i.l.bf16 %v3340_v38  ;;  %v3342_v60 = vunpack.i.h.bf16 %v3340_v38 }
  0x9f   :  { %642 = vrot.lane.b32.xlu1 %v629_v32, %s3762_s17  ;;  %v245_v49 = vsel %vm244_vm3, %v3885_v2, %v3332_v35  ;;  %v392_v50 = vsel %vm244_vm3, %v3893_v5, %v3331_v36  ;;  %v3528_v35 = vpack.i.bf16 %v4244_v43, %v4230_v30 }
  0xa0   :  { %v3335_v45 = vpop.permute.xlu0 %3334 }
  0xa1   :  { %v3337_v47 = vunpack.i.h.bf16 %v3335_v45  ;;  %v3336_v48 = vunpack.i.l.bf16 %v3335_v45  ;;  %v369_v52 = vpop.permute.xlu1 %368 }
  0xa2   :  { %3509 = vrot.lane.b32.xlu0 %v3508_v42, %s3759_s24  ;;  %v697_v63 = vrot.slane %v369_v52, 2 }
  0xa3   :  { %v400_v57 = vsel %vm253_vm4, %v392_v50, %v3336_v48  ;;  %v254_v59 = vsel %vm253_vm4, %v245_v49, %v3337_v47  ;;  %3514 = vrot.lane.b32.xlu1 %v3513_v46, %s3761_s16  ;;  %v3533_v47 = vpack.i.bf16 %v366_v62, %v218_v33  ;;  %v4284_v49 = vld [vmem:[%s5490_s0 + $0x38] sm:$0x7f] }
  0xa4   :  { %v408_v61 = vsel %vm262_vm5, %v400_v57, %v3341_v51  ;;  %v3345_v2 = vpop.permute.xlu0 %3344  ;;  %v263_v16 = vsel %vm262_vm5, %v254_v59, %v3342_v60  ;;  %v4293_v59 = vld [vmem:[%s5491_s1 + $0x38] sm:$0x7f]  ;;  %s3772_s1 = smov [#allocation7]  }
  0xa5   :  { %v416_v5 = vsel %vm271_vm6, %v408_v61, %v369_v52  ;;  %v3347_v6 = vunpack.i.h.bf16 %v3345_v2  ;;  %v3346_v12 = vunpack.i.l.bf16 %v3345_v2  ;;  %v221_v14 = vpop.permute.xlu1 %220  ;;  %v4298_v60 = vld [vmem:[%s5493_s3 + $0x38] sm:$0x7f]  ;;  %s3767_s3 = smov 72  }
  0xa6   :  { %v696_v4 = vrot.slane %v416_v5, 2  ;;  %3519 = vrot.lane.b32.xlu0 %v3518_v56, %s3760_s28  ;;  %v272_v17 = vsel %vm271_vm6, %v263_v16, %v221_v14  ;;  %v810_v18 = vsel %vm808_vm7, %v221_v14, %v697_v63  ;;  %v4304_v5 = vrot.slane %v4284_v49, 1  ;;  %v4311_v14 = vld [vmem:[%s5492_s2 + $0x38] sm:$0x7f] }
  0xa7   :  { %380 = vrot.lane.b32.xlu1 %v366_v62, %s3762_s17  ;;  %2846 = vmatprep.mubr.msk.f32.mxu0 %vm907_vm8, %v810_v18  ;;  %v656_v24 = vsel %vm244_vm3, %v3880_v1, %v3347_v6  ;;  %v520_v31 = vsel %vm244_vm3, %v3875_v0, %v3346_v12  ;;  %v630_v62 = vrot.slane %v4230_v30, 1  ;;  %v4318_v18 = vrot.slane %v4293_v59, 1 }
  0xa8   :  { %v3350_v19 = vpop.permute.xlu0 %3349  ;;  %v809_v20 = vsel %vm808_vm7, %v272_v17, %v696_v4  ;;  %v3538_v17 = vpack.i.bf16 %v4293_v59, %v4298_v60 }
  0xa9   :  { %v3352_v22 = vunpack.i.h.bf16 %v3350_v19  ;;  %v3351_v23 = vunpack.i.l.bf16 %v3350_v19  ;;  %1051 = vmatmul.mubr.f32.vlgmr.msra.gmra.mrb[0].mxu0 %v809_v20  ;;  %v3355_v32 = vpop.permute.xlu1 %3354 }
  0xaa   :  { %3524 = vrot.lane.b32.xlu0 %v3523_v3, %s3759_s24  ;;  %v3357_v36 = vunpack.i.h.bf16 %v3355_v32  ;;  %v3356_v38 = vunpack.i.l.bf16 %v3355_v32 }
  0xab   :  { %v528_v42 = vsel %vm253_vm4, %v520_v31, %v3351_v23  ;;  %v664_v45 = vsel %vm253_vm4, %v656_v24, %v3352_v22  ;;  %232 = vrot.lane.b32.xlu1 %v218_v33, %s3762_s17  ;;  %v3543_v23 = vpack.i.bf16 %v4311_v14, %v4304_v5 }
  0xac   :  { %v497_v46 = vpop.permute.xlu0 %496  ;;  %v536_v1 = vsel %vm262_vm5, %v528_v42, %v3356_v38  ;;  %v672_v0 = vsel %vm262_vm5, %v664_v45, %v3357_v36  ;;  %v3548_v36 = vpack.i.bf16 %v4298_v60, %v4318_v18 }
  0xad   :  { %v737_v48 = vrot.slane %v497_v46, 4  ;;  %v544_v50 = vsel %vm271_vm6, %v536_v1, %v497_v46  ;;  %v633_v51 = vpop.permute.xlu1 %632  ;;  %v367_v46 = vrot.slane %v4311_v14, 1 }
  0xae   :  { %3529 = vrot.lane.b32.xlu0 %v3528_v35, %s3761_s16  ;;  %v736_v52 = vrot.slane %v544_v50, 4  ;;  %v680_v56 = vsel %vm271_vm6, %v672_v0, %v633_v51  ;;  %v777_v33 = vrot.slane %v633_v51, 6 }
  0xaf   :  { %v827_v57 = vsel %vm825_vm0, %v697_v63, %v737_v48  ;;  %v776_v61 = vrot.slane %v680_v56, 6  ;;  %3534 = vrot.lane.b32.xlu1 %v3533_v47, %s3760_s28 }
  0xb0   :  { %v3360_v2 = vpop.permute.xlu0 %3359  ;;  %2847 = vmatprep.mubr.msk.f32.mxu0 %vm907_vm8, %v827_v57  ;;  %v826_v6 = vsel %vm825_vm0, %v696_v4, %v736_v52  ;;  %v844_v12 = vsel %vm842_vm9, %v737_v48, %v777_v33 }
  0xb1   :  { %v3362_v63 = vunpack.i.h.bf16 %v3360_v2  ;;  %v3361_v3 = vunpack.i.l.bf16 %v3360_v2  ;;  %v3365_v16 = vpop.permute.xlu1 %3364  ;;  %1057 = vmatmul.mubr.f32.gmra.mrb[2].mxu0 %v826_v6  ;;  %v843_v32 = vsel %vm842_vm9, %v736_v52, %v776_v61  ;;  %v3553_v52 = vpack.i.bf16 %v4304_v5, %v4311_v14 }
  0xb2   :  { %508 = vrot.lane.b32.xlu0 %v4244_v43, %s3762_s17  ;;  %v3367_v19 = vunpack.i.h.bf16 %v3365_v16  ;;  %v3366_v20 = vunpack.i.l.bf16 %v3365_v16  ;;  %2848 = vmatprep.mubr.msk.f32.mxu0 %vm907_vm8, %v844_v12 }
  0xb3   :  { %v393_v4 = vsel %vm244_vm3, %v3971_v37, %v3361_v3  ;;  %v246_v22 = vsel %vm244_vm3, %v3940_v26, %v3362_v63  ;;  %644 = vrot.lane.b32.xlu1 %v630_v62, %s3762_s17 }
  0xb4   :  { %v3370_v43 = vpop.permute.xlu0 %3369  ;;  %v401_v31 = vsel %vm253_vm4, %v393_v4, %v3366_v20  ;;  %v255_v38 = vsel %vm253_vm4, %v246_v22, %v3367_v19 }
  0xb5   :  { %v3371_v24 = vunpack.i.l.bf16 %v3370_v43  ;;  %v3372_v35 = vunpack.i.h.bf16 %v3370_v43  ;;  %v371_v37 = vpop.permute.xlu1 %370  ;;  %1063 = vmatmul.mubr.f32.gmra.mrb[4].mxu0 %v843_v32 }
  0xb6   :  { %3539 = vrot.lane.b32.xlu0 %v3538_v17, %s3759_s24  ;;  %v699_v1 = vrot.slane %v371_v37, 2 }
  0xb7   :  { %v409_v26 = vsel %vm262_vm5, %v401_v31, %v3371_v24  ;;  %3544 = vrot.lane.b32.xlu1 %v3543_v23, %s3761_s16  ;;  %v264_v51 = vsel %vm262_vm5, %v255_v38, %v3372_v35 }
  0xb8   :  { %v417_v42 = vsel %vm271_vm6, %v409_v26, %v371_v37  ;;  %v3375_v45 = vpop.permute.xlu0 %3374 }
  0xb9   :  { %v698_v47 = vrot.slane %v417_v42, 2  ;;  %v3377_v48 = vunpack.i.h.bf16 %v3375_v45  ;;  %v3376_v0 = vunpack.i.l.bf16 %v3375_v45  ;;  %v223_v50 = vpop.permute.xlu1 %222 }
  0xba   :  { %3549 = vrot.lane.b32.xlu0 %v3548_v36, %s3760_s28  ;;  %v273_v56 = vsel %vm271_vm6, %v264_v51, %v223_v50  ;;  %v812_v33 = vsel %vm808_vm7, %v223_v50, %v699_v1  ;;  %v631_v50 = vrot.slane %v4298_v60, 1 }
  0xbb   :  { %382 = vrot.lane.b32.xlu1 %v367_v46, %s3762_s17  ;;  %2849 = vmatprep.mubr.msk.f32.mxu0 %vm907_vm8, %v812_v33  ;;  %v811_v61 = vsel %vm808_vm7, %v273_v56, %v698_v47  ;;  %v657_v63 = vsel %vm244_vm3, %v3951_v29, %v3377_v48  ;;  %v521_v3 = vsel %vm244_vm3, %v3946_v27, %v3376_v0 }
  0xbc   :  { %v3380_v57 = vpop.permute.xlu0 %3379  ;;  %1069 = vmatmul.mubr.f32.gmra.mrb[6].mxu0 %v811_v61 }
  0xbd   :  { %v3382_v2 = vunpack.i.h.bf16 %v3380_v57  ;;  %v3381_v62 = vunpack.i.l.bf16 %v3380_v57  ;;  %v3385_v6 = vpop.permute.xlu1 %3384 }
  0xbe   :  { %3554 = vrot.lane.b32.xlu0 %v3553_v52, %s3759_s24  ;;  %v3387_v12 = vunpack.i.h.bf16 %v3385_v6  ;;  %v3386_v16 = vunpack.i.l.bf16 %v3385_v6 }
  0xbf   :  { %v529_v17 = vsel %vm253_vm4, %v521_v3, %v3381_v62  ;;  %v665_v4 = vsel %vm253_vm4, %v657_v63, %v3382_v2  ;;  %234 = vrot.lane.b32.xlu1 %v4304_v5, %s3762_s17 }
  0xc0   :  { %v499_v19 = vpop.permute.xlu0 %498  ;;  %v537_v20 = vsel %vm262_vm5, %v529_v17, %v3386_v16  ;;  %v673_v29 = vsel %vm262_vm5, %v665_v4, %v3387_v12 }
  0xc1   :  { %v739_v22 = vrot.slane %v499_v19, 4  ;;  %v545_v27 = vsel %vm271_vm6, %v537_v20, %v499_v19  ;;  %v635_v43 = vpop.permute.xlu1 %634 }
  0xc2   :  { %462 = vrot.lane.b32.xlu0 %v4298_v60, %s3761_s16  ;;  %v738_v23 = vrot.slane %v545_v27, 4  ;;  %v681_v24 = vsel %vm271_vm6, %v673_v29, %v635_v43  ;;  %v779_v31 = vrot.slane %v635_v43, 6 }
  0xc3   :  { %v829_v32 = vsel %vm825_vm0, %v699_v1, %v739_v22  ;;  %v778_v35 = vrot.slane %v681_v24, 6  ;;  %486 = vrot.lane.b32.xlu1 %v4304_v5, %s3760_s28 }
  0xc4   :  { %v3390_v37 = vpop.permute.xlu0 %3389  ;;  %2850 = vmatprep.mubr.msk.f32.mxu0 %vm907_vm8, %v829_v32  ;;  %v828_v38 = vsel %vm825_vm0, %v698_v47, %v738_v23  ;;  %v846_v42 = vsel %vm842_vm9, %v739_v22, %v779_v31 }
  0xc5   :  { %v3392_v36 = vunpack.i.h.bf16 %v3390_v37  ;;  %v3391_v26 = vunpack.i.l.bf16 %v3390_v37  ;;  %v3395_v45 = vpop.permute.xlu1 %3394  ;;  %1075 = vmatmul.mubr.f32.gmra.mrb[8].mxu0 %v828_v38  ;;  %v845_v56 = vsel %vm842_vm9, %v738_v23, %v778_v35 }
  0xc6   :  { %510 = vrot.lane.b32.xlu0 %v4318_v18, %s3762_s17  ;;  %v3397_v48 = vunpack.i.h.bf16 %v3395_v45  ;;  %v3396_v0 = vunpack.i.l.bf16 %v3395_v45  ;;  %2851 = vmatprep.mubr.msk.f32.mxu0 %vm907_vm8, %v846_v42 }
  0xc7   :  { %v394_v1 = vsel %vm244_vm3, %v4071_v21, %v3391_v26  ;;  %v247_v5 = vsel %vm244_vm3, %v4040_v10, %v3392_v36  ;;  %590 = vrot.lane.b32.xlu1 %v4318_v18, %s3761_s16 }
  0xc8   :  { %v3400_v47 = vpop.permute.xlu0 %3399  ;;  %v402_v52 = vsel %vm253_vm4, %v394_v1, %v3396_v0  ;;  %v256_v10 = vsel %vm253_vm4, %v247_v5, %v3397_v48 }
  0xc9   :  { %v3401_v51 = vunpack.i.l.bf16 %v3400_v47  ;;  %v3402_v33 = vunpack.i.h.bf16 %v3400_v47  ;;  %v373_v21 = vpop.permute.xlu1 %372  ;;  %1081 = vmatmul.mubr.f32.gmra.mrb[10].mxu0 %v845_v56 }
  0xca   :  { %614 = vrot.lane.b32.xlu0 %v367_v46, %s3760_s28  ;;  %v701_v62 = vrot.slane %v373_v21, 2 }
  0xcb   :  { %v410_v57 = vsel %vm262_vm5, %v402_v52, %v3401_v51  ;;  %646 = vrot.lane.b32.xlu1 %v631_v50, %s3762_s17  ;;  %v265_v12 = vsel %vm262_vm5, %v256_v10, %v3402_v33  ;;  %s3764_s17 = smov 32  }
  0xcc   :  { %v418_v61 = vsel %vm271_vm6, %v410_v57, %v373_v21  ;;  %v3405_v18 = vpop.permute.xlu0 %3404 }
  0xcd   :  { %v700_v2 = vrot.slane %v418_v61, 2  ;;  %v3407_v63 = vunpack.i.h.bf16 %v3405_v18  ;;  %v3406_v3 = vunpack.i.l.bf16 %v3405_v18  ;;  %v225_v6 = vpop.permute.xlu1 %224 }
  0xce   :  { %v274_v16 = vsel %vm271_vm6, %v265_v12, %v225_v6  ;;  %v814_v46 = vsel %vm808_vm7, %v225_v6, %v701_v62 }
  0xcf   :  { %2852 = vmatprep.mubr.msk.f32.mxu0 %vm907_vm8, %v814_v46  ;;  %v813_v4 = vsel %vm808_vm7, %v274_v16, %v700_v2  ;;  %v658_v22 = vsel %vm244_vm3, %v4051_v13, %v3407_v63  ;;  %v522_v29 = vsel %vm244_vm3, %v4046_v11, %v3406_v3 }
  0xd0   :  { %v3410_v17 = vpop.permute.xlu0 %3409  ;;  %1087 = vmatmul.mubr.f32.gmra.mrb[12].mxu0 %v813_v4 }
  0xd1   :  { %v3412_v19 = vunpack.i.h.bf16 %v3410_v17  ;;  %v3411_v20 = vunpack.i.l.bf16 %v3410_v17  ;;  %v3415_v27 = vpop.permute.xlu1 %3414 }
  0xd2   :  { %v3417_v43 = vunpack.i.h.bf16 %v3415_v27  ;;  %v3416_v23 = vunpack.i.l.bf16 %v3415_v27 }
  0xd3   :  { %v530_v24 = vsel %vm253_vm4, %v522_v29, %v3411_v20  ;;  %v666_v31 = vsel %vm253_vm4, %v658_v22, %v3412_v19 }
  0xd4   :  { %v501_v32 = vpop.permute.xlu0 %500  ;;  %v538_v35 = vsel %vm262_vm5, %v530_v24, %v3416_v23  ;;  %v674_v36 = vsel %vm262_vm5, %v666_v31, %v3417_v43 }
  0xd5   :  { %v741_v37 = vrot.slane %v501_v32, 4  ;;  %v546_v26 = vsel %vm271_vm6, %v538_v35, %v501_v32  ;;  %v637_v38 = vpop.permute.xlu1 %636 }
  0xd6   :  { %v740_v13 = vrot.slane %v546_v26, 4  ;;  %v682_v42 = vsel %vm271_vm6, %v674_v36, %v637_v38  ;;  %v781_v11 = vrot.slane %v637_v38, 6 }
  0xd7   :  { %v831_v45 = vsel %vm825_vm0, %v701_v62, %v741_v37  ;;  %v780_v1 = vrot.slane %v682_v42, 6 }
  0xd8   :  { %v3420_v48 = vpop.permute.xlu0 %3419  ;;  %2853 = vmatprep.mubr.msk.f32.mxu0 %vm907_vm8, %v831_v45  ;;  %v830_v47 = vsel %vm825_vm0, %v700_v2, %v740_v13  ;;  %v848_v50 = vsel %vm842_vm9, %v741_v37, %v781_v11 }
  0xd9   :  { %v3422_v0 = vunpack.i.h.bf16 %v3420_v48  ;;  %v3421_v5 = vunpack.i.l.bf16 %v3420_v48  ;;  %v3425_v51 = vpop.permute.xlu1 %3424  ;;  %1093 = vmatmul.mubr.f32.gmra.mrb[14].mxu0 %v830_v47  ;;  %v847_v18 = vsel %vm842_vm9, %v740_v13, %v780_v1 }
  0xda   :  { %v3427_v56 = vunpack.i.h.bf16 %v3425_v51  ;;  %v3426_v33 = vunpack.i.l.bf16 %v3425_v51  ;;  %2854 = vmatprep.mubr.msk.f32.mxu0 %vm907_vm8, %v848_v50 }
  0xdb   :  { %v395_v52 = vsel %vm244_vm3, %v4118_v44, %v3421_v5  ;;  %v248_v21 = vsel %vm244_vm3, %v4099_v39, %v3422_v0 }
  0xdc   :  { %v3430_v57 = vpop.permute.xlu0 %3429  ;;  %v403_v61 = vsel %vm253_vm4, %v395_v52, %v3426_v33  ;;  %v257_v44 = vsel %vm253_vm4, %v248_v21, %v3427_v56 }
  0xdd   :  { %v3431_v10 = vunpack.i.l.bf16 %v3430_v57  ;;  %v3432_v2 = vunpack.i.h.bf16 %v3430_v57  ;;  %v375_v62 = vpop.permute.xlu1 %374  ;;  %1099 = vmatmul.mubr.f32.gmra.mrb[16].mxu0 %v847_v18 }
  0xde   :  { %v703_v16 = vrot.slane %v375_v62, 2 }
  0xdf   :  { %v411_v63 = vsel %vm262_vm5, %v403_v61, %v3431_v10  ;;  %v266_v4 = vsel %vm262_vm5, %v257_v44, %v3432_v2 }
  0xe0   :  { %v419_v3 = vsel %vm271_vm6, %v411_v63, %v375_v62  ;;  %v3435_v6 = vpop.permute.xlu0 %3434 }
  0xe1   :  { %v702_v12 = vrot.slane %v419_v3, 2  ;;  %v3437_v46 = vunpack.i.h.bf16 %v3435_v6  ;;  %v3436_v39 = vunpack.i.l.bf16 %v3435_v6  ;;  %v227_v17 = vpop.permute.xlu1 %226 }
  0xe2   :  { %v275_v19 = vsel %vm271_vm6, %v266_v4, %v227_v17  ;;  %v816_v20 = vsel %vm808_vm7, %v227_v17, %v703_v16 }
  0xe3   :  { %2855 = vmatprep.mubr.msk.f32.mxu0 %vm907_vm8, %v816_v20  ;;  %v815_v29 = vsel %vm808_vm7, %v275_v19, %v702_v12  ;;  %v659_v23 = vsel %vm244_vm3, %v4110_v41, %v3437_v46  ;;  %v523_v24 = vsel %vm244_vm3, %v4105_v40, %v3436_v39 }
  0xe4   :  { %v3440_v22 = vpop.permute.xlu0 %3439  ;;  %1105 = vmatmul.mubr.f32.gmra.mrb[18].mxu0 %v815_v29 }
  0xe5   :  { %v3442_v27 = vunpack.i.h.bf16 %v3440_v22  ;;  %v3441_v43 = vunpack.i.l.bf16 %v3440_v22  ;;  %v3445_v31 = vpop.permute.xlu1 %3444 }
  0xe6   :  { %v3447_v32 = vunpack.i.h.bf16 %v3445_v31  ;;  %v3446_v35 = vunpack.i.l.bf16 %v3445_v31 }
  0xe7   :  { %v531_v37 = vsel %vm253_vm4, %v523_v24, %v3441_v43  ;;  %v667_v36 = vsel %vm253_vm4, %v659_v23, %v3442_v27 }
  0xe8   :  { %v503_v26 = vpop.permute.xlu0 %502  ;;  %v539_v38 = vsel %vm262_vm5, %v531_v37, %v3446_v35  ;;  %v675_v42 = vsel %vm262_vm5, %v667_v36, %v3447_v32 }
  0xe9   :  { %v743_v13 = vrot.slane %v503_v26, 4  ;;  %v547_v11 = vsel %vm271_vm6, %v539_v38, %v503_v26  ;;  %v639_v45 = vpop.permute.xlu1 %638 }
  0xea   :  { %v742_v41 = vrot.slane %v547_v11, 4  ;;  %v683_v1 = vsel %vm271_vm6, %v675_v42, %v639_v45  ;;  %v783_v40 = vrot.slane %v639_v45, 6 }
  0xeb   :  { %v833_v48 = vsel %vm825_vm0, %v703_v16, %v743_v13  ;;  %v782_v0 = vrot.slane %v683_v1, 6 }
  0xec   :  { %v3450_v5 = vpop.permute.xlu0 %3449  ;;  %2856 = vmatprep.mubr.msk.f32.mxu0 %vm907_vm8, %v833_v48  ;;  %v832_v51 = vsel %vm825_vm0, %v702_v12, %v742_v41  ;;  %v850_v52 = vsel %vm842_vm9, %v743_v13, %v783_v40 }
  0xed   :  { %v3452_v47 = vunpack.i.h.bf16 %v3450_v5  ;;  %v3451_v50 = vunpack.i.l.bf16 %v3450_v5  ;;  %v3455_v56 = vpop.permute.xlu1 %3454  ;;  %1111 = vmatmul.mubr.f32.gmra.mrb[20].mxu0 %v832_v51  ;;  %v849_v62 = vsel %vm842_vm9, %v742_v41, %v782_v0 }
  0xee   :  { %v3457_v21 = vunpack.i.h.bf16 %v3455_v56  ;;  %v3456_v57 = vunpack.i.l.bf16 %v3455_v56  ;;  %2857 = vmatprep.mubr.msk.f32.mxu0 %vm907_vm8, %v850_v52 }
  0xef   :  { %v396_v33 = vsel %vm244_vm3, %v4158_v58, %v3451_v50  ;;  %v249_v10 = vsel %vm244_vm3, %v4139_v53, %v3452_v47 }
  0xf0   :  { %v3460_v61 = vpop.permute.xlu0 %3459  ;;  %v404_v2 = vsel %vm253_vm4, %v396_v33, %v3456_v57  ;;  %v258_v58 = vsel %vm253_vm4, %v249_v10, %v3457_v21 }
  0xf1   :  { %v3461_v18 = vunpack.i.l.bf16 %v3460_v61  ;;  %v3462_v63 = vunpack.i.h.bf16 %v3460_v61  ;;  %v377_v44 = vpop.permute.xlu1 %376  ;;  %1117 = vmatmul.mubr.f32.gmra.mrb[22].mxu0 %v849_v62 }
  0xf2   :  { %v705_v46 = vrot.slane %v377_v44, 2 }
  0xf3   :  { %v412_v3 = vsel %vm262_vm5, %v404_v2, %v3461_v18  ;;  %v267_v4 = vsel %vm262_vm5, %v258_v58, %v3462_v63 }
  0xf4   :  { %v420_v6 = vsel %vm271_vm6, %v412_v3, %v377_v44  ;;  %v3465_v12 = vpop.permute.xlu0 %3464 }
  0xf5   :  { %v704_v16 = vrot.slane %v420_v6, 2  ;;  %v3467_v39 = vunpack.i.h.bf16 %v3465_v12  ;;  %v3466_v53 = vunpack.i.l.bf16 %v3465_v12  ;;  %v229_v17 = vpop.permute.xlu1 %228 }
  0xf6   :  { %v276_v19 = vsel %vm271_vm6, %v267_v4, %v229_v17  ;;  %v818_v20 = vsel %vm808_vm7, %v229_v17, %v705_v46 }
  0xf7   :  { %2858 = vmatprep.mubr.msk.f32.mxu0 %vm907_vm8, %v818_v20  ;;  %v817_v29 = vsel %vm808_vm7, %v276_v19, %v704_v16  ;;  %v660_v23 = vsel %vm244_vm3, %v4150_v55, %v3467_v39  ;;  %v524_v24 = vsel %vm244_vm3, %v4145_v54, %v3466_v53 }
  0xf8   :  { %v3470_v22 = vpop.permute.xlu0 %3469  ;;  %1123 = vmatmul.mubr.f32.gmra.mrb[24].mxu0 %v817_v29 }
  0xf9   :  { %v3472_v27 = vunpack.i.h.bf16 %v3470_v22  ;;  %v3471_v43 = vunpack.i.l.bf16 %v3470_v22  ;;  %v3475_v31 = vpop.permute.xlu1 %3474 }
  0xfa   :  { %v3477_v32 = vunpack.i.h.bf16 %v3475_v31  ;;  %v3476_v35 = vunpack.i.l.bf16 %v3475_v31 }
  0xfb   :  { %v532_v37 = vsel %vm253_vm4, %v524_v24, %v3471_v43  ;;  %v668_v36 = vsel %vm253_vm4, %v660_v23, %v3472_v27 }
  0xfc   :  { %v505_v26 = vpop.permute.xlu0 %504  ;;  %v540_v38 = vsel %vm262_vm5, %v532_v37, %v3476_v35  ;;  %v676_v42 = vsel %vm262_vm5, %v668_v36, %v3477_v32 }
  0xfd   :  { %v745_v13 = vrot.slane %v505_v26, 4  ;;  %v548_v11 = vsel %vm271_vm6, %v540_v38, %v505_v26  ;;  %v641_v45 = vpop.permute.xlu1 %640 }
  0xfe   :  { %v744_v55 = vrot.slane %v548_v11, 4  ;;  %v684_v41 = vsel %vm271_vm6, %v676_v42, %v641_v45  ;;  %v785_v54 = vrot.slane %v641_v45, 6 }
  0xff   :  { %v835_v1 = vsel %vm825_vm0, %v705_v46, %v745_v13  ;;  %v784_v40 = vrot.slane %v684_v41, 6 }
 0x100   :  { %v3480_v48 = vpop.permute.xlu0 %3479  ;;  %2859 = vmatprep.mubr.msk.f32.mxu0 %vm907_vm8, %v835_v1  ;;  %v834_v47 = vsel %vm825_vm0, %v704_v16, %v744_v55  ;;  %v852_v50 = vsel %vm842_vm9, %v745_v13, %v785_v54 }
 0x101   :  { %v3482_v0 = vunpack.i.h.bf16 %v3480_v48  ;;  %v3481_v5 = vunpack.i.l.bf16 %v3480_v48  ;;  %v3485_v51 = vpop.permute.xlu1 %3484  ;;  %1129 = vmatmul.mubr.f32.gmra.mrb[26].mxu0 %v834_v47  ;;  %v851_v18 = vsel %vm842_vm9, %v744_v55, %v784_v40 }
 0x102   :  { %v3487_v56 = vunpack.i.h.bf16 %v3485_v51  ;;  %v3486_v33 = vunpack.i.l.bf16 %v3485_v51  ;;  %2860 = vmatprep.mubr.msk.f32.mxu0 %vm907_vm8, %v852_v50 }
 0x103   :  { %v397_v52 = vsel %vm244_vm3, %v4198_v15, %v3481_v5  ;;  %v250_v21 = vsel %vm244_vm3, %v4179_v7, %v3482_v0 }
 0x104   :  { %v3490_v57 = vpop.permute.xlu0 %3489  ;;  %v405_v61 = vsel %vm253_vm4, %v397_v52, %v3486_v33  ;;  %v259_v15 = vsel %vm253_vm4, %v250_v21, %v3487_v56 }
 0x105   :  { %v3491_v10 = vunpack.i.l.bf16 %v3490_v57  ;;  %v3492_v2 = vunpack.i.h.bf16 %v3490_v57  ;;  %v379_v62 = vpop.permute.xlu1 %378  ;;  %1135 = vmatmul.mubr.f32.gmra.mrb[28].mxu0 %v851_v18 }
 0x106   :  { %v707_v6 = vrot.slane %v379_v62, 2 }
 0x107   :  { %v413_v63 = vsel %vm262_vm5, %v405_v61, %v3491_v10  ;;  %v268_v46 = vsel %vm262_vm5, %v259_v15, %v3492_v2 }
 0x108   :  { %v421_v44 = vsel %vm271_vm6, %v413_v63, %v379_v62  ;;  %v3495_v3 = vpop.permute.xlu0 %3494 }
 0x109   :  { %v706_v58 = vrot.slane %v421_v44, 2  ;;  %v3497_v12 = vunpack.i.h.bf16 %v3495_v3  ;;  %v3496_v7 = vunpack.i.l.bf16 %v3495_v3  ;;  %v231_v16 = vpop.permute.xlu1 %230 }
 0x10a   :  { %v277_v39 = vsel %vm271_vm6, %v268_v46, %v231_v16  ;;  %v820_v53 = vsel %vm808_vm7, %v231_v16, %v707_v6 }
 0x10b   :  { %2861 = vmatprep.mubr.msk.f32.mxu0 %vm907_vm8, %v820_v53  ;;  %v819_v4 = vsel %vm808_vm7, %v277_v39, %v706_v58  ;;  %v661_v22 = vsel %vm244_vm3, %v4190_v9, %v3497_v12  ;;  %v525_v29 = vsel %vm244_vm3, %v4185_v8, %v3496_v7 }
 0x10c   :  { %v3500_v17 = vpop.permute.xlu0 %3499  ;;  %1141 = vmatmul.mubr.f32.gmra.mrb[30].mxu0 %v819_v4 }
 0x10d   :  { %v3502_v19 = vunpack.i.h.bf16 %v3500_v17  ;;  %v3501_v20 = vunpack.i.l.bf16 %v3500_v17  ;;  %v3505_v27 = vpop.permute.xlu1 %3504 }
 0x10e   :  { %v3507_v43 = vunpack.i.h.bf16 %v3505_v27  ;;  %v3506_v23 = vunpack.i.l.bf16 %v3505_v27 }
 0x10f   :  { %v533_v24 = vsel %vm253_vm4, %v525_v29, %v3501_v20  ;;  %v669_v31 = vsel %vm253_vm4, %v661_v22, %v3502_v19 }
 0x110   :  { %v507_v32 = vpop.permute.xlu0 %506  ;;  %v541_v35 = vsel %vm262_vm5, %v533_v24, %v3506_v23  ;;  %v677_v36 = vsel %vm262_vm5, %v669_v31, %v3507_v43 }
 0x111   :  { %v747_v37 = vrot.slane %v507_v32, 4  ;;  %v549_v26 = vsel %vm271_vm6, %v541_v35, %v507_v32  ;;  %v643_v38 = vpop.permute.xlu1 %642 }
 0x112   :  { %v746_v9 = vrot.slane %v549_v26, 4  ;;  %v685_v13 = vsel %vm271_vm6, %v677_v36, %v643_v38  ;;  %v787_v8 = vrot.slane %v643_v38, 6 }
 0x113   :  { %v837_v42 = vsel %vm825_vm0, %v707_v6, %v747_v37  ;;  %v786_v11 = vrot.slane %v685_v13, 6 }
 0x114   :  { %v3510_v45 = vpop.permute.xlu0 %3509  ;;  %2862 = vmatprep.mubr.msk.f32.mxu0 %vm907_vm8, %v837_v42  ;;  %v836_v54 = vsel %vm825_vm0, %v706_v58, %v746_v9  ;;  %v854_v1 = vsel %vm842_vm9, %v747_v37, %v787_v8 }
 0x115   :  { %v3512_v55 = vunpack.i.h.bf16 %v3510_v45  ;;  %v3511_v41 = vunpack.i.l.bf16 %v3510_v45  ;;  %v3515_v40 = vpop.permute.xlu1 %3514  ;;  %1147 = vmatmul.mubr.f32.gmra.mrb[32].mxu0 %v836_v54  ;;  %v853_v56 = vsel %vm842_vm9, %v746_v9, %v786_v11 }
 0x116   :  { %v3517_v0 = vunpack.i.h.bf16 %v3515_v40  ;;  %v3516_v5 = vunpack.i.l.bf16 %v3515_v40  ;;  %2863 = vmatprep.mubr.msk.f32.mxu0 %vm907_vm8, %v854_v1 }
 0x117   :  { %v398_v48 = vsel %vm244_vm3, %v4238_v34, %v3511_v41  ;;  %v251_v47 = vsel %vm244_vm3, %v4219_v25, %v3512_v55 }
 0x118   :  { %v3520_v50 = vpop.permute.xlu0 %3519  ;;  %v406_v52 = vsel %vm253_vm4, %v398_v48, %v3516_v5  ;;  %v260_v34 = vsel %vm253_vm4, %v251_v47, %v3517_v0 }
 0x119   :  { %v3521_v51 = vunpack.i.l.bf16 %v3520_v50  ;;  %v3522_v33 = vunpack.i.h.bf16 %v3520_v50  ;;  %v381_v21 = vpop.permute.xlu1 %380  ;;  %1153 = vmatmul.mubr.f32.gmra.mrb[34].mxu0 %v853_v56 }
 0x11a   :  { %v709_v2 = vrot.slane %v381_v21, 2 }
 0x11b   :  { %v414_v57 = vsel %vm262_vm5, %v406_v52, %v3521_v51  ;;  %v269_v15 = vsel %vm262_vm5, %v260_v34, %v3522_v33 }
 0x11c   :  { %v422_v10 = vsel %vm271_vm6, %v414_v57, %v381_v21  ;;  %v3525_v61 = vpop.permute.xlu0 %3524 }
 0x11d   :  { %v708_v18 = vrot.slane %v422_v10, 2  ;;  %v3527_v62 = vunpack.i.h.bf16 %v3525_v61  ;;  %v3526_v25 = vunpack.i.l.bf16 %v3525_v61  ;;  %v233_v63 = vpop.permute.xlu1 %232 }
 0x11e   :  { %v278_v44 = vsel %vm271_vm6, %v269_v15, %v233_v63  ;;  %v822_v3 = vsel %vm808_vm7, %v233_v63, %v709_v2 }
 0x11f   :  { %2864 = vmatprep.mubr.msk.f32.mxu0 %vm907_vm8, %v822_v3  ;;  %v821_v6 = vsel %vm808_vm7, %v278_v44, %v708_v18  ;;  %v662_v16 = vsel %vm244_vm3, %v4230_v30, %v3527_v62  ;;  %v526_v46 = vsel %vm244_vm3, %v4225_v28, %v3526_v25 }
 0x120   :  { %v3530_v58 = vpop.permute.xlu0 %3529  ;;  %1159 = vmatmul.mubr.f32.gmra.mrb[36].mxu0 %v821_v6 }
 0x121   :  { %v3532_v12 = vunpack.i.h.bf16 %v3530_v58  ;;  %v3531_v7 = vunpack.i.l.bf16 %v3530_v58  ;;  %v3535_v39 = vpop.permute.xlu1 %3534 }
 0x122   :  { %v3537_v53 = vunpack.i.h.bf16 %v3535_v39  ;;  %v3536_v17 = vunpack.i.l.bf16 %v3535_v39 }
 0x123   :  { %v534_v4 = vsel %vm253_vm4, %v526_v46, %v3531_v7  ;;  %v670_v19 = vsel %vm253_vm4, %v662_v16, %v3532_v12 }
 0x124   :  { %v509_v20 = vpop.permute.xlu0 %508  ;;  %v542_v22 = vsel %vm262_vm5, %v534_v4, %v3536_v17  ;;  %v678_v27 = vsel %vm262_vm5, %v670_v19, %v3537_v53  ;;  %v897_v4 = vlaneseq }
 0x125   :  { %v749_v29 = vrot.slane %v509_v20, 4  ;;  %v550_v43 = vsel %vm271_vm6, %v542_v22, %v509_v20  ;;  %v645_v23 = vpop.permute.xlu1 %644 }
 0x126   :  { %v748_v30 = vrot.slane %v550_v43, 4  ;;  %v686_v24 = vsel %vm271_vm6, %v678_v27, %v645_v23  ;;  %v789_v28 = vrot.slane %v645_v23, 6  ;;  %v898_v22 = vshrl.u32 %v897_v4, 7  ;;  %v895_v27 = vld [vmem:[%s5495_s5] sm:$0x3] }
 0x127   :  { %v839_v31 = vsel %vm825_vm0, %v709_v2, %v749_v29  ;;  %v788_v32 = vrot.slane %v686_v24, 6 }
 0x128   :  { %v3540_v35 = vpop.permute.xlu0 %3539  ;;  %2865 = vmatprep.mubr.msk.f32.mxu0 %vm907_vm8, %v839_v31  ;;  %v838_v26 = vsel %vm825_vm0, %v708_v18, %v748_v30  ;;  %v856_v38 = vsel %vm842_vm9, %v749_v29, %v789_v28  ;;  %v899_v29 = vsub.s32 0, %v898_v22  ;;  %v903_v43 = vsub.s32 1, %v898_v22 }
 0x129   :  { %v3542_v37 = vunpack.i.h.bf16 %v3540_v35  ;;  %v3541_v36 = vunpack.i.l.bf16 %v3540_v35  ;;  %v3545_v9 = vpop.permute.xlu1 %3544  ;;  %1165 = vmatmul.mubr.f32.gmra.mrb[38].mxu0 %v838_v26  ;;  %v855_v54 = vsel %vm842_vm9, %v748_v30, %v788_v32 }
 0x12a   :  { %v3547_v8 = vunpack.i.h.bf16 %v3545_v9  ;;  %v3546_v42 = vunpack.i.l.bf16 %v3545_v9  ;;  %2866 = vmatprep.mubr.msk.f32.mxu0 %vm907_vm8, %v856_v38  ;;  %v4554_v30 = vrot.slane %v895_v27, %v899_v29  ;;  %v4556_v28 = vrot.slane %v895_v27, %v903_v43 }
 0x12b   :  { %v399_v13 = vsel %vm244_vm3, %v4311_v14, %v3541_v36  ;;  %v252_v11 = vsel %vm244_vm3, %v4284_v49, %v3542_v37 }
 0x12c   :  { %v3550_v45 = vpop.permute.xlu0 %3549  ;;  %v407_v41 = vsel %vm253_vm4, %v399_v13, %v3546_v42  ;;  %v261_v14 = vsel %vm253_vm4, %v252_v11, %v3547_v8 }
 0x12d   :  { %v3551_v55 = vunpack.i.l.bf16 %v3550_v45  ;;  %v3552_v1 = vunpack.i.h.bf16 %v3550_v45  ;;  %v383_v40 = vpop.permute.xlu1 %382  ;;  %1171 = vmatmul.mubr.f32.gmra.mrb[40].mxu0 %v855_v54 }
 0x12e   :  { %v711_v50 = vrot.slane %v383_v40, 2 }
 0x12f   :  { %v415_v48 = vsel %vm262_vm5, %v407_v41, %v3551_v55  ;;  %v270_v52 = vsel %vm262_vm5, %v261_v14, %v3552_v1 }
 0x130   :  { %v423_v0 = vsel %vm271_vm6, %v415_v48, %v383_v40  ;;  %v3555_v5 = vpop.permute.xlu0 %3554 }
 0x131   :  { %v710_v47 = vrot.slane %v423_v0, 2  ;;  %v3556_v51 = vunpack.i.l.bf16 %v3555_v5  ;;  %v235_v49 = vpop.permute.xlu1 %234  ;;  %v3557_v61 = vunpack.i.h.bf16 %v3555_v5 }
 0x132   :  { %v279_v56 = vsel %vm271_vm6, %v270_v52, %v235_v49  ;;  %v824_v33 = vsel %vm808_vm7, %v235_v49, %v711_v50 }
 0x133   :  { %v527_v21 = vsel %vm244_vm3, %v4293_v59, %v3556_v51  ;;  %2867 = vmatprep.mubr.msk.f32.mxu0 %vm907_vm8, %v824_v33  ;;  %v823_v34 = vsel %vm808_vm7, %v279_v56, %v710_v47  ;;  %v663_v59 = vsel %vm244_vm3, %v4298_v60, %v3557_v61  ;;  %vm2463_vm3 = vcmask 1043459  }
 0x134   :  { %v463_v57 = vpop.permute.xlu0 %462  ;;  %1177 = vmatmul.mubr.f32.gmra.mrb[42].mxu0 %v823_v34 }
 0x135   :  { %v535_v10 = vsel %vm253_vm4, %v527_v21, %v463_v57  ;;  %v487_v18 = vpop.permute.xlu1 %486 }
 0x136   :  { %v543_v2 = vsel %vm262_vm5, %v535_v10, %v487_v18 }
 0x138   :  { %v511_v62 = vpop.permute.xlu0 %510 }
 0x139   :  { %v551_v25 = vsel %vm271_vm6, %v543_v2, %v511_v62  ;;  %v751_v63 = vrot.slane %v511_v62, 4  ;;  %v591_v44 = vpop.permute.xlu1 %590 }
 0x13a   :  { %v750_v15 = vrot.slane %v551_v25, 4  ;;  %v671_v3 = vsel %vm253_vm4, %v663_v59, %v591_v44 }
 0x13b   :  { %v841_v58 = vsel %vm825_vm0, %v711_v50, %v751_v63 }
 0x13c   :  { %v615_v6 = vpop.permute.xlu0 %614  ;;  %2868 = vmatprep.mubr.msk.f32.mxu0 %vm907_vm8, %v841_v58  ;;  %v840_v12 = vsel %vm825_vm0, %v710_v47, %v750_v15 }
 0x13d   :  { %v679_v7 = vsel %vm262_vm5, %v671_v3, %v615_v6  ;;  %1183 = vmatmul.mubr.f32.gmra.mrb[44].mxu0 %v840_v12  ;;  %v647_v16 = vpop.permute.xlu1 %646  ;;  %vm2469_vm5 = vcmask 1045509  }
 0x13e   :  { %v687_v46 = vsel %vm271_vm6, %v679_v7, %v647_v16  ;;  %v791_v39 = vrot.slane %v647_v16, 6  ;;  %vm2472_vm6 = vcmask 1046534  }
 0x13f   :  { %v790_v53 = vrot.slane %v687_v46, 6 }
 0x140   :  { %v858_v17 = vsel %vm842_vm9, %v751_v63, %v791_v39 }
 0x141   :  { %2869 = vmatprep.mubr.msk.f32.mxu0 %vm907_vm8, %v858_v17  ;;  %v857_v60 = vsel %vm842_vm9, %v750_v15, %v790_v53  ;;  %vm2527_vm8 = vcmask 523264  }
 0x142   :  { %1189 = vmatmul.mubr.f32.gmra.mrb[46].mxu0 %v857_v60 }
 0x17c   :  { %v1052_v19 = vpop.f32.mrb[0].mxu0 }
 0x17d   :  { %v1054_v20 = vpop.f32.mrb[1].mxu0  ;;  %v1053_v13 = vadd.f32 %v1052_v19, %v4554_v30 }
 0x17e   :  { %v1055_v11 = vadd.f32 %v1054_v20, %v4556_v28 }
 0x184   :  { %v1058_v23 = vpop.f32.mrb[2].mxu0 }
 0x185   :  { %v1060_v24 = vpop.f32.mrb[3].mxu0  ;;  %v1059_v31 = vadd.f32 %v1058_v23, %v4554_v30 }
 0x186   :  { %v1061_v32 = vadd.f32 %v1060_v24, %v4556_v28 }
 0x187   :  { %v1227_v38 = vrot.slane %v1059_v31, 4 }
 0x188   :  { %v1064_v35 = vpop.f32.mrb[4].mxu0  ;;  %v1230_v8 = vrot.slane %v1061_v32, 4 }
 0x189   :  { %v1065_v37 = vadd.f32 %v1064_v35, %v4554_v30  ;;  %v1066_v36 = vpop.f32.mrb[5].mxu0 }
 0x18a   :  { %v1067_v26 = vadd.f32 %v1066_v36, %v4556_v28 }
 0x18b   :  { %v1228_v9 = vrot.slane %v1065_v37, 4 }
 0x18c   :  { %v1231_v42 = vrot.slane %v1067_v26, 4 }
 0x18d   :  { %v4564_v45 = vmax.f32 %v1059_v31, %v1228_v9  ;;  %v1229_v55 = vsel %vm825_vm0, %v1227_v38, %v1228_v9 }
 0x18e   :  { %v1310_v41 = vmax.f32 %v1061_v32, %v1231_v42  ;;  %v4567_v54 = vmax.f32 %v1053_v13, %v1229_v55  ;;  %v1232_v1 = vsel %vm825_vm0, %v1230_v8, %v1231_v42 }
 0x18f   :  { %v1070_v40 = vpop.f32.mrb[6].mxu0  ;;  %1375 = vrot.lane.b32.xlu0 %v4564_v45, %s3761_s16  ;;  %v1308_v48 = vmax.f32 %v1055_v11, %v1232_v1 }
 0x190   :  { %v1072_v14 = vpop.f32.mrb[7].mxu0  ;;  %1377 = vrot.lane.b32.xlu1 %v1310_v41, %s3761_s16  ;;  %v1071_v57 = vadd.f32 %v1070_v40, %v4554_v30 }
 0x191   :  { %v1073_v61 = vadd.f32 %v1072_v14, %v4556_v28 }
 0x193   :  { %1371 = vrot.lane.b32.xlu0 %v4567_v54, %s3761_s16 }
 0x194   :  { %1373 = vrot.lane.b32.xlu1 %v1308_v48, %s3761_s16 }
 0x198   :  { %v1076_v0 = vpop.f32.mrb[8].mxu0 }
 0x199   :  { %v1078_v5 = vpop.f32.mrb[9].mxu0  ;;  %v1077_v47 = vadd.f32 %v1076_v0, %v4554_v30 }
 0x19a   :  { %v1079_v50 = vadd.f32 %v1078_v5, %v4556_v28 }
 0x19b   :  { %v1233_v33 = vrot.slane %v1077_v47, 4 }
 0x19c   :  { %v1082_v51 = vpop.f32.mrb[10].mxu0  ;;  %v1236_v34 = vrot.slane %v1079_v50, 4 }
 0x19d   :  { %v1083_v49 = vadd.f32 %v1082_v51, %v4554_v30  ;;  %v1084_v52 = vpop.f32.mrb[11].mxu0 }
 0x19e   :  { %v1085_v56 = vadd.f32 %v1084_v52, %v4556_v28 }
 0x19f   :  { %v1234_v21 = vrot.slane %v1083_v49, 4 }
 0x1a0   :  { %v1237_v10 = vrot.slane %v1085_v56, 4 }
 0x1a1   :  { %v4582_v18 = vmax.f32 %v1077_v47, %v1234_v21  ;;  %v1235_v2 = vsel %vm825_vm0, %v1233_v33, %v1234_v21 }
 0x1a2   :  { %v1314_v62 = vmax.f32 %v1079_v50, %v1237_v10  ;;  %v4585_v25 = vmax.f32 %v1071_v57, %v1235_v2  ;;  %v1238_v63 = vsel %vm825_vm0, %v1236_v34, %v1237_v10 }
 0x1a3   :  { %v1088_v15 = vpop.f32.mrb[12].mxu0  ;;  %1383 = vrot.lane.b32.xlu0 %v4582_v18, %s3761_s16  ;;  %v1312_v44 = vmax.f32 %v1073_v61, %v1238_v63 }
 0x1a4   :  { %v1090_v59 = vpop.f32.mrb[13].mxu0  ;;  %1385 = vrot.lane.b32.xlu1 %v1314_v62, %s3761_s16  ;;  %v1089_v60 = vadd.f32 %v1088_v15, %v4554_v30 }
 0x1a5   :  { %v1091_v20 = vadd.f32 %v1090_v59, %v4556_v28 }
 0x1a7   :  { %1379 = vrot.lane.b32.xlu0 %v4585_v25, %s3761_s16 }
 0x1a8   :  { %1381 = vrot.lane.b32.xlu1 %v1312_v44, %s3761_s16 }
 0x1ac   :  { %v1094_v3 = vpop.f32.mrb[14].mxu0 }
 0x1ad   :  { %v1096_v58 = vpop.f32.mrb[15].mxu0  ;;  %v1095_v6 = vadd.f32 %v1094_v3, %v4554_v30 }
 0x1ae   :  { %v1097_v12 = vadd.f32 %v1096_v58, %v4556_v28 }
 0x1af   :  { %v1239_v53 = vrot.slane %v1095_v6, 4 }
 0x1b0   :  { %v1100_v7 = vpop.f32.mrb[16].mxu0  ;;  %v1242_v4 = vrot.slane %v1097_v12, 4 }
 0x1b1   :  { %v1101_v16 = vadd.f32 %v1100_v7, %v4554_v30  ;;  %v1102_v46 = vpop.f32.mrb[17].mxu0 }
 0x1b2   :  { %v1103_v39 = vadd.f32 %v1102_v46, %v4556_v28 }
 0x1b3   :  { %v1240_v17 = vrot.slane %v1101_v16, 4 }
 0x1b4   :  { %v1243_v19 = vrot.slane %v1103_v39, 4 }
 0x1b5   :  { %v4600_v22 = vmax.f32 %v1095_v6, %v1240_v17  ;;  %v1241_v29 = vsel %vm825_vm0, %v1239_v53, %v1240_v17 }
 0x1b6   :  { %v1318_v27 = vmax.f32 %v1097_v12, %v1243_v19  ;;  %v4603_v43 = vmax.f32 %v1089_v60, %v1241_v29  ;;  %v1244_v23 = vsel %vm825_vm0, %v1242_v4, %v1243_v19 }
 0x1b7   :  { %v1106_v24 = vpop.f32.mrb[18].mxu0  ;;  %1391 = vrot.lane.b32.xlu0 %v4600_v22, %s3761_s16  ;;  %v1316_v31 = vmax.f32 %v1091_v20, %v1244_v23 }
 0x1b8   :  { %v1108_v32 = vpop.f32.mrb[19].mxu0  ;;  %1393 = vrot.lane.b32.xlu1 %v1318_v27, %s3761_s16  ;;  %v1107_v55 = vadd.f32 %v1106_v24, %v4554_v30 }
 0x1b9   :  { %v1109_v40 = vadd.f32 %v1108_v32, %v4556_v28 }
 0x1bb   :  { %1387 = vrot.lane.b32.xlu0 %v4603_v43, %s3761_s16 }
 0x1bc   :  { %1389 = vrot.lane.b32.xlu1 %v1316_v31, %s3761_s16 }
 0x1c0   :  { %v1112_v35 = vpop.f32.mrb[20].mxu0 }
 0x1c1   :  { %v1114_v37 = vpop.f32.mrb[21].mxu0  ;;  %v1113_v36 = vadd.f32 %v1112_v35, %v4554_v30 }
 0x1c2   :  { %v1115_v26 = vadd.f32 %v1114_v37, %v4556_v28 }
 0x1c3   :  { %v1245_v42 = vrot.slane %v1113_v36, 4 }
 0x1c4   :  { %v1118_v38 = vpop.f32.mrb[22].mxu0  ;;  %v1248_v41 = vrot.slane %v1115_v26, 4 }
 0x1c5   :  { %v1119_v9 = vadd.f32 %v1118_v38, %v4554_v30  ;;  %v1120_v13 = vpop.f32.mrb[23].mxu0 }
 0x1c6   :  { %v1121_v8 = vadd.f32 %v1120_v13, %v4556_v28 }
 0x1c7   :  { %v1246_v11 = vrot.slane %v1119_v9, 4 }
 0x1c8   :  { %v1249_v1 = vrot.slane %v1121_v8, 4 }
 0x1c9   :  { %v4618_v48 = vmax.f32 %v1113_v36, %v1246_v11  ;;  %v1247_v14 = vsel %vm825_vm0, %v1245_v42, %v1246_v11 }
 0x1ca   :  { %v1322_v0 = vmax.f32 %v1115_v26, %v1249_v1  ;;  %v4621_v5 = vmax.f32 %v1107_v55, %v1247_v14  ;;  %v1250_v47 = vsel %vm825_vm0, %v1248_v41, %v1249_v1 }
 0x1cb   :  { %v1124_v50 = vpop.f32.mrb[24].mxu0  ;;  %1399 = vrot.lane.b32.xlu0 %v4618_v48, %s3761_s16  ;;  %v1320_v51 = vmax.f32 %v1109_v40, %v1250_v47 }
 0x1cc   :  { %v1126_v49 = vpop.f32.mrb[25].mxu0  ;;  %1401 = vrot.lane.b32.xlu1 %v1322_v0, %s3761_s16  ;;  %v1125_v63 = vadd.f32 %v1124_v50, %v4554_v30 }
 0x1cd   :  { %v1127_v59 = vadd.f32 %v1126_v49, %v4556_v28 }
 0x1cf   :  { %1395 = vrot.lane.b32.xlu0 %v4621_v5, %s3761_s16 }
 0x1d0   :  { %1397 = vrot.lane.b32.xlu1 %v1320_v51, %s3761_s16 }
 0x1d4   :  { %v1130_v52 = vpop.f32.mrb[26].mxu0 }
 0x1d5   :  { %v1132_v56 = vpop.f32.mrb[27].mxu0  ;;  %v1131_v33 = vadd.f32 %v1130_v52, %v4554_v30 }
 0x1d6   :  { %v1133_v21 = vadd.f32 %v1132_v56, %v4556_v28 }
 0x1d7   :  { %v1251_v2 = vrot.slane %v1131_v33, 4 }
 0x1d8   :  { %v1136_v57 = vpop.f32.mrb[28].mxu0  ;;  %v1254_v15 = vrot.slane %v1133_v21, 4 }
 0x1d9   :  { %v1137_v34 = vadd.f32 %v1136_v57, %v4554_v30  ;;  %v1138_v10 = vpop.f32.mrb[29].mxu0 }
 0x1da   :  { %v1139_v61 = vadd.f32 %v1138_v10, %v4556_v28 }
 0x1db   :  { %v1252_v62 = vrot.slane %v1137_v34, 4 }
 0x1dc   :  { %v1255_v44 = vrot.slane %v1139_v61, 4 }
 0x1dd   :  { %v1253_v3 = vsel %vm825_vm0, %v1251_v2, %v1252_v62  ;;  %v4637_v58 = vmax.f32 %v1131_v33, %v1252_v62 }
 0x1de   :  { %v4639_v6 = vmax.f32 %v1125_v63, %v1253_v3  ;;  %v1256_v12 = vsel %vm825_vm0, %v1254_v15, %v1255_v44  ;;  %v1326_v7 = vmax.f32 %v1133_v21, %v1255_v44  ;;  %v2097_v3 = vld [vmem:[%s5496_s6 + $0x80] sm:$0xff] }
 0x1df   :  { %v1324_v16 = vmax.f32 %v1127_v59, %v1256_v12  ;;  %v1142_v46 = vpop.f32.mrb[30].mxu0  ;;  %1407 = vrot.lane.b32.xlu0 %v4637_v58, %s3761_s16  ;;  %v2098_v12 = vld [vmem:[%s5496_s6 + $0x88] sm:$0xff] }
 0x1e0   :  { %v1144_v39 = vpop.f32.mrb[31].mxu0  ;;  %1409 = vrot.lane.b32.xlu1 %v1326_v7, %s3761_s16  ;;  %v1143_v31 = vadd.f32 %v1142_v46, %v4554_v30  ;;  %v3174_v7 = vpack.c.bf16 %v2098_v12, %v2097_v3  ;;  %v2082_v46 = vld [vmem:[%s5496_s6 + $0x8] sm:$0xff] }
 0x1e1   :  { %v1145_v37 = vadd.f32 %v1144_v39, %v4556_v28 }
 0x1e2   :  { %3175 = vmatprep.subr.bf16.mxu1 %v3174_v7 }
 0x1e3   :  { %1403 = vrot.lane.b32.xlu0 %v4639_v6, %s3761_s16 }
 0x1e4   :  { %1405 = vrot.lane.b32.xlu1 %v1324_v16, %s3761_s16  ;;  %v2081_v16 = vld [vmem:[%s5496_s6] sm:$0xff] }
 0x1e8   :  { %v1148_v53 = vpop.f32.mrb[32].mxu0 }
 0x1e9   :  { %v1150_v17 = vpop.f32.mrb[33].mxu0  ;;  %v1149_v60 = vadd.f32 %v1148_v53, %v4554_v30 }
 0x1ea   :  { %v1151_v4 = vadd.f32 %v1150_v17, %v4556_v28  ;;  %v3176_v17 = vpack.c.bf16 %v2082_v46, %v2081_v16 }
 0x1eb   :  { %v1257_v23 = vrot.slane %v1149_v60, 4 }
 0x1ec   :  { %v1154_v19 = vpop.f32.mrb[34].mxu0  ;;  %v1260_v32 = vrot.slane %v1151_v4, 4  ;;  %3177 = vmatpush3.bf16.msra.mxu1 %v3176_v17 }
 0x1ed   :  { %v1155_v20 = vadd.f32 %v1154_v19, %v4554_v30  ;;  %v1156_v29 = vpop.f32.mrb[35].mxu0  ;;  %v2099_v19 = vld [vmem:[%s5496_s6 + $0x90] sm:$0xff] }
 0x1ee   :  { %v1157_v27 = vadd.f32 %v1156_v29, %v4556_v28 }
 0x1ef   :  { %v1258_v24 = vrot.slane %v1155_v20, 4  ;;  %v2100_v20 = vld [vmem:[%s5496_s6 + $0x98] sm:$0xff] }
 0x1f0   :  { %v1261_v35 = vrot.slane %v1157_v27, 4 }
 0x1f1   :  { %v1259_v36 = vsel %vm825_vm0, %v1257_v23, %v1258_v24  ;;  %v4655_v26 = vmax.f32 %v1149_v60, %v1258_v24  ;;  %v3178_v23 = vpack.c.bf16 %v2100_v20, %v2099_v19  ;;  %v2083_v24 = vld [vmem:[%s5496_s6 + $0x10] sm:$0xff]  ;;  %v2090_v19 = vld [vmem:[%s5496_s6 + $0x48] sm:$0xff] }
 0x1f2   :  { %v4657_v38 = vmax.f32 %v1143_v31, %v1259_v36  ;;  %v1262_v9 = vsel %vm825_vm0, %v1260_v32, %v1261_v35  ;;  %v1330_v13 = vmax.f32 %v1151_v4, %v1261_v35  ;;  %v2084_v31 = vld [vmem:[%s5496_s6 + $0x18] sm:$0xff] }
 0x1f3   :  { %v1328_v8 = vmax.f32 %v1145_v37, %v1262_v9  ;;  %v1160_v42 = vpop.f32.mrb[36].mxu0  ;;  %1415 = vrot.lane.b32.xlu0 %v4655_v26, %s3761_s16  ;;  %v3180_v32 = vpack.c.bf16 %v2084_v31, %v2083_v24  ;;  %3179 = vmatprep.subr.bf16.mxu1 %v3178_v23  ;;  %v2101_v9 = vld [vmem:[%s5496_s6 + $0xa0] sm:$0xff]  ;;  %v2107_v31 = vld [vmem:[%s5496_s6 + $0xd0] sm:$0xff] }
 0x1f4   :  { %v1162_v11 = vpop.f32.mrb[37].mxu0  ;;  %1417 = vrot.lane.b32.xlu1 %v1330_v13, %s3761_s16  ;;  %v1161_v52 = vadd.f32 %v1160_v42, %v4554_v30  ;;  %v2102_v13 = vld [vmem:[%s5496_s6 + $0xa8] sm:$0xff] }
 0x1f5   :  { %v1163_v21 = vadd.f32 %v1162_v11, %v4556_v28  ;;  %3181 = vmatpush3.bf16.msra.mxu1 %v3180_v32  ;;  %v3182_v11 = vpack.c.bf16 %v2102_v13, %v2101_v9  ;;  %v2108_v32 = vld [vmem:[%s5496_s6 + $0xd8] sm:$0xff] }
 0x1f7   :  { %1411 = vrot.lane.b32.xlu0 %v4657_v38, %s3761_s16  ;;  %3183 = vmatprep.subr.bf16.mxu1 %v3182_v11  ;;  %v2109_v11 = vld [vmem:[%s5496_s6 + $0xe0] sm:$0xff] }
 0x1f8   :  { %1413 = vrot.lane.b32.xlu1 %v1328_v8, %s3761_s16 }
 0x1fc   :  { %v1166_v55 = vpop.f32.mrb[38].mxu0 }
 0x1fd   :  { %v1168_v41 = vpop.f32.mrb[39].mxu0  ;;  %v1167_v1 = vadd.f32 %v1166_v55, %v4554_v30 }
 0x1fe   :  { %v1169_v40 = vadd.f32 %v1168_v41, %v4556_v28 }
 0x1ff   :  { %v1263_v51 = vrot.slane %v1167_v1, 4 }
 0x200   :  { %v1172_v14 = vpop.f32.mrb[40].mxu0  ;;  %v1266_v56 = vrot.slane %v1169_v40, 4 }
 0x201   :  { %v1173_v0 = vadd.f32 %v1172_v14, %v4554_v30  ;;  %v1174_v47 = vpop.f32.mrb[41].mxu0  ;;  %v1376_v63 = vpop.permute.xlu0 %1375 }
 0x202   :  { %v1175_v50 = vadd.f32 %v1174_v47, %v4556_v28  ;;  %v1378_v44 = vpop.permute.xlu1 %1377 }
 0x203   :  { %v1264_v49 = vrot.slane %v1173_v0, 4  ;;  %v1436_v29 = vsel %vm253_vm4, %v1376_v63, %v1378_v44 }
 0x204   :  { %v1267_v33 = vrot.slane %v1175_v50, 4  ;;  %v1468_v35 = vmax.f32 %v4564_v45, %v1436_v29  ;;  %v2085_v45 = vld [vmem:[%s5496_s6 + $0x20] sm:$0xff] }
 0x205   :  { %v1265_v57 = vsel %vm825_vm0, %v1263_v51, %v1264_v49  ;;  %v4673_v34 = vmax.f32 %v1167_v1, %v1264_v49  ;;  %v1372_v39 = vpop.permute.xlu0 %1371 }
 0x206   :  { %v4675_v10 = vmax.f32 %v1161_v52, %v1265_v57  ;;  %v1268_v61 = vsel %vm825_vm0, %v1266_v56, %v1267_v33  ;;  %v1334_v2 = vmax.f32 %v1169_v40, %v1267_v33  ;;  %v1374_v53 = vpop.permute.xlu1 %1373  ;;  %v4728_v47 = vmax.f32 %v1468_v35, 0.0  ;;  %v2103_v52 = vld [vmem:[%s5496_s6 + $0xb0] sm:$0xff]  ;;  %v2104_v56 = vld [vmem:[%s5496_s6 + $0xb8] sm:$0xff] }
 0x207   :  { %v1332_v62 = vmax.f32 %v1163_v21, %v1268_v61  ;;  %v1178_v15 = vpop.f32.mrb[42].mxu0  ;;  %1423 = vrot.lane.b32.xlu0 %v4673_v34, %s3761_s16  ;;  %v1435_v27 = vsel %vm253_vm4, %v1372_v39, %v1374_v53  ;;  %v3186_v61 = vpack.c.bf16 %v2104_v56, %v2103_v52  ;;  %v2091_v35 = vld [vmem:[%s5496_s6 + $0x50] sm:$0xff] }
 0x208   :  { %v1180_v59 = vpop.f32.mrb[43].mxu0  ;;  %1425 = vrot.lane.b32.xlu1 %v1334_v2, %s3761_s16  ;;  %v1467_v37 = vmax.f32 %v4567_v54, %v1435_v27  ;;  %v2086_v54 = vld [vmem:[%s5496_s6 + $0x28] sm:$0xff]  ;;  %v1179_v33 = vadd.f32 %v1178_v15, %v4554_v30  ;;  %v2087_v2 = vld [vmem:[%s5496_s6 + $0x30] sm:$0xff]  ;;  %v1745_v20 = vrot.slane %v4728_v47, 1  ;;  %v1516_v56 = vrot.slane %v4728_v47, 6 }
 0x209   :  { %v3184_v1 = vpack.c.bf16 %v2086_v54, %v2085_v45  ;;  %v1181_v63 = vadd.f32 %v1180_v59, %v4556_v28  ;;  %v2106_v59 = vld [vmem:[%s5496_s6 + $0xc8] sm:$0xff] }
 0x20a   :  { %v4730_v50 = vmax.f32 %v1467_v37, 0.0  ;;  %v2092_v37 = vld [vmem:[%s5496_s6 + $0x58] sm:$0xff]  ;;  %v2110_v45 = vld [vmem:[%s5496_s6 + $0xe8] sm:$0xff] }
 0x20b   :  { %1419 = vrot.lane.b32.xlu0 %v4675_v10, %s3761_s16  ;;  %3185 = vmatpush3.bf16.msra.mxu1 %v3184_v1  ;;  %v3196_v9 = vpack.c.bf16 %v2092_v37, %v2091_v35  ;;  %v3198_v54 = vpack.c.bf16 %v2110_v45, %v2109_v11 }
 0x20c   :  { %1421 = vrot.lane.b32.xlu1 %v1332_v62, %s3761_s16  ;;  %v2088_v62 = vld [vmem:[%s5496_s6 + $0x38] sm:$0xff]  ;;  %3187 = vmatprep.subr.bf16.mxu1 %v3186_v61  ;;  %v1563_v39 = vrot.slane %v4730_v50, 1 }
 0x20d   :  { %v3188_v12 = vpack.c.bf16 %v2088_v62, %v2087_v2  ;;  %v1644_v2 = vrot.slane %v4730_v50, 2  ;;  %v1712_v62 = vrot.slane %v4730_v50, 3 }
 0x20e   :  { %v1746_v24 = vsel %vm1744_vm10, %v1563_v39, %v1745_v20 }
 0x20f   :  { %3189 = vmatpush3.bf16.msra.mxu1 %v3188_v12 }
 0x210   :  { %v1184_v60 = vpop.f32.mrb[44].mxu0 }
 0x211   :  { %v1186_v4 = vpop.f32.mrb[45].mxu0  ;;  %v1185_v36 = vadd.f32 %v1184_v60, %v4554_v30 }
 0x212   :  { %v1187_v8 = vadd.f32 %v1186_v4, %v4556_v28  ;;  %v2089_v4 = vld [vmem:[%s5496_s6 + $0x40] sm:$0xff] }
 0x213   :  { %v1269_v51 = vrot.slane %v1185_v36, 4  ;;  %v3192_v29 = vpack.c.bf16 %v2090_v19, %v2089_v4 }
 0x214   :  { %v1272_v21 = vrot.slane %v1187_v8, 4 }
 0x215   :  { %v1190_v42 = vpop.f32.mrb[46].mxu0  ;;  %v1384_v40 = vpop.permute.xlu0 %1383 }
 0x216   :  { %v1191_v55 = vadd.f32 %v1190_v42, %v4554_v30  ;;  %v1192_v41 = vpop.f32.mrb[47].mxu0  ;;  %v1386_v0 = vpop.permute.xlu1 %1385  ;;  %v3563_v42 = vpack.i.bf16 %v1745_v20, %v1746_v24 }
 0x217   :  { %v1193_v14 = vadd.f32 %v1192_v41, %v4556_v28  ;;  %v1438_v46 = vsel %vm253_vm4, %v1384_v40, %v1386_v0  ;;  %v2105_v28 = vld [vmem:[%s5496_s6 + $0xc0] sm:$0xff]  ;;  %v1809_v41 = vrot.slane %v4730_v50, 4  ;;  %v1515_v0 = vrot.slane %v4730_v50, 6 }
 0x218   :  { %v1270_v49 = vrot.slane %v1191_v55, 4  ;;  %v3190_v60 = vpack.c.bf16 %v2106_v59, %v2105_v28  ;;  %v1470_v27 = vmax.f32 %v4582_v18, %v1438_v46  ;;  %v3194_v18 = vpack.c.bf16 %v2108_v32, %v2107_v31  ;;  %v2094_v55 = vld [vmem:[%s5496_s6 + $0x68] sm:$0xff] }
 0x219   :  { %v1273_v57 = vrot.slane %v1193_v14, 4  ;;  %v1380_v53 = vpop.permute.xlu0 %1379  ;;  %v1517_v12 = vsel %vm842_vm9, %v1515_v0, %v1516_v56 }
 0x21a   :  { %v1271_v44 = vsel %vm825_vm0, %v1269_v51, %v1270_v49  ;;  %v4747_v3 = vmax.f32 %v1185_v36, %v1270_v49  ;;  %v1382_v17 = vpop.permute.xlu1 %1381  ;;  %3191 = vmatprep.subr.bf16.mxu1 %v3190_v60  ;;  %v1841_v36 = vrot.slane %v4728_v47, 2  ;;  %v4791_v13 = vmax.f32 %v1470_v27, 0.0  ;;  %v2111_v51 = vld [vmem:[%s5496_s6 + $0xf0] sm:$0xff]  ;;  %v2112_v49 = vld [vmem:[%s5496_s6 + $0xf8] sm:$0xff] }
 0x21b   :  { %v4749_v7 = vmax.f32 %v1179_v33, %v1271_v44  ;;  %v1274_v30 = vsel %vm825_vm0, %v1272_v21, %v1273_v57  ;;  %v1338_v15 = vmax.f32 %v1187_v8, %v1273_v57  ;;  %v1437_v23 = vsel %vm253_vm4, %v1380_v53, %v1382_v17  ;;  %3193 = vmatpush3.bf16.msra.mxu1 %v3192_v29  ;;  %v2095_v21 = vld [vmem:[%s5496_s6 + $0x70] sm:$0xff]  ;;  %v2096_v57 = vld [vmem:[%s5496_s6 + $0x78] sm:$0xff] }
 0x21c   :  { %v1336_v16 = vmax.f32 %v1181_v63, %v1274_v30  ;;  %1431 = vrot.lane.b32.xlu0 %v4747_v3, %s3761_s16  ;;  %v1469_v8 = vmax.f32 %v4585_v25, %v1437_v23  ;;  %3195 = vmatprep.subr.bf16.mxu1 %v3194_v18  ;;  %v2093_v25 = vld [vmem:[%s5496_s6 + $0x60] sm:$0xff]  ;;  %v1842_v14 = vrot.slane %v4791_v13, 2  ;;  %v3202_v33 = vpack.c.bf16 %v2112_v49, %v2111_v51 }
 0x21d   :  { %1433 = vrot.lane.b32.xlu1 %v1338_v15, %s3761_s16  ;;  %v3200_v1 = vpack.c.bf16 %v2094_v55, %v2093_v25  ;;  %v3204_v63 = vpack.c.bf16 %v2096_v57, %v2095_v21  ;;  %v3558_v46 = vpack.i.bf16 %v1517_v12, %v1712_v62  ;;  %v1747_v28 = vrot.slane %v4791_v13, 1 }
 0x21e   :  { %v4809_v40 = vmax.f32 %v1469_v8, 0.0  ;;  %v1596_v60 = vrot.slane %v4730_v50, 7  ;;  %v1597_v29 = vrot.slane %v4728_v47, 7  ;;  %v1519_v23 = vrot.slane %v4791_v13, 6 }
 0x21f   :  { %3197 = vmatpush3.bf16.msra.mxu1 %v3196_v9  ;;  %v1600_v9 = vrot.slane %v4791_v13, 7 }
 0x220   :  { %1427 = vrot.lane.b32.xlu0 %v4749_v7, %s3761_s16  ;;  %3199 = vmatprep.subr.bf16.mxu1 %v3198_v54  ;;  %v1810_v44 = vrot.slane %v4809_v40, 4  ;;  %v1564_v30 = vrot.slane %v4809_v40, 1  ;;  %v1645_v17 = vrot.slane %v4809_v40, 2  ;;  %v1518_v20 = vrot.slane %v4809_v40, 6 }
 0x221   :  { %1429 = vrot.lane.b32.xlu1 %v1336_v16, %s3761_s16  ;;  %v1598_v24 = vsel %vm1595_vm11, %v1596_v60, %v1597_v29  ;;  %v1713_v31 = vrot.slane %v4809_v40, 3 }
 0x222   :  { %v1748_v19 = vsel %vm1744_vm10, %v1564_v30, %v1747_v28  ;;  %v1520_v18 = vsel %vm842_vm9, %v1518_v20, %v1519_v23 }
 0x223   :  { %3201 = vmatpush3.bf16.msra.mxu1 %v3200_v1  ;;  %v3578_v37 = vpack.i.bf16 %v1520_v18, %v1713_v31 }
 0x224   :  { %1849 = vrot.lane.b32.xlu0 %v1841_v36, %s3764_s17  ;;  %3203 = vmatprep.subr.bf16.mxu1 %v3202_v33  ;;  %v1599_v36 = vrot.slane %v4809_v40, 7 }
 0x225   :  { %3564 = vrot.lane.b32.xlu1 %v3563_v42, %s3765_s23 }
 0x226   :  { %v1601_v42 = vsel %vm1595_vm11, %v1599_v36, %v1600_v9 }
 0x227   :  { %3205 = vmatpush3.bf16.msra.mxu1 %v3204_v63 }
 0x228   :  { %1817 = vrot.lane.b32.xlu0 %v1809_v41, %s3766_s4 }
 0x229   :  { %1851 = vrot.lane.b32.xlu1 %v1842_v14, %s3764_s17  ;;  %v1392_v52 = vpop.permute.xlu0 %1391 }
 0x22a   :  { %v1394_v61 = vpop.permute.xlu1 %1393 }
 0x22b   :  { %v1440_v59 = vsel %vm253_vm4, %v1392_v52, %v1394_v61 }
 0x22c   :  { %1652 = vrot.lane.b32.xlu0 %v1644_v2, %s3764_s17  ;;  %v1472_v27 = vmax.f32 %v4600_v22, %v1440_v59  ;;  %v3568_v22 = vpack.i.bf16 %v1564_v30, %v1747_v28 }
 0x22d   :  { %1819 = vrot.lane.b32.xlu1 %v1810_v44, %s3766_s4  ;;  %v1388_v15 = vpop.permute.xlu0 %1387 }
 0x22e   :  { %v1390_v16 = vpop.permute.xlu1 %1389  ;;  %v4857_v35 = vmax.f32 %v1472_v27, 0.0 }
 0x22f   :  { %v1439_v53 = vsel %vm253_vm4, %v1388_v15, %v1390_v16 }
 0x230   :  { %v1471_v4 = vmax.f32 %v4603_v43, %v1439_v53  ;;  %3559 = vrot.lane.b32.xlu0 %v3558_v46, %s3767_s3  ;;  %v3573_v43 = vpack.i.bf16 %v1748_v19, %v1563_v39  ;;  %v1522_v8 = vrot.slane %v4857_v35, 6  ;;  %v1749_v41 = vrot.slane %v4857_v35, 1 }
 0x231   :  { %1654 = vrot.lane.b32.xlu1 %v1645_v17, %s3764_s17  ;;  %v1843_v14 = vrot.slane %v4857_v35, 2  ;;  %v1603_v61 = vrot.slane %v4857_v35, 7 }
 0x232   :  { %v4852_v32 = vmax.f32 %v1471_v4, 0.0 }
 0x234   :  { %1620 = vrot.lane.b32.xlu0 %v1598_v24, %s3766_s4  ;;  %v1521_v39 = vrot.slane %v4852_v32, 6  ;;  %v1811_v11 = vrot.slane %v4852_v32, 4  ;;  %v1714_v45 = vrot.slane %v4852_v32, 3  ;;  %v1565_v54 = vrot.slane %v4852_v32, 1 }
 0x235   :  { %3574 = vrot.lane.b32.xlu1 %v3573_v43, %s3765_s23  ;;  %v1602_v56 = vrot.slane %v4852_v32, 7 }
 0x236   :  { %v1523_v25 = vsel %vm842_vm9, %v1521_v39, %v1522_v8  ;;  %v1750_v49 = vsel %vm1744_vm10, %v1565_v54, %v1749_v41 }
 0x237   :  { %v3583_v51 = vpack.i.bf16 %v1523_v25, %v1714_v45  ;;  %v3588_v57 = vpack.i.bf16 %v1749_v41, %v1750_v49 }
 0x238   :  { %3569 = vrot.lane.b32.xlu0 %v3568_v22, %s3765_s23 }
 0x239   :  { %3579 = vrot.lane.b32.xlu1 %v3578_v37, %s3767_s3 }
 0x23c   :  { %1622 = vrot.lane.b32.xlu0 %v1601_v42, %s3766_s4 }
 0x23d   :  { %1821 = vrot.lane.b32.xlu1 %v1811_v11, %s3766_s4  ;;  %v1400_v55 = vpop.permute.xlu0 %1399 }
 0x23e   :  { %v1402_v1 = vpop.permute.xlu1 %1401 }
 0x23f   :  { %v1442_v0 = vsel %vm253_vm4, %v1400_v55, %v1402_v1 }
 0x240   :  { %v1474_v52 = vmax.f32 %v4618_v48, %v1442_v0  ;;  %1853 = vrot.lane.b32.xlu0 %v1843_v14, %s3764_s17  ;;  %v1604_v48 = vsel %vm1595_vm11, %v1602_v56, %v1603_v61 }
 0x241   :  { %3584 = vrot.lane.b32.xlu1 %v3583_v51, %s3767_s3  ;;  %v1396_v33 = vpop.permute.xlu0 %1395 }
 0x242   :  { %v1398_v21 = vpop.permute.xlu1 %1397  ;;  %v4881_v2 = vmax.f32 %v1474_v52, 0.0 }
 0x243   :  { %v1441_v62 = vsel %vm253_vm4, %v1396_v33, %v1398_v21 }
 0x244   :  { %v1473_v63 = vmax.f32 %v4621_v5, %v1441_v62  ;;  %3589 = vrot.lane.b32.xlu0 %v3588_v57, %s3765_s23  ;;  %v1844_v12 = vrot.slane %v4881_v2, 2  ;;  %v1751_v16 = vrot.slane %v4881_v2, 1  ;;  %v1525_v53 = vrot.slane %v4881_v2, 6 }
 0x245   :  { %1624 = vrot.lane.b32.xlu1 %v1604_v48, %s3766_s4  ;;  %v1606_v19 = vrot.slane %v4881_v2, 7 }
 0x246   :  { %v4888_v44 = vmax.f32 %v1473_v63, 0.0 }
 0x248   :  { %v1812_v30 = vrot.slane %v4888_v44, 4  ;;  %v1566_v15 = vrot.slane %v4888_v44, 1  ;;  %v1524_v5 = vrot.slane %v4888_v44, 6  ;;  %v1605_v17 = vrot.slane %v4888_v44, 7 }
 0x249   :  { %1855 = vrot.lane.b32.xlu1 %v1844_v12, %s3764_s17  ;;  %v1715_v60 = vrot.slane %v4888_v44, 3 }
 0x24a   :  { %1823 = vrot.lane.b32.xlu0 %v1812_v30, %s3766_s4  ;;  %v3593_v46 = vpack.i.bf16 %v1566_v15, %v1751_v16  ;;  %v1752_v28 = vsel %vm1744_vm10, %v1566_v15, %v1751_v16  ;;  %v1526_v4 = vsel %vm842_vm9, %v1524_v5, %v1525_v53  ;;  %v1607_v20 = vsel %vm1595_vm11, %v1605_v17, %v1606_v19 }
 0x24b   :  { %v3598_v59 = vpack.i.bf16 %v1752_v28, %v1565_v54  ;;  %v3603_v29 = vpack.i.bf16 %v1526_v4, %v1715_v60 }
 0x24d   :  { %3594 = vrot.lane.b32.xlu1 %v3593_v46, %s3765_s23 }
 0x24e   :  { %3599 = vrot.lane.b32.xlu0 %v3598_v59, %s3765_s23 }
 0x251   :  { %1626 = vrot.lane.b32.xlu1 %v1607_v20, %s3766_s4  ;;  %v1408_v27 = vpop.permute.xlu0 %1407 }
 0x252   :  { %v1410_v23 = vpop.permute.xlu1 %1409  ;;  %3604 = vrot.lane.b32.xlu0 %v3603_v29, %s3767_s3 }
 0x253   :  { %v1444_v24 = vsel %vm253_vm4, %v1408_v27, %v1410_v23 }
 0x254   :  { %v1476_v43 = vmax.f32 %v4637_v58, %v1444_v24 }
 0x255   :  { %v1404_v31 = vpop.permute.xlu0 %1403 }
 0x256   :  { %v1406_v18 = vpop.permute.xlu1 %1405  ;;  %v4910_v22 = vmax.f32 %v1476_v43, 0.0 }
 0x257   :  { %v1443_v37 = vsel %vm253_vm4, %v1404_v31, %v1406_v18  ;;  %v2113_v31 = vld [vmem:[%s5496_s6 + $0x100] sm:$0xff]  ;;  %v2114_v18 = vld [vmem:[%s5496_s6 + $0x108] sm:$0xff] }
 0x258   :  { %v1475_v36 = vmax.f32 %v4639_v6, %v1443_v37  ;;  %v1753_v9 = vrot.slane %v4910_v22, 1  ;;  %v1528_v8 = vrot.slane %v4910_v22, 6  ;;  %v1609_v1 = vrot.slane %v4910_v22, 7 }
 0x259   :  { %v4967_v37 = vpack.c.bf16 %v2114_v18, %v2113_v31 }
 0x25a   :  { %v4914_v39 = vmax.f32 %v1475_v36, 0.0 }
 0x25b   :  { %3207 = vmatprep.subr.bf16.mxu1 %v4967_v37 }
 0x25c   :  { %v1813_v42 = vrot.slane %v4914_v39, 4  ;;  %v1567_v11 = vrot.slane %v4914_v39, 1  ;;  %v1527_v58 = vrot.slane %v4914_v39, 6  ;;  %v1716_v45 = vrot.slane %v4914_v39, 3 }
 0x25d   :  { %v1608_v41 = vrot.slane %v4914_v39, 7 }
 0x25e   :  { %1825 = vrot.lane.b32.xlu0 %v1813_v42, %s3766_s4  ;;  %v1754_v54 = vsel %vm1744_vm10, %v1567_v11, %v1753_v9  ;;  %v1529_v6 = vsel %vm842_vm9, %v1527_v58, %v1528_v8 }
 0x25f   :  { %v3613_v25 = vpack.i.bf16 %v1753_v9, %v1754_v54  ;;  %v3608_v55 = vpack.i.bf16 %v1529_v6, %v1716_v45  ;;  %v1610_v0 = vsel %vm1595_vm11, %v1608_v41, %v1609_v1 }
 0x261   :  { %3614 = vrot.lane.b32.xlu1 %v3613_v25, %s3765_s23 }
 0x262   :  { %3609 = vrot.lane.b32.xlu0 %v3608_v55, %s3767_s3 }
 0x265   :  { %v1416_v14 = vpop.permute.xlu0 %1415 }
 0x266   :  { %v1418_v51 = vpop.permute.xlu1 %1417  ;;  %1628 = vrot.lane.b32.xlu0 %v1610_v0, %s3766_s4 }
 0x267   :  { %v1446_v49 = vsel %vm253_vm4, %v1416_v14, %v1418_v51 }
 0x268   :  { %v1478_v52 = vmax.f32 %v4655_v26, %v1446_v49 }
 0x269   :  { %v1412_v56 = vpop.permute.xlu0 %1411 }
 0x26a   :  { %v1414_v33 = vpop.permute.xlu1 %1413  ;;  %v4934_v57 = vmax.f32 %v1478_v52, 0.0 }
 0x26b   :  { %v1445_v21 = vsel %vm253_vm4, %v1412_v56, %v1414_v33 }
 0x26c   :  { %v1477_v61 = vmax.f32 %v4657_v38, %v1445_v21  ;;  %v1755_v12 = vrot.slane %v4934_v57, 1  ;;  %v1531_v38 = vrot.slane %v4934_v57, 6  ;;  %v1612_v28 = vrot.slane %v4934_v57, 7 }
 0x26e   :  { %v4937_v62 = vmax.f32 %v1477_v61, 0.0 }
 0x270   :  { %v1814_v63 = vrot.slane %v4937_v62, 4  ;;  %v1568_v48 = vrot.slane %v4937_v62, 1  ;;  %v1530_v30 = vrot.slane %v4937_v62, 6  ;;  %v1611_v5 = vrot.slane %v4937_v62, 7 }
 0x271   :  { %v1717_v46 = vrot.slane %v4937_v62, 3 }
 0x272   :  { %1827 = vrot.lane.b32.xlu1 %v1814_v63, %s3766_s4  ;;  %v3618_v26 = vpack.i.bf16 %v1568_v48, %v1755_v12  ;;  %v1756_v15 = vsel %vm1744_vm10, %v1568_v48, %v1755_v12  ;;  %v1532_v59 = vsel %vm842_vm9, %v1530_v30, %v1531_v38  ;;  %v1613_v53 = vsel %vm1595_vm11, %v1611_v5, %v1612_v28 }
 0x273   :  { %v3623_v16 = vpack.i.bf16 %v1756_v15, %v1567_v11  ;;  %v3628_v17 = vpack.i.bf16 %v1532_v59, %v1717_v46 }
 0x274   :  { %3619 = vrot.lane.b32.xlu0 %v3618_v26, %s3765_s23 }
 0x276   :  { %3624 = vrot.lane.b32.xlu1 %v3623_v16, %s3765_s23 }
 0x278   :  { %1630 = vrot.lane.b32.xlu0 %v1613_v53, %s3766_s4 }
 0x279   :  { %v1424_v60 = vpop.permute.xlu0 %1423 }
 0x27a   :  { %v1426_v4 = vpop.permute.xlu1 %1425  ;;  %3629 = vrot.lane.b32.xlu1 %v3628_v17, %s3767_s3 }
 0x27b   :  { %v1448_v19 = vsel %vm253_vm4, %v1424_v60, %v1426_v4 }
 0x27c   :  { %v1480_v20 = vmax.f32 %v4673_v34, %v1448_v19 }
 0x27d   :  { %v1420_v29 = vpop.permute.xlu0 %1419 }
 0x27e   :  { %v1422_v27 = vpop.permute.xlu1 %1421  ;;  %v4957_v23 = vmax.f32 %v1480_v20, 0.0 }
 0x27f   :  { %v1447_v24 = vsel %vm253_vm4, %v1420_v29, %v1422_v27 }
 0x280   :  { %v1479_v43 = vmax.f32 %v4675_v10, %v1447_v24  ;;  %v1757_v34 = vrot.slane %v4957_v23, 1  ;;  %v1534_v9 = vrot.slane %v4957_v23, 6  ;;  %v1615_v55 = vrot.slane %v4957_v23, 7 }
 0x282   :  { %v4969_v36 = vmax.f32 %v1479_v43, 0.0 }
 0x284   :  { %v1815_v10 = vrot.slane %v4969_v36, 4  ;;  %v1569_v8 = vrot.slane %v4969_v36, 1  ;;  %v1533_v42 = vrot.slane %v4969_v36, 6  ;;  %v1718_v11 = vrot.slane %v4969_v36, 3 }
 0x285   :  { %v1614_v25 = vrot.slane %v4969_v36, 7 }
 0x286   :  { %1829 = vrot.lane.b32.xlu1 %v1815_v10, %s3766_s4  ;;  %v1758_v58 = vsel %vm1744_vm10, %v1569_v8, %v1757_v34  ;;  %v1535_v45 = vsel %vm842_vm9, %v1533_v42, %v1534_v9  ;;  %v1647_v9 = vrot.slane %v4888_v44, 2  ;;  %v1846_v42 = vrot.slane %v4934_v57, 2 }
 0x287   :  { %v3638_v54 = vpack.i.bf16 %v1757_v34, %v1758_v58  ;;  %v3633_v6 = vpack.i.bf16 %v1535_v45, %v1718_v11  ;;  %v1616_v41 = vsel %vm1595_vm11, %v1614_v25, %v1615_v55 }
 0x289   :  { %3639 = vrot.lane.b32.xlu0 %v3638_v54, %s3765_s23 }
 0x28a   :  { %3634 = vrot.lane.b32.xlu1 %v3633_v6, %s3767_s3 }
 0x28e   :  { %1632 = vrot.lane.b32.xlu1 %v1616_v41, %s3766_s4  ;;  %v1432_v1 = vpop.permute.xlu0 %1431 }
 0x28f   :  { %v1434_v14 = vpop.permute.xlu1 %1433 }
 0x290   :  { %v1450_v0 = vsel %vm253_vm4, %v1432_v1, %v1434_v14 }
 0x291   :  { %v1482_v51 = vmax.f32 %v4747_v3, %v1450_v0 }
 0x292   :  { %v1428_v49 = vpop.permute.xlu0 %1427 }
 0x293   :  { %v1430_v52 = vpop.permute.xlu1 %1429  ;;  %v4990_v33 = vmax.f32 %v1482_v51, 0.0 }
 0x294   :  { %v1449_v56 = vsel %vm253_vm4, %v1428_v49, %v1430_v52  ;;  %vm2466_vm4 = vcmask 1044484  }
 0x295   :  { %v1481_v21 = vmax.f32 %v4749_v7, %v1449_v56  ;;  %v1759_v26 = vrot.slane %v4990_v33, 1  ;;  %v1537_v59 = vrot.slane %v4990_v33, 6  ;;  %v1618_v60 = vrot.slane %v4990_v33, 7 }
 0x296   :  { %v1850_v61 = vpop.permute.xlu0 %1849 }
 0x297   :  { %v4993_v63 = vmax.f32 %v1481_v21, 0.0  ;;  %v3565_v48 = vpop.permute.xlu1 %3564 }
 0x298   :  { %v3567_v43 = vunpack.i.h.bf16 %v3565_v48  ;;  %v3566_v31 = vunpack.i.l.bf16 %v3565_v48 }
 0x299   :  { %v1816_v12 = vrot.slane %v4993_v63, 4  ;;  %v1570_v30 = vrot.slane %v4993_v63, 1  ;;  %v1536_v15 = vrot.slane %v4993_v63, 6  ;;  %v1617_v28 = vrot.slane %v4993_v63, 7 }
 0x29a   :  { %v1818_v3 = vpop.permute.xlu0 %1817  ;;  %v1719_v53 = vrot.slane %v4993_v63, 3 }
 0x29b   :  { %v1921_v16 = vsel %vm1703_vm12, %v1818_v3, %v1850_v61  ;;  %v1852_v5 = vpop.permute.xlu1 %1851  ;;  %1831 = vrot.lane.b32.xlu0 %v1816_v12, %s3766_s4  ;;  %v3643_v7 = vpack.i.bf16 %v1570_v30, %v1759_v26  ;;  %v1760_v38 = vsel %vm1744_vm10, %v1570_v30, %v1759_v26  ;;  %v1538_v4 = vsel %vm842_vm9, %v1536_v15, %v1537_v59  ;;  %v2116_v15 = vld [vmem:[%s5496_s6 + $0x118] sm:$0xff] }
 0x29c   :  { %v3648_v46 = vpack.i.bf16 %v1760_v38, %v1569_v8  ;;  %v1619_v29 = vsel %vm1595_vm11, %v1617_v28, %v1618_v60  ;;  %v3653_v27 = vpack.i.bf16 %v1538_v4, %v1719_v53  ;;  %v1975_v10 = vrot.slane %v1921_v16, 2 }
 0x29d   :  { %3644 = vrot.lane.b32.xlu1 %v3643_v7, %s3765_s23  ;;  %v1646_v8 = vrot.slane %v4852_v32, 2  ;;  %v1845_v61 = vrot.slane %v4910_v22, 2  ;;  %v1648_v60 = vrot.slane %v4914_v39, 2  ;;  %vm3770_vm9 = vmmov 0  }
 0x29e   :  { %v1653_v17 = vpop.permute.xlu0 %1652 }
 0x29f   :  { %v5008_v19 = vpop.permute.xlu1 %1819  ;;  %3649 = vrot.lane.b32.xlu0 %v3648_v46, %s3765_s23 }
 0x2a0   :  { %v5013_v20 = vsel %vm1703_vm12, %v5008_v19, %v1852_v5 }
 0x2a1   :  { %1634 = vrot.lane.b32.xlu1 %v1619_v29, %s3766_s4  ;;  %v1983_v29 = vrot.slane %v5013_v20, 2 }
 0x2a2   :  { %v3560_v24 = vpop.permute.xlu0 %3559 }
 0x2a3   :  { %v3561_v18 = vunpack.i.l.bf16 %v3560_v24  ;;  %v1655_v34 = vpop.permute.xlu1 %1654  ;;  %3654 = vrot.lane.b32.xlu0 %v3653_v27, %s3767_s3  ;;  %v3562_v11 = vunpack.i.h.bf16 %v3560_v24 }
 0x2a5   :  { %1658 = vrot.lane.b32.xlu1 %v1647_v9, %s3764_s17  ;;  %v1889_v58 = vsel %vm1685_vm13, %v3561_v18, %v3566_v31  ;;  %v1890_v45 = vsel %vm1685_vm13, %v3561_v18, %v3567_v43  ;;  %v1873_v54 = vsel %vm1676_vm15, %v4730_v50, %v3561_v18  ;;  %v1874_v41 = vsel %vm1676_vm15, %v4728_v47, %v3561_v18  ;;  %v2117_v18 = vld [vmem:[%s5496_s6 + $0x120] sm:$0xff]  ;;  %v2118_v9 = vld [vmem:[%s5496_s6 + $0x128] sm:$0xff] }
 0x2a6   :  { %v1621_v6 = vpop.permute.xlu0 %1620  ;;  %v1905_v25 = vsel %vm1694_vm14, %v1889_v58, %v1818_v3  ;;  %v1906_v55 = vsel %vm1694_vm14, %v1890_v45, %v1818_v3  ;;  %v1969_v1 = vrot.slane %v1873_v54, 2  ;;  %v1970_v52 = vrot.slane %v1874_v41, 2  ;;  %v2115_v3 = vld [vmem:[%s5496_s6 + $0x110] sm:$0xff] }
 0x2a7   :  { %v1704_v14 = vsel %vm1703_vm12, %v1621_v6, %v1653_v17  ;;  %v3575_v0 = vpop.permute.xlu1 %3574  ;;  %1656 = vrot.lane.b32.xlu0 %v1646_v8, %s3764_s17  ;;  %v1972_v51 = vrot.slane %v1905_v25, 2  ;;  %v1973_v49 = vrot.slane %v1906_v55, 2  ;;  %v1649_v47 = vrot.slane %v4937_v62, 2 }
 0x2a8   :  { %v3576_v56 = vunpack.i.l.bf16 %v3575_v0  ;;  %v5033_v21 = vsel %vm825_vm0, %v1704_v14, %v1975_v10  ;;  %v1677_v30 = vsel %vm1676_vm15, %v4730_v50, %v3562_v11  ;;  %v1971_v26 = vsel %vm808_vm7, %v1969_v1, %v1970_v52 }
 0x2a9   :  { %1859 = vrot.lane.b32.xlu1 %v1846_v42, %s3764_s17  ;;  %v1974_v46 = vsel %vm808_vm7, %v1972_v51, %v1973_v49  ;;  %v3577_v50 = vunpack.i.h.bf16 %v3575_v0  ;;  %v2057_v17 = vsel %vm825_vm0, %v1677_v30, %v1971_v26  ;;  %v3210_v4 = vpack.c.bf16 %v2116_v15, %v2115_v3  ;;  %v2120_v51 = vld [vmem:[%s5496_s6 + $0x138] sm:$0xff]  ;;  %v2121_v3 = vld [vmem:[%s5496_s6 + $0x140] sm:$0xff] }
 0x2aa   :  { %v3570_v48 = vpop.permute.xlu0 %3569  ;;  %v1686_v12 = vsel %vm1685_vm13, %v3562_v11, %v3576_v56  ;;  %v1848_v31 = vrot.slane %v4990_v33, 2  ;;  %v1651_v56 = vrot.slane %v4993_v63, 2 }
 0x2ab   :  { %v3572_v16 = vunpack.i.h.bf16 %v3570_v48  ;;  %v3571_v5 = vunpack.i.l.bf16 %v3570_v48  ;;  %v3580_v7 = vpop.permute.xlu1 %3579  ;;  %1857 = vrot.lane.b32.xlu0 %v1845_v61, %s3764_s17  ;;  %v1695_v38 = vsel %vm1694_vm14, %v1686_v12, %v1621_v6  ;;  %v1650_v12 = vrot.slane %v4969_v36, 2 }
 0x2ac   :  { %v3582_v28 = vunpack.i.h.bf16 %v3580_v7  ;;  %v3581_v59 = vunpack.i.l.bf16 %v3580_v7  ;;  %v2058_v53 = vsel %vm825_vm0, %v1695_v38, %v1974_v46 }
 0x2ad   :  { %1662 = vrot.lane.b32.xlu1 %v1649_v47, %s3764_s17  ;;  %2222 = vmatprep.mubr.f32.mxu1 %v2058_v53 }
 0x2ae   :  { %v1891_v27 = vsel %vm1685_vm13, %v3581_v59, %v3577_v50  ;;  %v1892_v24 = vsel %vm1685_vm13, %v3581_v59, %v3571_v5  ;;  %v1623_v43 = vpop.permute.xlu0 %1622  ;;  %2223 = vmatmul.mubr.f32.vlgmr.msra.gmra.mrb[0].mxu1 %v2057_v17  ;;  %v1687_v10 = vsel %vm1685_vm13, %v3582_v28, %v3572_v16  ;;  %v1875_v6 = vsel %vm1676_vm15, %v4809_v40, %v3581_v59 }
 0x2af   :  { %v1705_v20 = vsel %vm1703_vm12, %v1623_v43, %v1655_v34  ;;  %v1822_v8 = vpop.permute.xlu1 %1821  ;;  %1660 = vrot.lane.b32.xlu0 %v1648_v60, %s3764_s17  ;;  %v1907_v42 = vsel %vm1694_vm14, %v1891_v27, %v5008_v19  ;;  %v1908_v11 = vsel %vm1694_vm14, %v1892_v24, %v5008_v19  ;;  %3209 = vmatpush3.bf16.msra.mxu1 %v4967_v37  ;;  %v1847_v34 = vrot.slane %v4957_v23, 2  ;;  %v2119_v37 = vld [vmem:[%s5496_s6 + $0x130] sm:$0xff] }
 0x2b0   :  { %v5073_v58 = vsel %vm825_vm0, %v1705_v20, %v1983_v29  ;;  %v1980_v45 = vrot.slane %v1907_v42, 2  ;;  %v1981_v54 = vrot.slane %v1908_v11, 2  ;;  %v1876_v25 = vsel %vm1676_vm15, %v4791_v13, %v3581_v59  ;;  %3211 = vmatprep.subr.bf16.mxu1 %v3210_v4  ;;  %v2124_v59 = vld [vmem:[%s5496_s6 + $0x158] sm:$0xff] }
 0x2b1   :  { %1863 = vrot.lane.b32.xlu1 %v1848_v31, %s3764_s17  ;;  %v1977_v55 = vrot.slane %v1875_v6, 2  ;;  %v3214_v19 = vpack.c.bf16 %v2118_v9, %v2117_v18  ;;  %v1696_v41 = vsel %vm1694_vm14, %v1687_v10, %v1623_v43  ;;  %v1978_v0 = vrot.slane %v1876_v25, 2 }
 0x2b2   :  { %v1854_v1 = vpop.permute.xlu0 %1853  ;;  %v1982_v14 = vsel %vm808_vm7, %v1980_v45, %v1981_v54  ;;  %v1678_v61 = vsel %vm1676_vm15, %v4809_v40, %v3582_v28  ;;  %v3218_v30 = vpack.c.bf16 %v2120_v51, %v2119_v37  ;;  %v2122_v40 = vld [vmem:[%s5496_s6 + $0x148] sm:$0xff]  ;;  %v2123_v28 = vld [vmem:[%s5496_s6 + $0x150] sm:$0xff] }
 0x2b3   :  { %v5091_v49 = vsel %vm1703_vm12, %v1822_v8, %v1854_v1  ;;  %v3585_v13 = vpop.permute.xlu1 %3584  ;;  %1861 = vrot.lane.b32.xlu0 %v1847_v34, %s3764_s17  ;;  %v2061_v52 = vsel %vm825_vm0, %v1696_v41, %v1982_v14  ;;  %v1979_v48 = vsel %vm808_vm7, %v1977_v55, %v1978_v0  ;;  %3213 = vmatpush3.bf16.msra.mxu1 %v3210_v4 }
 0x2b4   :  { %2227 = vmatprep.mubr.f32.mxu1 %v2061_v52  ;;  %v2060_v47 = vsel %vm825_vm0, %v1678_v61, %v1979_v48  ;;  %3215 = vmatprep.subr.bf16.mxu1 %v3214_v19  ;;  %v3586_v7 = vunpack.i.l.bf16 %v3585_v13  ;;  %v3222_v38 = vpack.c.bf16 %v2122_v40, %v2121_v3  ;;  %v3226_v43 = vpack.c.bf16 %v2124_v59, %v2123_v28 }
 0x2b5   :  { %1666 = vrot.lane.b32.xlu1 %v1651_v56, %s3764_s17  ;;  %2228 = vmatmul.mubr.f32.gmra.mrb[2].mxu1 %v2060_v47  ;;  %v3587_v9 = vunpack.i.h.bf16 %v3585_v13 }
 0x2b6   :  { %v3590_v26 = vpop.permute.xlu0 %3589  ;;  %v1877_v60 = vsel %vm1676_vm15, %v4852_v32, %v3586_v7  ;;  %v1878_v4 = vsel %vm1676_vm15, %v4857_v35, %v3586_v7  ;;  %v2125_v35 = vld [vmem:[%s5496_s6 + $0x160] sm:$0xff] }
 0x2b7   :  { %v3592_v15 = vunpack.i.h.bf16 %v3590_v26  ;;  %v3591_v16 = vunpack.i.l.bf16 %v3590_v26  ;;  %v5108_v5 = vpop.permute.xlu1 %1624  ;;  %1664 = vrot.lane.b32.xlu0 %v1650_v12, %s3764_s17  ;;  %3217 = vmatpush3.bf16.msra.mxu1 %v3214_v19  ;;  %v1985_v31 = vrot.slane %v1877_v60, 2  ;;  %v1986_v18 = vrot.slane %v1878_v4, 2 }
 0x2b8   :  { %3219 = vmatprep.subr.bf16.mxu1 %v3218_v30  ;;  %v1679_v19 = vsel %vm1676_vm15, %v4852_v32, %v3587_v9 }
 0x2b9   :  { %v1894_v46 = vsel %vm1685_vm13, %v3586_v7, %v3592_v15  ;;  %v1893_v50 = vsel %vm1685_vm13, %v3586_v7, %v3591_v16  ;;  %v1987_v54 = vsel %vm808_vm7, %v1985_v31, %v1986_v18 }
 0x2ba   :  { %v1910_v29 = vsel %vm1694_vm14, %v1894_v46, %v1822_v8  ;;  %v1909_v27 = vsel %vm1694_vm14, %v1893_v50, %v1822_v8  ;;  %v2063_v51 = vsel %vm825_vm0, %v1679_v19, %v1987_v54 }
 0x2bb   :  { %v1856_v53 = vpop.permute.xlu1 %1855  ;;  %3221 = vmatpush3.bf16.msra.mxu1 %v3218_v30  ;;  %v1988_v20 = vrot.slane %v1909_v27, 2  ;;  %v1989_v42 = vrot.slane %v1910_v29, 2 }
 0x2bc   :  { %v1824_v17 = vpop.permute.xlu0 %1823  ;;  %3223 = vmatprep.subr.bf16.mxu1 %v3222_v38 }
 0x2bd   :  { %v5126_v24 = vsel %vm1703_vm12, %v1824_v17, %v1856_v53  ;;  %v1990_v55 = vsel %vm808_vm7, %v1988_v20, %v1989_v42 }
 0x2bf   :  { %3225 = vmatpush3.bf16.msra.mxu1 %v3222_v38  ;;  %v3595_v11 = vpop.permute.xlu1 %3594 }
 0x2c0   :  { %v3600_v10 = vpop.permute.xlu0 %3599  ;;  %3227 = vmatprep.subr.bf16.mxu1 %v3226_v43  ;;  %v3596_v6 = vunpack.i.l.bf16 %v3595_v11  ;;  %v3597_v37 = vunpack.i.h.bf16 %v3595_v11 }
 0x2c1   :  { %v3601_v45 = vunpack.i.l.bf16 %v3600_v10  ;;  %v3602_v41 = vunpack.i.h.bf16 %v3600_v10 }
 0x2c3   :  { %v1688_v8 = vsel %vm1685_vm13, %v3587_v9, %v3601_v45  ;;  %3229 = vmatpush3.bf16.msra.mxu1 %v3226_v43  ;;  %v5149_v3 = vpop.permute.xlu1 %1626 }
 0x2c4   :  { %v3605_v34 = vpop.permute.xlu0 %3604  ;;  %v1697_v25 = vsel %vm1694_vm14, %v1688_v8, %v5108_v5  ;;  %3052 = vmatprep.subr.mxu1 %v2125_v35 }
 0x2c5   :  { %v3607_v1 = vunpack.i.h.bf16 %v3605_v34  ;;  %v3606_v14 = vunpack.i.l.bf16 %v3605_v34  ;;  %v2064_v0 = vsel %vm825_vm0, %v1697_v25, %v1990_v55 }
 0x2c6   :  { %2232 = vmatprep.mubr.f32.mxu1 %v2064_v0 }
 0x2c7   :  { %v1895_v13 = vsel %vm1685_vm13, %v3606_v14, %v3602_v41  ;;  %v1896_v52 = vsel %vm1685_vm13, %v3606_v14, %v3596_v6  ;;  %2233 = vmatmul.mubr.f32.gmra.mrb[4].mxu1 %v2063_v51  ;;  %v1689_v56 = vsel %vm1685_vm13, %v3607_v1, %v3597_v37  ;;  %v1879_v48 = vsel %vm1676_vm15, %v4888_v44, %v3606_v14 }
 0x2c8   :  { %v1911_v32 = vsel %vm1694_vm14, %v1895_v13, %v1824_v17  ;;  %v1912_v61 = vsel %vm1694_vm14, %v1896_v52, %v1824_v17  ;;  %3053 = vmatpush3.msra.mxu1 %v2125_v35  ;;  %v1880_v30 = vsel %vm1676_vm15, %v4881_v2, %v3606_v14  ;;  %v1993_v26 = vrot.slane %v1879_v48, 2 }
 0x2c9   :  { %v1996_v47 = vrot.slane %v1911_v32, 2  ;;  %v1997_v12 = vrot.slane %v1912_v61, 2  ;;  %v1994_v40 = vrot.slane %v1880_v30, 2  ;;  %v1698_v15 = vsel %vm1694_vm14, %v1689_v56, %v5149_v3 }
 0x2ca   :  { %v1680_v38 = vsel %vm1676_vm15, %v4888_v44, %v3607_v1 }
 0x2cb   :  { %v1998_v16 = vsel %vm808_vm7, %v1996_v47, %v1997_v12  ;;  %v1995_v46 = vsel %vm808_vm7, %v1993_v26, %v1994_v40 }
 0x2cc   :  { %v2067_v7 = vsel %vm825_vm0, %v1698_v15, %v1998_v16  ;;  %v2066_v50 = vsel %vm825_vm0, %v1680_v38, %v1995_v46 }
 0x2cd   :  { %2237 = vmatprep.mubr.f32.mxu1 %v2067_v7 }
 0x2ce   :  { %2238 = vmatmul.mubr.f32.gmra.mrb[6].mxu1 %v2066_v50 }
 0x2d0   :  { %v5159_v2 = vpop.permute.xlu0 %1825 }
 0x2d3   :  { %v3615_v28 = vpop.permute.xlu1 %3614 }
 0x2d4   :  { %v3610_v59 = vpop.permute.xlu0 %3609  ;;  %v3617_v53 = vunpack.i.h.bf16 %v3615_v28  ;;  %v3616_v17 = vunpack.i.l.bf16 %v3615_v28 }
 0x2d5   :  { %v3611_v60 = vunpack.i.l.bf16 %v3610_v59  ;;  %v3612_v42 = vunpack.i.h.bf16 %v3610_v59 }
 0x2d7   :  { %v1897_v4 = vsel %vm1685_vm13, %v3611_v60, %v3616_v17  ;;  %v1898_v29 = vsel %vm1685_vm13, %v3611_v60, %v3617_v53  ;;  %v1881_v44 = vsel %vm1676_vm15, %v4914_v39, %v3611_v60  ;;  %v1882_v43 = vsel %vm1676_vm15, %v4910_v22, %v3611_v60 }
 0x2d8   :  { %v5169_v31 = vpop.permute.xlu0 %1628  ;;  %v1913_v18 = vsel %vm1694_vm14, %v1897_v4, %v5159_v2  ;;  %v1914_v9 = vsel %vm1694_vm14, %v1898_v29, %v5159_v2  ;;  %v2001_v10 = vrot.slane %v1881_v44, 2  ;;  %v2002_v20 = vrot.slane %v1882_v43, 2 }
 0x2d9   :  { %v2004_v45 = vrot.slane %v1913_v18, 2  ;;  %v2005_v35 = vrot.slane %v1914_v9, 2  ;;  %v1681_v41 = vsel %vm1676_vm15, %v4914_v39, %v3612_v42 }
 0x2da   :  { %v2003_v22 = vsel %vm808_vm7, %v2001_v10, %v2002_v20 }
 0x2db   :  { %v2006_v19 = vsel %vm808_vm7, %v2004_v45, %v2005_v35  ;;  %v2069_v13 = vsel %vm825_vm0, %v1681_v41, %v2003_v22 }
 0x2e4   :  { %v5163_v27 = vpop.permute.xlu1 %1827 }
 0x2e6   :  { %v3620_v8 = vpop.permute.xlu0 %3619 }
 0x2e7   :  { %v3621_v34 = vunpack.i.l.bf16 %v3620_v8  ;;  %v3622_v51 = vunpack.i.h.bf16 %v3620_v8 }
 0x2e8   :  { %v3625_v11 = vpop.permute.xlu1 %3624 }
 0x2e9   :  { %v3626_v54 = vunpack.i.l.bf16 %v3625_v11  ;;  %v3627_v1 = vunpack.i.h.bf16 %v3625_v11 }
 0x2ea   :  { %v5195_v40 = vpop.permute.xlu0 %1630 }
 0x2eb   :  { %v1690_v6 = vsel %vm1685_vm13, %v3612_v42, %v3626_v54 }
 0x2ec   :  { %v3630_v25 = vpop.permute.xlu1 %3629  ;;  %v1699_v55 = vsel %vm1694_vm14, %v1690_v6, %v5169_v31 }
 0x2ed   :  { %v3632_v14 = vunpack.i.h.bf16 %v3630_v25  ;;  %v3631_v0 = vunpack.i.l.bf16 %v3630_v25  ;;  %v2070_v37 = vsel %vm825_vm0, %v1699_v55, %v2006_v19 }
 0x2ee   :  { %2242 = vmatprep.mubr.f32.mxu1 %v2070_v37 }
 0x2ef   :  { %v1899_v52 = vsel %vm1685_vm13, %v3631_v0, %v3627_v1  ;;  %v1900_v56 = vsel %vm1685_vm13, %v3631_v0, %v3621_v34  ;;  %2243 = vmatmul.mubr.f32.gmra.mrb[8].mxu1 %v2069_v13  ;;  %v1691_v32 = vsel %vm1685_vm13, %v3632_v14, %v3622_v51  ;;  %v1883_v48 = vsel %vm1676_vm15, %v4937_v62, %v3631_v0 }
 0x2f0   :  { %v1915_v61 = vsel %vm1694_vm14, %v1899_v52, %v5163_v27  ;;  %v1916_v39 = vsel %vm1694_vm14, %v1900_v56, %v5163_v27  ;;  %v1884_v30 = vsel %vm1676_vm15, %v4934_v57, %v3631_v0  ;;  %v2009_v26 = vrot.slane %v1883_v48, 2 }
 0x2f1   :  { %v2012_v47 = vrot.slane %v1915_v61, 2  ;;  %v2013_v12 = vrot.slane %v1916_v39, 2  ;;  %v2010_v15 = vrot.slane %v1884_v30, 2  ;;  %v1700_v16 = vsel %vm1694_vm14, %v1691_v32, %v5195_v40 }
 0x2f2   :  { %v1682_v46 = vsel %vm1676_vm15, %v4937_v62, %v3632_v14 }
 0x2f3   :  { %v2014_v7 = vsel %vm808_vm7, %v2012_v47, %v2013_v12  ;;  %v2011_v50 = vsel %vm808_vm7, %v2009_v26, %v2010_v15 }
 0x2f4   :  { %v2073_v38 = vsel %vm825_vm0, %v1700_v16, %v2014_v7  ;;  %v2072_v28 = vsel %vm825_vm0, %v1682_v46, %v2011_v50 }
 0x2f5   :  { %2247 = vmatprep.mubr.f32.mxu1 %v2073_v38 }
 0x2f6   :  { %2248 = vmatmul.mubr.f32.gmra.mrb[10].mxu1 %v2072_v28 }
 0x2f8   :  { %v5205_v57 = vpop.permute.xlu1 %1829 }
 0x2fb   :  { %v3640_v59 = vpop.permute.xlu0 %3639 }
 0x2fc   :  { %v3635_v53 = vpop.permute.xlu1 %3634  ;;  %v3642_v17 = vunpack.i.h.bf16 %v3640_v59  ;;  %v3641_v60 = vunpack.i.l.bf16 %v3640_v59 }
 0x2fd   :  { %v3636_v4 = vunpack.i.l.bf16 %v3635_v53  ;;  %v3637_v35 = vunpack.i.h.bf16 %v3635_v53 }
 0x2ff   :  { %v1901_v29 = vsel %vm1685_vm13, %v3636_v4, %v3641_v60  ;;  %v1902_v44 = vsel %vm1685_vm13, %v3636_v4, %v3642_v17  ;;  %v1885_v18 = vsel %vm1676_vm15, %v4969_v36, %v3636_v4  ;;  %v1886_v9 = vsel %vm1676_vm15, %v4957_v23, %v3636_v4 }
 0x300   :  { %v5209_v43 = vpop.permute.xlu1 %1632  ;;  %v1917_v10 = vsel %vm1694_vm14, %v1901_v29, %v5205_v57  ;;  %v1918_v20 = vsel %vm1694_vm14, %v1902_v44, %v5205_v57  ;;  %v2017_v11 = vrot.slane %v1885_v18, 2  ;;  %v2018_v45 = vrot.slane %v1886_v9, 2 }
 0x301   :  { %v2020_v54 = vrot.slane %v1917_v10, 2  ;;  %v2021_v6 = vrot.slane %v1918_v20, 2  ;;  %v1683_v14 = vsel %vm1676_vm15, %v4969_v36, %v3637_v35  ;;  %v1991_v18 = vrot.slane %v5091_v49, 2 }
 0x302   :  { %v2019_v23 = vsel %vm808_vm7, %v2017_v11, %v2018_v45 }
 0x303   :  { %v2022_v1 = vsel %vm808_vm7, %v2020_v54, %v2021_v6  ;;  %v2075_v32 = vsel %vm825_vm0, %v1683_v14, %v2019_v23 }
 0x30d   :  { %v5211_v62 = vpop.permute.xlu0 %1831 }
 0x30f   :  { %v3645_v42 = vpop.permute.xlu1 %3644 }
 0x310   :  { %v3646_v55 = vunpack.i.l.bf16 %v3645_v42  ;;  %v3647_v52 = vunpack.i.h.bf16 %v3645_v42 }
 0x311   :  { %v3650_v8 = vpop.permute.xlu0 %3649 }
 0x312   :  { %v3651_v22 = vunpack.i.l.bf16 %v3650_v8  ;;  %v3652_v0 = vunpack.i.h.bf16 %v3650_v8 }
 0x313   :  { %v5221_v34 = vpop.permute.xlu1 %1634 }
 0x314   :  { %v1692_v25 = vsel %vm1685_vm13, %v3637_v35, %v3651_v22 }
 0x315   :  { %v3655_v19 = vpop.permute.xlu0 %3654  ;;  %v1701_v41 = vsel %vm1694_vm14, %v1692_v25, %v5209_v43 }
 0x316   :  { %v3657_v37 = vunpack.i.h.bf16 %v3655_v19  ;;  %v3656_v51 = vunpack.i.l.bf16 %v3655_v19  ;;  %v2076_v13 = vsel %vm825_vm0, %v1701_v41, %v2022_v1 }
 0x317   :  { %v1659_v56 = vpop.permute.xlu1 %1658  ;;  %2252 = vmatprep.mubr.f32.mxu1 %v2076_v13 }
 0x318   :  { %v1903_v61 = vsel %vm1685_vm13, %v3656_v51, %v3652_v0  ;;  %v1904_v39 = vsel %vm1685_vm13, %v3656_v51, %v3646_v55  ;;  %2253 = vmatmul.mubr.f32.gmra.mrb[12].mxu1 %v2075_v32  ;;  %v1693_v47 = vsel %vm1685_vm13, %v3657_v37, %v3647_v52  ;;  %v1887_v15 = vsel %vm1676_vm15, %v4993_v63, %v3656_v51 }
 0x319   :  { %v1657_v48 = vpop.permute.xlu0 %1656  ;;  %v1919_v36 = vsel %vm1694_vm14, %v1903_v61, %v5211_v62  ;;  %v1920_v12 = vsel %vm1694_vm14, %v1904_v39, %v5211_v62  ;;  %v1888_v7 = vsel %vm1676_vm15, %v4990_v33, %v3656_v51  ;;  %v2025_v38 = vrot.slane %v1887_v15, 2 }
 0x31a   :  { %v2028_v30 = vrot.slane %v1919_v36, 2  ;;  %v2029_v26 = vrot.slane %v1920_v12, 2  ;;  %v1702_v46 = vsel %vm1694_vm14, %v1693_v47, %v5221_v34  ;;  %v2026_v28 = vrot.slane %v1888_v7, 2 }
 0x31b   :  { %v1860_v16 = vpop.permute.xlu1 %1859  ;;  %v1684_v17 = vsel %vm1676_vm15, %v4993_v63, %v3657_v37  ;;  %v1706_v29 = vsel %vm1703_vm12, %v5108_v5, %v1657_v48  ;;  %v1707_v10 = vsel %vm1703_vm12, %v5149_v3, %v1659_v56  ;;  %v1999_v5 = vrot.slane %v5126_v24, 2 }
 0x31c   :  { %v2030_v50 = vsel %vm808_vm7, %v2028_v30, %v2029_v26  ;;  %v2027_v60 = vsel %vm808_vm7, %v2025_v38, %v2026_v28  ;;  %v2065_v20 = vsel %vm825_vm0, %v1706_v29, %v1991_v18  ;;  %v2870_v26 = vld [vmem:[%s5497_s7] ss:$0 sm:$0xff]  ;;  %s3768_s7 = smov 64   ;;  %vm2475_vm7 = vcmask 1047559  }
 0x31d   :  { %v1858_v59 = vpop.permute.xlu0 %1857  ;;  %v2079_v53 = vsel %vm825_vm0, %v1702_v46, %v2030_v50  ;;  %v2078_v33 = vsel %vm825_vm0, %v1684_v17, %v2027_v60  ;;  %v2068_v11 = vsel %vm825_vm0, %v1707_v10, %v1999_v5 }
 0x31e   :  { %2257 = vmatprep.mubr.f32.mxu1 %v2079_v53  ;;  %v1925_v9 = vsel %vm1703_vm12, %v5159_v2, %v1858_v59  ;;  %v1926_v2 = vsel %vm1703_vm12, %v5163_v27, %v1860_v16 }
 0x31f   :  { %v1663_v4 = vpop.permute.xlu1 %1662  ;;  %2258 = vmatmul.mubr.f32.gmra.mrb[14].mxu1 %v2078_v33  ;;  %v2007_v42 = vrot.slane %v1925_v9, 2 }
 0x320   :  { %3054 = vmatprep.mubr.msk.f32.mxu1 %vm2133_vm1, %v5033_v21 }
 0x321   :  { %v1661_v44 = vpop.permute.xlu0 %1660 }
 0x322   :  { %v1708_v21 = vsel %vm1703_vm12, %v5169_v31, %v1661_v44  ;;  %v2015_v31 = vrot.slane %v1926_v2, 2 }
 0x323   :  { %v1864_v63 = vpop.permute.xlu1 %1863  ;;  %3055 = vmatmul.mubr.msk.f32.vlgmr.msra.gmra.mrb[16].mxu1 %vm2133_vm1, %v5073_v58  ;;  %v1709_v58 = vsel %vm1703_vm12, %v5195_v40, %v1663_v4  ;;  %v2071_v24 = vsel %vm825_vm0, %v1708_v21, %v2007_v42 }
 0x324   :  { %3057 = vmatprep.mubr.msk.f32.mxu1 %vm2133_vm1, %v2065_v20  ;;  %v1928_v27 = vsel %vm1703_vm12, %v5211_v62, %v1864_v63  ;;  %v2074_v54 = vsel %vm825_vm0, %v1709_v58, %v2015_v31 }
 0x325   :  { %v1862_v49 = vpop.permute.xlu0 %1861  ;;  %v2031_v22 = vrot.slane %v1928_v27, 2 }
 0x326   :  { %v1927_v3 = vsel %vm1703_vm12, %v5205_v57, %v1862_v49 }
 0x327   :  { %3058 = vmatmul.mubr.msk.f32.gmra.mrb[18].mxu1 %vm2133_vm1, %v2068_v11  ;;  %v2023_v45 = vrot.slane %v1927_v3, 2  ;;  %v1667_v35 = vpop.permute.xlu1 %1666 }
 0x328   :  { %3060 = vmatprep.mubr.msk.f32.mxu1 %vm2133_vm1, %v2071_v24  ;;  %v1711_v6 = vsel %vm1703_vm12, %v5221_v34, %v1667_v35 }
 0x329   :  { %v1665_v8 = vpop.permute.xlu0 %1664  ;;  %v2080_v25 = vsel %vm825_vm0, %v1711_v6, %v2031_v22 }
 0x32a   :  { %v1710_v57 = vsel %vm1703_vm12, %v5209_v43, %v1665_v8 }
 0x32b   :  { %v2077_v40 = vsel %vm825_vm0, %v1710_v57, %v2023_v45  ;;  %3061 = vmatmul.mubr.msk.f32.gmra.mrb[20].mxu1 %vm2133_vm1, %v2074_v54  ;;  %vm2457_vm0 = vcmask 1041409  }
 0x32c   :  { %3063 = vmatprep.mubr.msk.f32.mxu1 %vm2133_vm1, %v2077_v40 }
 0x32f   :  { %3064 = vmatmul.mubr.msk.f32.gmra.mrb[22].mxu1 %vm2133_vm1, %v2080_v25 }
 0x381   :  { %v2914_v62 = vpop.f32.mrb[0].mxu1 }
 0x382   :  { %v2915_v23 = vpop.f32.mrb[1].mxu1 }
 0x383   :  { %v2916_v55 = vadd.f32 %v2915_v23, %v2914_v62 }
 0x385   :  { %v2225_v38 = vadd.f32 %v2916_v55, %v2870_v26 }
 0x388   :  { %v2917_v43 = vpop.f32.mrb[2].mxu1 }
 0x389   :  { %v2918_v19 = vpop.f32.mrb[3].mxu1 }
 0x38a   :  { %v2919_v41 = vadd.f32 %v2918_v19, %v2917_v43 }
 0x38c   :  { %v2230_v16 = vadd.f32 %v2919_v41, %v2870_v26  ;;  %v2546_v41 = vld [vmem:[%s5498_s8 + $0x80] sm:$0xff] }
 0x39a   :  { %v2920_v1 = vpop.f32.mrb[4].mxu1 }
 0x39b   :  { %v2921_v14 = vpop.f32.mrb[5].mxu1 }
 0x39c   :  { %v2922_v0 = vadd.f32 %v2921_v14, %v2920_v1  ;;  %v2547_v1 = vld [vmem:[%s5498_s8 + $0x88] sm:$0xff]  ;;  %v2530_v14 = vld [vmem:[%s5498_s8] sm:$0xff] }
 0x39e   :  { %v2235_v4 = vadd.f32 %v2922_v0, %v2870_v26  ;;  %v3230_v0 = vpack.c.bf16 %v2547_v1, %v2546_v41 }
 0x3a0   :  { %3231 = vmatprep.subr.bf16.mxu1 %v3230_v0 }
 0x3a1   :  { %v2923_v37 = vpop.f32.mrb[6].mxu1 }
 0x3a2   :  { %v2924_v34 = vpop.f32.mrb[7].mxu1 }
 0x3a3   :  { %v2925_v51 = vadd.f32 %v2924_v34, %v2923_v37  ;;  %v2531_v37 = vld [vmem:[%s5498_s8 + $0x8] sm:$0xff]  ;;  %v2548_v34 = vld [vmem:[%s5498_s8 + $0x90] sm:$0xff] }
 0x3a5   :  { %v2240_v53 = vadd.f32 %v2925_v51, %v2870_v26  ;;  %v2549_v51 = vld [vmem:[%s5498_s8 + $0x98] sm:$0xff] }
 0x3c2   :  { %v2926_v13 = vpop.f32.mrb[8].mxu1 }
 0x3c3   :  { %v2927_v52 = vpop.f32.mrb[9].mxu1 }
 0x3c4   :  { %v2928_v56 = vadd.f32 %v2927_v52, %v2926_v13  ;;  %v3232_v13 = vpack.c.bf16 %v2531_v37, %v2530_v14  ;;  %v3234_v52 = vpack.c.bf16 %v2549_v51, %v2548_v34 }
 0x3c6   :  { %v2245_v49 = vadd.f32 %v2928_v56, %v2870_v26  ;;  %v2532_v56 = vld [vmem:[%s5498_s8 + $0x10] sm:$0xff]  ;;  %3233 = vmatpush3.bf16.msra.mxu1 %v3232_v13 }
 0x3c7   :  { %3235 = vmatprep.subr.bf16.mxu1 %v3234_v52 }
 0x3c9   :  { %v2929_v32 = vpop.f32.mrb[10].mxu1 }
 0x3ca   :  { %v2930_v61 = vpop.f32.mrb[11].mxu1 }
 0x3cb   :  { %v2931_v39 = vadd.f32 %v2930_v61, %v2929_v32  ;;  %v2533_v32 = vld [vmem:[%s5498_s8 + $0x18] sm:$0xff]  ;;  %v2550_v61 = vld [vmem:[%s5498_s8 + $0xa0] sm:$0xff] }
 0x3cd   :  { %v2250_v10 = vadd.f32 %v2931_v39, %v2870_v26  ;;  %v2551_v39 = vld [vmem:[%s5498_s8 + $0xa8] sm:$0xff] }
 0x3eb   :  { %v2932_v48 = vpop.f32.mrb[12].mxu1 }
 0x3ec   :  { %v2933_v47 = vpop.f32.mrb[13].mxu1 }
 0x3ed   :  { %v2934_v36 = vadd.f32 %v2933_v47, %v2932_v48  ;;  %v3236_v48 = vpack.c.bf16 %v2533_v32, %v2532_v56  ;;  %v3238_v47 = vpack.c.bf16 %v2551_v39, %v2550_v61 }
 0x3ef   :  { %v2255_v27 = vadd.f32 %v2934_v36, %v2870_v26  ;;  %v2534_v36 = vld [vmem:[%s5498_s8 + $0x20] sm:$0xff]  ;;  %3237 = vmatpush3.bf16.msra.mxu1 %v3236_v48 }
 0x3f0   :  { %3239 = vmatprep.subr.bf16.mxu1 %v3238_v47 }
 0x3f2   :  { %v2935_v12 = vpop.f32.mrb[14].mxu1 }
 0x3f3   :  { %v2936_v30 = vpop.f32.mrb[15].mxu1 }
 0x3f4   :  { %v2937_v15 = vadd.f32 %v2936_v30, %v2935_v12  ;;  %v2535_v12 = vld [vmem:[%s5498_s8 + $0x28] sm:$0xff]  ;;  %v2552_v30 = vld [vmem:[%s5498_s8 + $0xb0] sm:$0xff] }
 0x3f6   :  { %v3056_v7 = vpop.f32.mrb[16].mxu1  ;;  %v2260_v31 = vadd.f32 %v2937_v15, %v2870_v26  ;;  %v2553_v26 = vld [vmem:[%s5498_s8 + $0xb8] sm:$0xff]  ;;  %v3240_v15 = vpack.c.bf16 %v2535_v12, %v2534_v36 }
 0x3f7   :  { %v2335_v46 = vadd.f32 %v3056_v7, %v2230_v16  ;;  %v2329_v50 = vpop.f32.mrb[17].mxu1  ;;  %v3242_v16 = vpack.c.bf16 %v2553_v26, %v2552_v30  ;;  %v2536_v7 = vld [vmem:[%s5498_s8 + $0x30] sm:$0xff] }
 0x3f8   :  { %v2330_v28 = vadd.f32 %v2329_v50, %v2225_v38  ;;  %v2537_v38 = vld [vmem:[%s5498_s8 + $0x38] sm:$0xff]  ;;  %v2555_v50 = vld [vmem:[%s5498_s8 + $0xc8] sm:$0xff]  ;;  %3241 = vmatpush3.bf16.msra.mxu1 %v3240_v15 }
 0x3f9   :  { %v2377_v59 = vrot.slane %v2335_v46, 4  ;;  %3243 = vmatprep.subr.bf16.mxu1 %v3242_v16 }
 0x3fa   :  { %v2376_v17 = vrot.slane %v2330_v28, 4  ;;  %v3059_v60 = vpop.f32.mrb[18].mxu1 }
 0x3fb   :  { %v5292_v33 = vmax.f32 %v2335_v46, %v2377_v59  ;;  %v2345_v29 = vadd.f32 %v3059_v60, %v2240_v53  ;;  %v2339_v44 = vpop.f32.mrb[19].mxu1  ;;  %v2554_v46 = vld [vmem:[%s5498_s8 + $0xc0] sm:$0xff]  ;;  %v2556_v60 = vld [vmem:[%s5498_s8 + $0xd0] sm:$0xff] }
 0x3fc   :  { %v5294_v18 = vmax.f32 %v2330_v28, %v2376_v17  ;;  %v2340_v9 = vadd.f32 %v2339_v44, %v2235_v4  ;;  %v3244_v28 = vpack.c.bf16 %v2537_v38, %v2536_v7  ;;  %v3246_v59 = vpack.c.bf16 %v2555_v50, %v2554_v46  ;;  %v2538_v53 = vld [vmem:[%s5498_s8 + $0x40] sm:$0xff]  ;;  %v2539_v17 = vld [vmem:[%s5498_s8 + $0x48] sm:$0xff]  ;;  %v2557_v4 = vld [vmem:[%s5498_s8 + $0xd8] sm:$0xff] }
 0x3fd   :  { %v2379_v63 = vrot.slane %v2345_v29, 4  ;;  %v3250_v44 = vpack.c.bf16 %v2557_v4, %v2556_v60  ;;  %v2544_v60 = vld [vmem:[%s5498_s8 + $0x70] sm:$0xff]  ;;  %v2545_v4 = vld [vmem:[%s5498_s8 + $0x78] sm:$0xff] }
 0x3fe   :  { %v3658_v20 = vpack.i.bf16 %v5292_v33, %v5294_v18  ;;  %v2378_v5 = vrot.slane %v2340_v9, 4  ;;  %v3062_v21 = vpop.f32.mrb[20].mxu1  ;;  %3245 = vmatpush3.bf16.msra.mxu1 %v3244_v28  ;;  %v2560_v28 = vld [vmem:[%s5498_s8 + $0xf0] sm:$0xff] }
 0x3ff   :  { %v5298_v2 = vmax.f32 %v2345_v29, %v2379_v63  ;;  %v2355_v42 = vadd.f32 %v3062_v21, %v2250_v10  ;;  %v2349_v3 = vpop.f32.mrb[21].mxu1  ;;  %v3248_v29 = vpack.c.bf16 %v2539_v17, %v2538_v53  ;;  %3247 = vmatprep.subr.bf16.mxu1 %v3246_v59  ;;  %v2541_v63 = vld [vmem:[%s5498_s8 + $0x58] sm:$0xff]  ;;  %v2558_v10 = vld [vmem:[%s5498_s8 + $0xe0] sm:$0xff] }
 0x400   :  { %v5300_v11 = vmax.f32 %v2340_v9, %v2378_v5  ;;  %v2350_v58 = vadd.f32 %v2349_v3, %v2245_v49  ;;  %3659 = vrot.lane.b32.xlu0 %v3658_v20, %s3768_s7  ;;  %v2540_v9 = vld [vmem:[%s5498_s8 + $0x50] sm:$0xff]  ;;  %v2559_v20 = vld [vmem:[%s5498_s8 + $0xe8] sm:$0xff]  ;;  %v2542_v49 = vld [vmem:[%s5498_s8 + $0x60] sm:$0xff] }
 0x401   :  { %v2381_v24 = vrot.slane %v2355_v42, 4  ;;  %v3252_v5 = vpack.c.bf16 %v2541_v63, %v2540_v9  ;;  %v3254_v21 = vpack.c.bf16 %v2559_v20, %v2558_v10  ;;  %v2561_v59 = vld [vmem:[%s5498_s8 + $0xf8] sm:$0xff] }
 0x402   :  { %v3663_v45 = vpack.i.bf16 %v5298_v2, %v5300_v11  ;;  %v2380_v35 = vrot.slane %v2350_v58, 4  ;;  %v3065_v8 = vpop.f32.mrb[22].mxu1  ;;  %3249 = vmatpush3.bf16.msra.mxu1 %v3248_v29 }
 0x403   :  { %v5305_v57 = vmax.f32 %v2355_v42, %v2381_v24  ;;  %v2365_v54 = vadd.f32 %v3065_v8, %v2260_v31  ;;  %v2359_v40 = vpop.f32.mrb[23].mxu1  ;;  %3251 = vmatprep.subr.bf16.mxu1 %v3250_v44  ;;  %v2543_v42 = vld [vmem:[%s5498_s8 + $0x68] sm:$0xff] }
 0x404   :  { %v5307_v6 = vmax.f32 %v2350_v58, %v2380_v35  ;;  %v2360_v22 = vadd.f32 %v2359_v40, %v2255_v27  ;;  %3664 = vrot.lane.b32.xlu1 %v3663_v45, %s3768_s7  ;;  %v3256_v3 = vpack.c.bf16 %v2543_v42, %v2542_v49 }
 0x405   :  { %v2383_v25 = vrot.slane %v2365_v54, 4 }
 0x406   :  { %v3668_v62 = vpack.i.bf16 %v5305_v57, %v5307_v6  ;;  %v2382_v23 = vrot.slane %v2360_v22, 4  ;;  %3253 = vmatpush3.bf16.msra.mxu1 %v3252_v5 }
 0x407   :  { %v5312_v55 = vmax.f32 %v2365_v54, %v2383_v25  ;;  %3255 = vmatprep.subr.bf16.mxu1 %v3254_v21  ;;  %v3258_v21 = vpack.c.bf16 %v2561_v59, %v2560_v28  ;;  %v2648_v28 = vld [vmem:[#allocation2 + $0x40] sm:$0xff]  ;;  %v2649_v59 = vld [vmem:[#allocation2 + $0x48] sm:$0xff] }
 0x408   :  { %v5314_v43 = vmax.f32 %v2360_v22, %v2382_v23  ;;  %3669 = vrot.lane.b32.xlu0 %v3668_v62, %s3768_s7 }
 0x40a   :  { %v3673_v19 = vpack.i.bf16 %v5312_v55, %v5314_v43  ;;  %3257 = vmatpush3.bf16.msra.mxu1 %v3256_v3  ;;  %v3260_v3 = vpack.c.bf16 %v2545_v4, %v2544_v60  ;;  %v2651_v60 = vld [vmem:[#allocation2 + $0x58] sm:$0xff] }
 0x40b   :  { %3259 = vmatprep.subr.bf16.mxu1 %v3258_v21  ;;  %v2734_v21 = vld [vmem:[#allocation5] sm:$0xff] }
 0x40c   :  { %3674 = vrot.lane.b32.xlu1 %v3673_v19, %s3768_s7 }
 0x40e   :  { %3261 = vmatpush3.bf16.msra.mxu1 %v3260_v3 }
 0x472   :  { %v3660_v58 = vpop.permute.xlu0 %3659 }
 0x473   :  { %v3662_v24 = vunpack.i.h.bf16 %v3660_v58  ;;  %v3661_v31 = vunpack.i.l.bf16 %v3660_v58 }
 0x475   :  { %v2433_v45 = vmax.f32 %v5292_v33, %v3662_v24  ;;  %v2432_v35 = vmax.f32 %v5294_v18, %v3661_v31 }
 0x476   :  { %v3665_v8 = vpop.permute.xlu1 %3664 }
 0x477   :  { %v2441_v27 = vmax.f32 %v2433_v45, 0.0  ;;  %v2440_v54 = vmax.f32 %v2432_v35, 0.0  ;;  %v3667_v40 = vunpack.i.h.bf16 %v3665_v8  ;;  %v3666_v22 = vunpack.i.l.bf16 %v3665_v8 }
 0x479   :  { %v2456_v25 = vrot.slane %v2441_v27, 7  ;;  %v2496_v62 = vrot.slane %v2441_v27, 1  ;;  %v2511_v23 = vrot.slane %v2441_v27, 2  ;;  %v2478_v19 = vrot.slane %v2440_v54, 1 }
 0x47a   :  { %v2495_v41 = vrot.slane %v2440_v54, 2  ;;  %v2510_v1 = vrot.slane %v2440_v54, 3  ;;  %v2435_v14 = vmax.f32 %v5298_v2, %v3667_v40  ;;  %v2434_v0 = vmax.f32 %v5300_v11, %v3666_v22  ;;  %v3670_v37 = vpop.permute.xlu0 %3669 }
 0x47b   :  { %v2458_v33 = vsel %vm2457_vm0, %v2456_v25, %v2440_v54  ;;  %v3672_v18 = vunpack.i.h.bf16 %v3670_v37  ;;  %v3671_v34 = vunpack.i.l.bf16 %v3670_v37  ;;  %v2479_v56 = vsel %vm2457_vm0, %v2441_v27, %v2478_v19 }
 0x47c   :  { %v2443_v51 = vmax.f32 %v2435_v14, 0.0  ;;  %v2442_v13 = vmax.f32 %v2434_v0, 0.0  ;;  %v2497_v52 = vsel %vm2457_vm0, %v2496_v62, %v2495_v41  ;;  %v2512_v48 = vsel %vm2457_vm0, %v2511_v23, %v2510_v1 }
 0x47d   :  { %v2437_v32 = vmax.f32 %v5305_v57, %v3672_v18  ;;  %v2436_v61 = vmax.f32 %v5307_v6, %v3671_v34  ;;  %v3769_v25 = vmov 0.0|0.0  }
 0x47e   :  { %v2462_v2 = vrot.slane %v2443_v51, 5  ;;  %v2482_v11 = vrot.slane %v2443_v51, 6  ;;  %v2459_v39 = vrot.slane %v2442_v13, 6  ;;  %v3675_v47 = vpop.permute.xlu1 %3674  ;;  %v2480_v36 = vrot.slane %v2442_v13, 7  ;;  %3262 = vmatprep.subr.bf16.mxu1 %v3769_v25  ;;  %3286 = vmatprep.subr.bf16.mxu0 %v3769_v25 }
 0x47f   :  { %v2498_v12 = vsel %vm2460_vm2, %v2442_v13, %v2497_v52  ;;  %v2513_v30 = vrot.slane %v2442_v13, 1  ;;  %v2445_v26 = vmax.f32 %v2437_v32, 0.0  ;;  %v2444_v16 = vmax.f32 %v2436_v61, 0.0 }
 0x480   :  { %v2461_v15 = vsel %vm2460_vm2, %v2459_v39, %v2458_v33  ;;  %v3677_v7 = vunpack.i.h.bf16 %v3675_v47  ;;  %v3676_v57 = vunpack.i.l.bf16 %v3675_v47  ;;  %v2499_v38 = vrot.slane %v2443_v51, 7 }
 0x481   :  { %v2464_v6 = vsel %vm2463_vm3, %v2462_v2, %v2461_v15  ;;  %v2481_v46 = vsel %vm2460_vm2, %v2480_v36, %v2479_v56  ;;  %v2514_v50 = vsel %vm2460_vm2, %v2513_v30, %v2512_v48  ;;  %v2468_v17 = vrot.slane %v2445_v26, 3  ;;  %v2640_v2 = vld [vmem:[#allocation2] sm:$0xff]  ;;  %v2643_v15 = vld [vmem:[#allocation2 + $0x18] sm:$0xff] }
 0x482   :  { %v2483_v53 = vsel %vm2463_vm3, %v2482_v11, %v2481_v46  ;;  %v2515_v29 = vsel %vm2463_vm3, %v2443_v51, %v2514_v50  ;;  %v2465_v44 = vrot.slane %v2444_v16, 4  ;;  %v2484_v9 = vrot.slane %v2444_v16, 5  ;;  %v2641_v11 = vld [vmem:[#allocation2 + $0x8] sm:$0xff]  ;;  %v2647_v46 = vld [vmem:[#allocation2 + $0x38] sm:$0xff] }
 0x483   :  { %v2501_v63 = vrot.slane %v2444_v16, 6  ;;  %v2516_v10 = vrot.slane %v2444_v16, 7  ;;  %v2439_v20 = vmax.f32 %v5312_v55, %v3677_v7  ;;  %v2438_v5 = vmax.f32 %v5314_v43, %v3676_v57  ;;  %v2644_v7 = vld [vmem:[#allocation2 + $0x20] sm:$0xff]  ;;  %v2645_v57 = vld [vmem:[#allocation2 + $0x28] sm:$0xff] }
 0x484   :  { %v2486_v49 = vrot.slane %v2445_v26, 4  ;;  %v2503_v42 = vrot.slane %v2445_v26, 5  ;;  %v2500_v58 = vsel %vm2463_vm3, %v2499_v38, %v2498_v12  ;;  %v2518_v24 = vrot.slane %v2445_v26, 6  ;;  %v2642_v26 = vld [vmem:[#allocation2 + $0x10] sm:$0xff] }
 0x485   :  { %v2447_v31 = vmax.f32 %v2439_v20, 0.0  ;;  %v2446_v45 = vmax.f32 %v2438_v5, 0.0  ;;  %v2485_v35 = vsel %vm2466_vm4, %v2484_v9, %v2483_v53  ;;  %v2517_v8 = vsel %vm2466_vm4, %v2516_v10, %v2515_v29  ;;  %v2652_v29 = vld [vmem:[#allocation2 + $0x60] sm:$0xff]  ;;  %v2655_v10 = vld [vmem:[#allocation2 + $0x78] sm:$0xff] }
 0x486   :  { %v2502_v27 = vsel %vm2466_vm4, %v2501_v63, %v2500_v58  ;;  %v2467_v55 = vsel %vm2466_vm4, %v2465_v44, %v2464_v6  ;;  %v2487_v1 = vsel %vm2469_vm5, %v2486_v49, %v2485_v35  ;;  %v2519_v14 = vsel %vm2469_vm5, %v2518_v24, %v2517_v8  ;;  %v2646_v6 = vld [vmem:[#allocation2 + $0x30] sm:$0xff]  ;;  %v2653_v44 = vld [vmem:[#allocation2 + $0x68] sm:$0xff]  ;;  %v2737_v58 = vld [vmem:[#allocation5 + $0x18] sm:$0xff] }
 0x487   :  { %v2474_v43 = vrot.slane %v2447_v31, 1  ;;  %v2490_v54 = vrot.slane %v2447_v31, 2  ;;  %v2522_v40 = vrot.slane %v2447_v31, 4  ;;  %v2471_v22 = vrot.slane %v2446_v45, 2  ;;  %v2654_v63 = vld [vmem:[#allocation2 + $0x70] sm:$0xff]  ;;  %v2735_v49 = vld [vmem:[#allocation5 + $0x8] sm:$0xff] }
 0x488   :  { %v2488_v62 = vrot.slane %v2446_v45, 3  ;;  %v2520_v23 = vrot.slane %v2446_v45, 5  ;;  %v2504_v19 = vsel %vm2469_vm5, %v2503_v42, %v2502_v27  ;;  %v2505_v41 = vrot.slane %v2446_v45, 4  ;;  %v2736_v42 = vld [vmem:[#allocation5 + $0x10] sm:$0xff]  ;;  %v2739_v45 = vld [vmem:[#allocation5 + $0x28] sm:$0xff]  ;;  %v2741_v27 = vld [vmem:[#allocation5 + $0x38] sm:$0xff] }
 0x489   :  { %v2507_v0 = vrot.slane %v2447_v31, 3  ;;  %v2470_v37 = vsel %vm2469_vm5, %v2468_v17, %v2467_v55  ;;  %v3263_v36 = vpack.c.bf16 %v2641_v11, %v2640_v2  ;;  %v3266_v16 = vpack.c.bf16 %v2643_v15, %v2642_v26  ;;  %v2650_v17 = vld [vmem:[#allocation2 + $0x50] sm:$0xff]  ;;  %v2738_v31 = vld [vmem:[#allocation5 + $0x20] sm:$0xff] }
 0x48a   :  { %v2489_v33 = vsel %vm2472_vm6, %v2488_v62, %v2487_v1  ;;  %v2521_v18 = vsel %vm2472_vm6, %v2520_v23, %v2519_v14  ;;  %v2506_v34 = vsel %vm2472_vm6, %v2505_v41, %v2504_v19  ;;  %v2473_v51 = vsel %vm2472_vm6, %v2471_v22, %v2470_v37  ;;  %v2740_v8 = vld [vmem:[#allocation5 + $0x30] sm:$0xff]  ;;  %v2745_v62 = vld [vmem:[#allocation5 + $0x58] sm:$0xff]  ;;  %v2746_v19 = vld [vmem:[#allocation5 + $0x60] sm:$0xff] }
 0x48b   :  { %v2491_v13 = vsel %vm2475_vm7, %v2490_v54, %v2489_v33  ;;  %v2523_v52 = vsel %vm2475_vm7, %v2522_v40, %v2521_v18  ;;  %v2508_v56 = vsel %vm2475_vm7, %v2507_v0, %v2506_v34  ;;  %v2476_v32 = vsel %vm2475_vm7, %v2474_v43, %v2473_v51  ;;  %v2742_v43 = vld [vmem:[#allocation5 + $0x40] sm:$0xff]  ;;  %v2743_v54 = vld [vmem:[#allocation5 + $0x48] sm:$0xff]  ;;  %v2744_v22 = vld [vmem:[#allocation5 + $0x50] sm:$0xff] }
 0x48c   :  { %v3678_v61 = vpack.i.bf16 %v2491_v13, %v2523_v52  ;;  %v3269_v38 = vpack.c.bf16 %v2645_v57, %v2644_v7  ;;  %v3272_v50 = vpack.c.bf16 %v2647_v46, %v2646_v6  ;;  %v3275_v53 = vpack.c.bf16 %v2649_v59, %v2648_v28  ;;  %v2747_v41 = vld [vmem:[#allocation5 + $0x68] sm:$0xff]  ;;  %v2748_v14 = vld [vmem:[#allocation5 + $0x70] sm:$0xff]  ;;  %v2749_v0 = vld [vmem:[#allocation5 + $0x78] sm:$0xff] }
 0x48d   :  { %v3278_v4 = vpack.c.bf16 %v2651_v60, %v2650_v17  ;;  %v3281_v9 = vpack.c.bf16 %v2653_v44, %v2652_v29  ;;  %v3284_v20 = vpack.c.bf16 %v2655_v10, %v2654_v63  ;;  %v3771_v5 = vmov 0.0   ;;  %v2879_v18 = vld [vmem:[%s5499_s9] ss:$0 sm:$0xff]  ;;  %s2834_s9 = sshll.u32 %s3772_s1, 4  ;;  %s2835_s9 = int_to_ptr.vmem [resolvable:$true] %s2834_s9 }
 0x48e   :  { %3679 = vrot.lane.b32.xlu0 %v3678_v61, %s3768_s7  ;;  %3133 = vmatprep.mubr.msk.f32.mxu0 %vm3770_vm9, %v3771_v5  ;;  %v3287_v3 = vpack.c.bf16 %v2735_v49, %v2734_v21  ;;  %v3290_v24 = vpack.c.bf16 %v2737_v58, %v2736_v42  ;;  %v3293_v35 = vpack.c.bf16 %v2739_v45, %v2738_v31  ;;  %s3727_s3 = scalar_lea.vmem %s2835_s9, 128  ;;  %p3732_p3 = scmp.lt.s32.totalorder %s2835_s9, %s2835_s9 }
 0x48f   :  { %v3296_v55 = vpack.c.bf16 %v2741_v27, %v2740_v8  ;;  %v3299_v40 = vpack.c.bf16 %v2743_v54, %v2742_v43  ;;  %v3302_v23 = vpack.c.bf16 %v2745_v62, %v2744_v22  ;;  %v3305_v1 = vpack.c.bf16 %v2747_v41, %v2746_v19  ;;  %p3728_p2 = scmp.ne.s32.totalorder %s2835_s9, %s3727_s3  ;;  %p3733_p4 = scmp.lt.s32.totalorder %s3727_s3, %s3727_s3 }
 0x490   :  { %3288 = vmatpush3.bf16.msra.mxu0 %v3287_v3  ;;  %v3308_v37 = vpack.c.bf16 %v2749_v0, %v2748_v14 }
 0x491   :  { %3289 = vmatprep.subr.bf16.mxu0 %v3769_v25  ;;  %p3734_p5 = por %p3733_p4, %p3732_p3 }
 0x493   :  { %p3735_p6 = pnand %p3734_p5, %p3728_p2 }
 0x494   :  { %3291 = vmatpush3.bf16.msra.mxu0 %v3290_v24 }
 0x495   :  { %3292 = vmatprep.subr.bf16.mxu0 %v3769_v25 }
 0x498   :  { %3294 = vmatpush3.bf16.msra.mxu0 %v3293_v35 }
 0x499   :  { %3295 = vmatprep.subr.bf16.mxu0 %v3769_v25 }
 0x49c   :  { %3297 = vmatpush3.bf16.msra.mxu0 %v3296_v55 }
 0x49d   :  { %3298 = vmatprep.subr.bf16.mxu0 %v3769_v25 }
 0x4a0   :  { %3300 = vmatpush3.bf16.msra.mxu0 %v3299_v40 }
 0x4a1   :  { %3301 = vmatprep.subr.bf16.mxu0 %v3769_v25 }
 0x4a4   :  { %3303 = vmatpush3.bf16.msra.mxu0 %v3302_v23 }
 0x4a5   :  { %3304 = vmatprep.subr.bf16.mxu0 %v3769_v25 }
 0x4a8   :  { %3306 = vmatpush3.bf16.msra.mxu0 %v3305_v1 }
 0x4a9   :  { %3307 = vmatprep.subr.bf16.mxu0 %v3769_v25 }
 0x4ac   :  { %3309 = vmatpush3.bf16.msra.mxu0 %v3308_v37 }
 0x500   :  { %v3680_v39 = vpop.permute.xlu0 %3679 }
 0x501   :  { %v3682_v48 = vunpack.i.h.bf16 %v3680_v39  ;;  %v3681_v47 = vunpack.i.l.bf16 %v3680_v39 }
 0x503   :  { %v2529_v12 = vsel %vm2527_vm8, %v2508_v56, %v3681_v47  ;;  %v2528_v30 = vsel %vm2527_vm8, %v2476_v32, %v3682_v48  ;;  %v2880_v56 = vld [vmem:[%s5501_s11] ss:$0 sm:$0xff] }
 0x504   :  { %2633 = vmatprep.mubr.f32.mxu1 %v2529_v12 }
 0x505   :  { %2634 = vmatmul.mubr.f32.vlgmr.msra.gmra.mrb[24].mxu1 %v2528_v30 }
 0x506   :  { %3264 = vmatpush3.bf16.msra.mxu1 %v3263_v36  ;;  %3098 = vmatprep.mubr.msk.f32.mxu1 %vm3770_vm9, %v3771_v5 }
 0x507   :  { %3265 = vmatprep.subr.bf16.mxu1 %v3769_v25 }
 0x50a   :  { %3267 = vmatpush3.bf16.msra.mxu1 %v3266_v16 }
 0x50b   :  { %3268 = vmatprep.subr.bf16.mxu1 %v3769_v25 }
 0x50e   :  { %3270 = vmatpush3.bf16.msra.mxu1 %v3269_v38 }
 0x50f   :  { %3271 = vmatprep.subr.bf16.mxu1 %v3769_v25 }
 0x512   :  { %3273 = vmatpush3.bf16.msra.mxu1 %v3272_v50 }
 0x513   :  { %3274 = vmatprep.subr.bf16.mxu1 %v3769_v25 }
 0x516   :  { %3276 = vmatpush3.bf16.msra.mxu1 %v3275_v53 }
 0x517   :  { %3277 = vmatprep.subr.bf16.mxu1 %v3769_v25 }
 0x51a   :  { %3279 = vmatpush3.bf16.msra.mxu1 %v3278_v4 }
 0x51b   :  { %3280 = vmatprep.subr.bf16.mxu1 %v3769_v25 }
 0x51e   :  { %3282 = vmatpush3.bf16.msra.mxu1 %v3281_v9 }
 0x51f   :  { %3283 = vmatprep.subr.bf16.mxu1 %v3769_v25  ;;  %v2881_v25 = vld [vmem:[%s5503_s13] ss:$0 sm:$0xff] }
 0x522   :  { %3285 = vmatpush3.bf16.msra.mxu1 %v3284_v20 }
 0x5d8   :  { %v2991_v33 = vpop.f32.mrb[24].mxu1 }
 0x5d9   :  { %v2992_v34 = vpop.f32.mrb[25].mxu1 }
 0x5da   :  { %v2993_v51 = vadd.f32 %v2992_v34, %v2991_v33 }
 0x5dc   :  { %v2636_v13 = vadd.f32 %v2993_v51, %v2879_v18 }
 0x5de   :  { %v2639_v52 = vmax.f32 %v2636_v13, 0.0 }
 0x5e0   :  { %3099 = vmatmul.mubr.f32.vlgmr.msra.gmra.mrb[26].mxu1 %v2639_v52 }
 0x6b3   :  { %v2729_v32 = vpop.f32.mrb[26].mxu1 }
 0x6b4   :  { %v2730_v61 = vadd.f32 %v2880_v56, %v2729_v32  ;;  %v3100_v2 = vpop.f32.mrb[27].mxu1 }
 0x6b6   :  { %v2733_v11 = vmax.f32 %v2730_v61, 0.0 }
 0x6b8   :  { %3134 = vmatmul.mubr.f32.vlgmr.msra.gmra.mrb[48].mxu0 %v2733_v11 }
 0x78b   :  { %v2823_v39 = vpop.f32.mrb[48].mxu0 }
 0x78c   :  { %v2824_v48 = vadd.f32 %v2881_v25, %v2823_v39  ;;  %v3135_v47 = vpop.f32.mrb[49].mxu0 }
 0x78e   :  { %2827 = vst [vmem:[#allocation7] sm:$0xff] %v2824_v48 }
 0x78f   :  { %3738 = shalt.err (!%p3735_p6)
}
 0x790   :  { %s3739_s17 = scalar_lea.hbm %s5504_s14, 128 }
 0x791   :  { %p3740_p7 = scmp.ne.s32.totalorder %s5504_s14, %s3739_s17  ;;  %p3743_p8 = scmp.lt.u32.totalorder %s3739_s17, %s5504_s14 }
 0x793   :  { %p3745_p9 = pnand %p3743_p8, %p3740_p7 }
 0x795   :  { %3748 = shalt.err (!%p3745_p9)
}
 0x796   :  { %2837 = dma.vmem_to_hbm [thread:$0]  %s2835_s9, 128, %s5504_s14, [#allocation4]  }
 0x797   :  { %3753 = dma.done.wait [#allocation4], 128  }
 0x798   :  { %3754 = vsyncadd [#allocation4], 4294967168 }
 0x799   :  { %2841 = vsyncpa [#allocation3], 1 }
 0x79a   :  { %2842 = vsyncpa [#allocation6], 1 }
 0x79b   :  { %2843 = vsyncpa [#allocation4], 1 }

</bundles_post_ra>
